<compile_context>
chip_gen: v5e
topology: v5e:2x2
jax: 0.10.0
libtpu: 0.0.40
codegen_flags: <defaults>
</compile_context>

<pallas_src>
import math
import functools

import jax
import jax.numpy as jnp
from jax.experimental import pallas as pl
from jax.experimental.pallas import tpu as pltpu


# ------------------------- in-kernel helper math ----------------------------

def _layernorm(x, g, b):
    mean = jnp.mean(x, axis=-1, keepdims=True)
    c = x - mean
    var = jnp.mean(c * c, axis=-1, keepdims=True)
    return c * jax.lax.rsqrt(var + 1e-5) * g + b


def _softplus(x):
    # PyTorch Softplus(beta=1, threshold=20), overflow-safe formulation.
    sp = jnp.maximum(x, 0.0) + jnp.log(1.0 + jnp.exp(-jnp.abs(x)))
    return jnp.where(x > 20.0, x, sp)


def _mha(q, k, v, w_o, b_o, *, nhead, causal):
    """Multi-head attention + folded per-head output projection (all in VMEM).

    q: (Sq, D); k, v: (Skv, D); w_o: (D, D) pre-transposed; b_o: (1, D).
    concat_h(ctx_h) @ W == sum_h ctx_h @ W[h*hd:(h+1)*hd, :].
    """
    Sq, D = q.shape
    Skv = k.shape[0]
    hd = D // nhead
    scale = 1.0 / math.sqrt(hd)
    if causal:
        row = jax.lax.broadcasted_iota(jnp.int32, (Sq, Skv), 0)
        col = jax.lax.broadcasted_iota(jnp.int32, (Sq, Skv), 1)
        allowed = col <= row
    acc = jnp.zeros((Sq, D), jnp.float32)
    for h in range(nhead):                       # static unroll (nhead = 4)
        sl = slice(h * hd, (h + 1) * hd)
        s = jax.lax.dot_general(q[:, sl], k[:, sl], (((1,), (1,)), ((), ())),
                                preferred_element_type=jnp.float32) * scale
        if causal:
            s = jnp.where(allowed, s, -1e30)
        s = s - jnp.max(s, axis=-1, keepdims=True)
        p = jnp.exp(s)
        p = p * pl.reciprocal(jnp.sum(p, axis=-1, keepdims=True), approx=True)
        ctx = jnp.dot(p, v[:, sl], preferred_element_type=jnp.float32)
        acc = acc + jnp.dot(ctx, w_o[sl, :], preferred_element_type=jnp.float32)
    return acc + b_o


# ------------------------------ fused kernel --------------------------------
#
# Bias / LayerNorm vector packing (row indices):
#   g_vD  (7, D):  0 b_emb | 1 encn_g | 2 encn_b | 3 b_z | 4 b_temb | 5 decn_g | 6 decn_b
#   g_vL  (2, L):  0 b_mu  | 1 b_ln_var
#   enc_vD (nE, 9, D):  0 bq 1 bk 2 bv 3 bo 4 ln1_g 5 ln1_b 6 ff_b2 7 ln2_g 8 ln2_b
#   dec_vD (nD, 15, D): 0 sbq 1 sbk 2 sbv 3 sbo 4 ln1_g 5 ln1_b
#                       6 cbq 7 cbk 8 cbv 9 cbo 10 ln2_g 11 ln2_b
#                       12 ff_b2 13 ln3_g 14 ln3_b

def _vtf_kernel(src_ref, tgt_ref, eps_ref,
                w_emb_ref, g_vD_ref, g_vL_ref, b_out_ref,
                w_mu_ref, w_lv_ref, w_z_ref, w_temb_ref, w_out_ref,
                enc_qkvo_ref, enc_w1_ref, enc_w2_ref, enc_vD_ref, enc_b1_ref,
                dec_sqkvo_ref, dec_cqkvo_ref, dec_w1_ref, dec_w2_ref,
                dec_vD_ref, dec_b1_ref,
                out_ref,
                *, nhead, n_enc, n_dec):
    f32 = jnp.float32
    lin = lambda x, w, b: jnp.dot(x, w, preferred_element_type=f32) + b

    # ------------------------------ encoder ---------------------------------
    x = lin(src_ref[...], w_emb_ref[...], g_vD_ref[0:1, :])
    for l in range(n_enc):                                     # static unroll
        q = lin(x, enc_qkvo_ref[l, 0], enc_vD_ref[l, 0:1, :])
        k = lin(x, enc_qkvo_ref[l, 1], enc_vD_ref[l, 1:2, :])
        v = lin(x, enc_qkvo_ref[l, 2], enc_vD_ref[l, 2:3, :])
        attn = _mha(q, k, v, enc_qkvo_ref[l, 3], enc_vD_ref[l, 3:4, :],
                    nhead=nhead, causal=False)
        # TODO(synk): dropout (p=0.5) treated as identity (eval-mode semantics).
        x = _layernorm(x + attn, enc_vD_ref[l, 4:5, :], enc_vD_ref[l, 5:6, :])
        h = jnp.maximum(lin(x, enc_w1_ref[l], enc_b1_ref[l]), 0.0)
        x = _layernorm(x + lin(h, enc_w2_ref[l], enc_vD_ref[l, 6:7, :]),
                       enc_vD_ref[l, 7:8, :], enc_vD_ref[l, 8:9, :])
    xe = _layernorm(x, g_vD_ref[1:2, :], g_vD_ref[2:3, :])

    # latent: MultivariateNormal(mu, diag(softplus(ln_var)+eps)).rsample()
    mu = lin(xe, w_mu_ref[...], g_vL_ref[0:1, :])
    scale = _softplus(lin(xe, w_lv_ref[...], g_vL_ref[1:2, :])) + 1e-8
    z = mu + scale * eps_ref[...]
    # TODO(synk): self.kl_loss is a stored side-effect attribute, not part of
    # forward()'s return value; it is not computed here.
    mem = lin(z, w_z_ref[...], g_vD_ref[3:4, :])       # cross-attn memory, VMEM only

    # ------------------------------ decoder ---------------------------------
    y = lin(tgt_ref[...], w_temb_ref[...], g_vD_ref[4:5, :])
    for l in range(n_dec):                                     # static unroll
        # Causal self-attention (mask generated in-kernel via iota).
        # TODO(synk): arbitrary user-supplied tgt_mask is not supported; the
        # causal mask matching get_tgt_mask(T) is baked in.
        q = lin(y, dec_sqkvo_ref[l, 0], dec_vD_ref[l, 0:1, :])
        k = lin(y, dec_sqkvo_ref[l, 1], dec_vD_ref[l, 1:2, :])
        v = lin(y, dec_sqkvo_ref[l, 2], dec_vD_ref[l, 2:3, :])
        attn = _mha(q, k, v, dec_sqkvo_ref[l, 3], dec_vD_ref[l, 3:4, :],
                    nhead=nhead, causal=True)
        y = _layernorm(y + attn, dec_vD_ref[l, 4:5, :], dec_vD_ref[l, 5:6, :])
        # Cross-attention against the VMEM-resident memory.
        qc = lin(y, dec_cqkvo_ref[l, 0], dec_vD_ref[l, 6:7, :])
        kc = lin(mem, dec_cqkvo_ref[l, 1], dec_vD_ref[l, 7:8, :])
        vc = lin(mem, dec_cqkvo_ref[l, 2], dec_vD_ref[l, 8:9, :])
        cattn = _mha(qc, kc, vc, dec_cqkvo_ref[l, 3], dec_vD_ref[l, 9:10, :],
                     nhead=nhead, causal=False)
        y = _layernorm(y + cattn, dec_vD_ref[l, 10:11, :], dec_vD_ref[l, 11:12, :])
        # Feed-forward (ReLU, PyTorch default activation).
        h = jnp.maximum(lin(y, dec_w1_ref[l], dec_b1_ref[l]), 0.0)
        y = _layernorm(y + lin(h, dec_w2_ref[l], dec_vD_ref[l, 12:13, :]),
                       dec_vD_ref[l, 13:14, :], dec_vD_ref[l, 14:15, :])
    yd = _layernorm(y, g_vD_ref[5:6, :], g_vD_ref[6:7, :])
    out_ref[...] = lin(yd, w_out_ref[...], b_out_ref[...])


# ------------------------------ pallas wrapper -------------------------------

_WEIGHT_ORDER = ("w_emb", "g_vD", "g_vL", "b_out", "w_mu", "w_lv", "w_z",
                 "w_temb", "w_out",
                 "enc_qkvo", "enc_w1", "enc_w2", "enc_vD", "enc_b1",
                 "dec_sqkvo", "dec_cqkvo", "dec_w1", "dec_w2", "dec_vD", "dec_b1")


@functools.partial(jax.jit, static_argnames=("nhead",))
def variational_transformer_forward(packed, src, tgt, noise, *, nhead):
    S, B, d_in = src.shape
    T, _, d_out = tgt.shape
    L = packed["w_z"].shape[0]
    n_enc = packed["enc_qkvo"].shape[0]
    n_dec = packed["dec_sqkvo"].shape[0]

    # Boundary transposes to batch-major layout (cheap KB-scale XLA ops).
    srcb = jnp.transpose(src, (1, 0, 2))     # (B, S, d_in)
    tgtb = jnp.transpose(tgt, (1, 0, 2))     # (B, T, d_out)
    epsb = jnp.transpose(noise, (1, 0, 2))   # (B, S, L)

    kern = functools.partial(_vtf_kernel, nhead=nhead, n_enc=n_enc, n_dec=n_dec)

    def whole(a):
        # Whole-array, VMEM-resident block (constant index map -> DMA'd once).
        return pl.BlockSpec(a.shape, lambda b, _nd=a.ndim: (0,) * _nd)

    def per_batch(trail):
        # Squeezed leading batch dim: kernel sees a 2-D ref directly.
        return pl.BlockSpec((None,) + tuple(trail),
                            lambda b, _nt=len(trail): (b,) + (0,) * _nt)

    weights = [packed[k] for k in _WEIGHT_ORDER]

    out = pl.pallas_call(
        kern,
        out_shape=jax.ShapeDtypeStruct((B, T, d_out), jnp.float32),
        grid=(B,),
        in_specs=[per_batch((S, d_in)),       # src
                  per_batch((T, d_out)),      # tgt
                  per_batch((S, L))]          # eps (rsample noise)
                 + [whole(w) for w in weights],
        out_specs=per_batch((T, d_out)),
        compiler_params=pltpu.CompilerParams(
            dimension_semantics=("parallel",)),   # batch axis -> dual TC on v7x
    )(srcb, tgtb, epsb, *weights)
    return jnp.transpose(out, (1, 0, 2))          # back to (T, B, d_out)


def get_tgt_mask(size):
    tri = jnp.tril(jnp.ones((size, size), dtype=bool))
    return jnp.where(tri, 0.0, -jnp.inf).astype(jnp.float32)


# ------------------------- parameter init & packing --------------------------

def init_params(key, d_input, d_output, d_embed, d_latent,
                num_encoder_layers, num_decoder_layers, dim_feedforward):
    keys = iter(jax.random.split(key, 128))

    def unif(shape, scale=0.1):
        return jax.random.uniform(next(keys), shape, jnp.float32, -scale, scale)

    zeros = lambda shape: jnp.zeros(shape, jnp.float32)
    ones = lambda shape: jnp.ones(shape, jnp.float32)

    def attn():
        return (unif((3 * d_embed, d_embed)), zeros((3 * d_embed,)),
                unif((d_embed, d_embed)), zeros((d_embed,)))

    def enc_layer_params():
        iw, ib, ow, ob = attn()
        return {"sa_in_w": iw, "sa_in_b": ib, "sa_out_w": ow, "sa_out_b": ob,
                "ff_w1": unif((dim_feedforward, d_embed)), "ff_b1": zeros((dim_feedforward,)),
                "ff_w2": unif((d_embed, dim_feedforward)), "ff_b2": zeros((d_embed,)),
                "ln1_g": ones((d_embed,)), "ln1_b": zeros((d_embed,)),
                "ln2_g": ones((d_embed,)), "ln2_b": zeros((d_embed,))}

    def dec_layer_params():
        siw, sib, sow, sob = attn()
        ciw, cib, cow, cob = attn()
        return {"sa_in_w": siw, "sa_in_b": sib, "sa_out_w": sow, "sa_out_b": sob,
                "ca_in_w": ciw, "ca_in_b": cib, "ca_out_w": cow, "ca_out_b": cob,
                "ff_w1": unif((dim_feedforward, d_embed)), "ff_b1": zeros((dim_feedforward,)),
                "ff_w2": unif((d_embed, dim_feedforward)), "ff_b2": zeros((d_embed,)),
                "ln1_g": ones((d_embed,)), "ln1_b": zeros((d_embed,)),
                "ln2_g": ones((d_embed,)), "ln2_b": zeros((d_embed,)),
                "ln3_g": ones((d_embed,)), "ln3_b": zeros((d_embed,))}

    return {
        "input_embedding": {"w": unif((d_embed, d_input)), "b": zeros((d_embed,))},
        "encoder_layers": [enc_layer_params() for _ in range(num_encoder_layers)],
        "encoder_norm": {"g": ones((d_embed,)), "b": zeros((d_embed,))},
        "encoder_mu": {"w": unif((d_latent, d_embed)), "b": zeros((d_latent,))},
        "encoder_ln_var": {"w": unif((d_latent, d_embed)), "b": zeros((d_latent,))},
        "decoder_z": {"w": unif((d_embed, d_latent)), "b": zeros((d_embed,))},
        "target_embedding": {"w": unif((d_embed, d_output)), "b": zeros((d_embed,))},
        "decoder_layers": [dec_layer_params() for _ in range(num_decoder_layers)],
        "decoder_norm": {"g": ones((d_embed,)), "b": zeros((d_embed,))},
        "output_converter": {"w": unif((d_output, d_embed)), "b": zeros((d_output,))},
    }


def pack_params(params):
    """One-time pre-transpose + stacking + small-vector packing of all weights."""
    D = params["input_embedding"]["w"].shape[0]
    t = lambda w: w.T

    def qkvo(in_w, out_w):
        # PyTorch in_proj_weight rows = [Wq; Wk; Wv]; pre-transpose for x @ W.
        return jnp.stack([t(in_w[:D]), t(in_w[D:2 * D]), t(in_w[2 * D:]), t(out_w)])

    enc = params["encoder_layers"]
    dec = params["decoder_layers"]

    enc_vD = jnp.stack([jnp.stack([
        p["sa_in_b"][:D], p["sa_in_b"][D:2 * D], p["sa_in_b"][2 * D:],
        p["sa_out_b"], p["ln1_g"], p["ln1_b"],
        p["ff_b2"], p["ln2_g"], p["ln2_b"]]) for p in enc])

    dec_vD = jnp.stack([jnp.stack([
        p["sa_in_b"][:D], p["sa_in_b"][D:2 * D], p["sa_in_b"][2 * D:], p["sa_out_b"],
        p["ln1_g"], p["ln1_b"],
        p["ca_in_b"][:D], p["ca_in_b"][D:2 * D], p["ca_in_b"][2 * D:], p["ca_out_b"],
        p["ln2_g"], p["ln2_b"],
        p["ff_b2"], p["ln3_g"], p["ln3_b"]]) for p in dec])

    g_vD = jnp.stack([params["input_embedding"]["b"],
                      params["encoder_norm"]["g"], params["encoder_norm"]["b"],
                      params["decoder_z"]["b"],
                      params["target_embedding"]["b"],
                      params["decoder_norm"]["g"], params["decoder_norm"]["b"]])
    g_vL = jnp.stack([params["encoder_mu"]["b"], params["encoder_ln_var"]["b"]])

    return {
        "w_emb": t(params["input_embedding"]["w"]),
        "g_vD": g_vD,
        "g_vL": g_vL,
        "b_out": params["output_converter"]["b"].reshape(1, -1),
        "w_mu": t(params["encoder_mu"]["w"]),
        "w_lv": t(params["encoder_ln_var"]["w"]),
        "w_z": t(params["decoder_z"]["w"]),
        "w_temb": t(params["target_embedding"]["w"]),
        "w_out": t(params["output_converter"]["w"]),
        "enc_qkvo": jnp.stack([qkvo(p["sa_in_w"], p["sa_out_w"]) for p in enc]),
        "enc_w1": jnp.stack([t(p["ff_w1"]) for p in enc]),
        "enc_w2": jnp.stack([t(p["ff_w2"]) for p in enc]),
        "enc_vD": enc_vD,
        "enc_b1": jnp.stack([p["ff_b1"].reshape(1, -1) for p in enc]),
        "dec_sqkvo": jnp.stack([qkvo(p["sa_in_w"], p["sa_out_w"]) for p in dec]),
        "dec_cqkvo": jnp.stack([qkvo(p["ca_in_w"], p["ca_out_w"]) for p in dec]),
        "dec_w1": jnp.stack([t(p["ff_w1"]) for p in dec]),
        "dec_w2": jnp.stack([t(p["ff_w2"]) for p in dec]),
        "dec_vD": dec_vD,
        "dec_b1": jnp.stack([p["ff_b1"].reshape(1, -1) for p in dec]),
    }


# ------------------------- pure-JAX reference (check) -------------------------

def _ref_forward(params, src, tgt, noise, nhead):
    linear = lambda x, w, b: x @ w.T + b

    def ln(x, g, b):
        m = x.mean(-1, keepdims=True)
        v = ((x - m) ** 2).mean(-1, keepdims=True)
        return (x - m) / jnp.sqrt(v + 1e-5) * g + b

    def mha(xq, xkv, in_w, in_b, ow, ob, mask):
        Sq, B, D = xq.shape
        Skv = xkv.shape[0]
        hd = D // nhead
        q = linear(xq, in_w[:D], in_b[:D])
        k = linear(xkv, in_w[D:2 * D], in_b[D:2 * D])
        v = linear(xkv, in_w[2 * D:], in_b[2 * D:])
        q = q.reshape(Sq, B, nhead, hd).transpose(1, 2, 0, 3)
        k = k.reshape(Skv, B, nhead, hd).transpose(1, 2, 0, 3)
        v = v.reshape(Skv, B, nhead, hd).transpose(1, 2, 0, 3)
        s = jnp.einsum("bhqd,bhkd->bhqk", q, k) / math.sqrt(hd)
        if mask is not None:
            s = s + mask
        p = jax.nn.softmax(s, axis=-1)
        ctx = jnp.einsum("bhqk,bhkd->bhqd", p, v)
        ctx = ctx.transpose(2, 0, 1, 3).reshape(Sq, B, D)
        return linear(ctx, ow, ob)

    x = linear(src, params["input_embedding"]["w"], params["input_embedding"]["b"])
    for p in params["encoder_layers"]:
        a = mha(x, x, p["sa_in_w"], p["sa_in_b"], p["sa_out_w"], p["sa_out_b"], None)
        x = ln(x + a, p["ln1_g"], p["ln1_b"])
        h = jnp.maximum(linear(x, p["ff_w1"], p["ff_b1"]), 0.0)
        x = ln(x + linear(h, p["ff_w2"], p["ff_b2"]), p["ln2_g"], p["ln2_b"])
    mem = ln(x, params["encoder_norm"]["g"], params["encoder_norm"]["b"])
    mu = linear(mem, params["encoder_mu"]["w"], params["encoder_mu"]["b"])
    lv = linear(mem, params["encoder_ln_var"]["w"], params["encoder_ln_var"]["b"])
    z = mu + (_softplus(lv) + 1e-8) * noise
    dec_mem = linear(z, params["decoder_z"]["w"], params["decoder_z"]["b"])

    T = tgt.shape[0]
    mask = get_tgt_mask(T)
    y = linear(tgt, params["target_embedding"]["w"], params["target_embedding"]["b"])
    for p in params["decoder_layers"]:
        a = mha(y, y, p["sa_in_w"], p["sa_in_b"], p["sa_out_w"], p["sa_out_b"], mask)
        y = ln(y + a, p["ln1_g"], p["ln1_b"])
        c = mha(y, dec_mem, p["ca_in_w"], p["ca_in_b"], p["ca_out_w"], p["ca_out_b"], None)
        y = ln(y + c, p["ln2_g"], p["ln2_b"])
        h = jnp.maximum(linear(y, p["ff_w1"], p["ff_b1"]), 0.0)
        y = ln(y + linear(h, p["ff_w2"], p["ff_b2"]), p["ln3_g"], p["ln3_b"])
    y = ln(y, params["decoder_norm"]["g"], params["decoder_norm"]["b"])
    return linear(y, params["output_converter"]["w"], params["output_converter"]["b"])


# ---------------------------------- main --------------------------------------

if __name__ == "__main__":
    d_input, d_output = 4, 4
    d_embed, d_latent = 32, 16
    nhead, num_enc, num_dec, d_ff = 4, 2, 2, 64
    S, T, B = 8, 8, 2

    key = jax.random.PRNGKey(0)
    k_p, k_src, k_tgt, k_eps = jax.random.split(key, 4)

    params = init_params(k_p, d_input, d_output, d_embed, d_latent,
                         num_enc, num_dec, d_ff)
    packed = pack_params(params)

    src = jax.random.normal(k_src, (S, B, d_input), jnp.float32)
    tgt = jax.random.normal(k_tgt, (T, B, d_output), jnp.float32)
    noise = jax.random.normal(k_eps, (S, B, d_latent), jnp.float32)  # rsample eps

    out = variational_transformer_forward(packed, src, tgt, noise, nhead=nhead)
    out = jax.block_until_ready(out)

    assert out.shape == (T, B, d_output), out.shape
    assert bool(jnp.all(jnp.isfinite(out)))

    ref = _ref_forward(params, src, tgt, noise, nhead)
    # Tolerance accounts for the approx EUP reciprocal used in the softmax.
    assert bool(jnp.allclose(out, ref, atol=2e-3, rtol=1e-2)), (
        float(jnp.max(jnp.abs(out - ref))))

    print("KERNEL_OK")
</pallas_src>

<mosaic_0001>
module attributes {stable_mosaic.version = 11 : i64} {
  func.func @_vtf_kernel(%arg0: i32, %arg1: memref<1x8x4xf32, #tpu.memory_space<vmem>>, %arg2: memref<1x8x4xf32, #tpu.memory_space<vmem>>, %arg3: memref<1x8x16xf32, #tpu.memory_space<vmem>>, %arg4: memref<4x32xf32, #tpu.memory_space<vmem>>, %arg5: memref<7x32xf32, #tpu.memory_space<vmem>>, %arg6: memref<2x16xf32, #tpu.memory_space<vmem>>, %arg7: memref<1x4xf32, #tpu.memory_space<vmem>>, %arg8: memref<32x16xf32, #tpu.memory_space<vmem>>, %arg9: memref<32x16xf32, #tpu.memory_space<vmem>>, %arg10: memref<16x32xf32, #tpu.memory_space<vmem>>, %arg11: memref<4x32xf32, #tpu.memory_space<vmem>>, %arg12: memref<32x4xf32, #tpu.memory_space<vmem>>, %arg13: memref<2x4x32x32xf32, #tpu.memory_space<vmem>>, %arg14: memref<2x32x64xf32, #tpu.memory_space<vmem>>, %arg15: memref<2x64x32xf32, #tpu.memory_space<vmem>>, %arg16: memref<2x9x32xf32, #tpu.memory_space<vmem>>, %arg17: memref<2x1x64xf32, #tpu.memory_space<vmem>>, %arg18: memref<2x4x32x32xf32, #tpu.memory_space<vmem>>, %arg19: memref<2x4x32x32xf32, #tpu.memory_space<vmem>>, %arg20: memref<2x32x64xf32, #tpu.memory_space<vmem>>, %arg21: memref<2x64x32xf32, #tpu.memory_space<vmem>>, %arg22: memref<2x15x32xf32, #tpu.memory_space<vmem>>, %arg23: memref<2x1x64xf32, #tpu.memory_space<vmem>>, %arg24: memref<1x8x4xf32, #tpu.memory_space<vmem>>) attributes {dimension_semantics = [#tpu.dimension_semantics<parallel>], iteration_bounds = array<i64: 2>, scalar_prefetch = 0 : i64, scratch_operands = 0 : i64, tpu.core_type = #tpu.core_type<tc>, window_params = [{transform_indices = @transform_0, window_bounds = array<i64: 1, 8, 4>}, {transform_indices = @transform_1, window_bounds = array<i64: 1, 8, 4>}, {transform_indices = @transform_2, window_bounds = array<i64: 1, 8, 16>}, {pipeline_mode = #tpu.pipeline_mode<synchronous>, transform_indices = @transform_3, window_bounds = array<i64: 4, 32>}, {pipeline_mode = #tpu.pipeline_mode<synchronous>, transform_indices = @transform_4, window_bounds = array<i64: 7, 32>}, {pipeline_mode = #tpu.pipeline_mode<synchronous>, transform_indices = @transform_5, window_bounds = array<i64: 2, 16>}, {pipeline_mode = #tpu.pipeline_mode<synchronous>, transform_indices = @transform_6, window_bounds = array<i64: 1, 4>}, {pipeline_mode = #tpu.pipeline_mode<synchronous>, transform_indices = @transform_7, window_bounds = array<i64: 32, 16>}, {pipeline_mode = #tpu.pipeline_mode<synchronous>, transform_indices = @transform_8, window_bounds = array<i64: 32, 16>}, {pipeline_mode = #tpu.pipeline_mode<synchronous>, transform_indices = @transform_9, window_bounds = array<i64: 16, 32>}, {pipeline_mode = #tpu.pipeline_mode<synchronous>, transform_indices = @transform_10, window_bounds = array<i64: 4, 32>}, {pipeline_mode = #tpu.pipeline_mode<synchronous>, transform_indices = @transform_11, window_bounds = array<i64: 32, 4>}, {pipeline_mode = #tpu.pipeline_mode<synchronous>, transform_indices = @transform_12, window_bounds = array<i64: 2, 4, 32, 32>}, {pipeline_mode = #tpu.pipeline_mode<synchronous>, transform_indices = @transform_13, window_bounds = array<i64: 2, 32, 64>}, {pipeline_mode = #tpu.pipeline_mode<synchronous>, transform_indices = @transform_14, window_bounds = array<i64: 2, 64, 32>}, {pipeline_mode = #tpu.pipeline_mode<synchronous>, transform_indices = @transform_15, window_bounds = array<i64: 2, 9, 32>}, {pipeline_mode = #tpu.pipeline_mode<synchronous>, transform_indices = @transform_16, window_bounds = array<i64: 2, 1, 64>}, {pipeline_mode = #tpu.pipeline_mode<synchronous>, transform_indices = @transform_17, window_bounds = array<i64: 2, 4, 32, 32>}, {pipeline_mode = #tpu.pipeline_mode<synchronous>, transform_indices = @transform_18, window_bounds = array<i64: 2, 4, 32, 32>}, {pipeline_mode = #tpu.pipeline_mode<synchronous>, transform_indices = @transform_19, window_bounds = array<i64: 2, 32, 64>}, {pipeline_mode = #tpu.pipeline_mode<synchronous>, transform_indices = @transform_20, window_bounds = array<i64: 2, 64, 32>}, {pipeline_mode = #tpu.pipeline_mode<synchronous>, transform_indices = @transform_21, window_bounds = array<i64: 2, 15, 32>}, {pipeline_mode = #tpu.pipeline_mode<synchronous>, transform_indices = @transform_22, window_bounds = array<i64: 2, 1, 64>}, {transform_indices = @transform_23, window_bounds = array<i64: 1, 8, 4>}]} {
    %c0 = arith.constant 0 : index
    %c0_0 = arith.constant 0 : index
    %c0_1 = arith.constant 0 : index
    %0 = vector.load %arg1[%c0, %c0_0, %c0_1] : memref<1x8x4xf32, #tpu.memory_space<vmem>>, vector<1x8x4xf32>
    %1 = vector.shape_cast %0 : vector<1x8x4xf32> to vector<8x4xf32>
    %c0_2 = arith.constant 0 : index
    %c0_3 = arith.constant 0 : index
    %2 = vector.load %arg4[%c0_2, %c0_3] : memref<4x32xf32, #tpu.memory_space<vmem>>, vector<4x32xf32>
    %c0_4 = arith.constant 0 : index
    %c0_5 = arith.constant 0 : index
    %3 = vector.load %arg5[%c0_4, %c0_5] : memref<7x32xf32, #tpu.memory_space<vmem>>, vector<1x32xf32>
    %cst = arith.constant dense<0.000000e+00> : vector<8x32xf32>
    %4 = tpu.matmul %1, %2, %cst {dimension_numbers = #tpu.dot_dimension_numbers<[1], [0], [0], [1], [0, 0, 1, 1], [], []>} : vector<8x4xf32>, vector<4x32xf32>, vector<8x32xf32> -> vector<8x32xf32>
    %5 = vector.broadcast %3 : vector<1x32xf32> to vector<8x32xf32>
    %6 = arith.addf %4, %5 : vector<8x32xf32>
    %c0_6 = arith.constant 0 : index
    %c0_7 = arith.constant 0 : index
    %c0_8 = arith.constant 0 : index
    %c0_9 = arith.constant 0 : index
    %7 = vector.load %arg13[%c0_6, %c0_7, %c0_8, %c0_9] : memref<2x4x32x32xf32, #tpu.memory_space<vmem>>, vector<1x1x32x32xf32>
    %8 = vector.shape_cast %7 : vector<1x1x32x32xf32> to vector<32x32xf32>
    %c0_10 = arith.constant 0 : index
    %c0_11 = arith.constant 0 : index
    %c0_12 = arith.constant 0 : index
    %9 = vector.load %arg16[%c0_10, %c0_11, %c0_12] : memref<2x9x32xf32, #tpu.memory_space<vmem>>, vector<1x1x32xf32>
    %10 = vector.shape_cast %9 : vector<1x1x32xf32> to vector<1x32xf32>
    %cst_13 = arith.constant dense<0.000000e+00> : vector<8x32xf32>
    %11 = tpu.matmul %6, %8, %cst_13 {dimension_numbers = #tpu.dot_dimension_numbers<[1], [0], [0], [1], [0, 0, 1, 1], [], []>} : vector<8x32xf32>, vector<32x32xf32>, vector<8x32xf32> -> vector<8x32xf32>
    %12 = vector.broadcast %10 : vector<1x32xf32> to vector<8x32xf32>
    %13 = arith.addf %11, %12 : vector<8x32xf32>
    %c0_14 = arith.constant 0 : index
    %c1 = arith.constant 1 : index
    %c0_15 = arith.constant 0 : index
    %c0_16 = arith.constant 0 : index
    %14 = vector.load %arg13[%c0_14, %c1, %c0_15, %c0_16] : memref<2x4x32x32xf32, #tpu.memory_space<vmem>>, vector<1x1x32x32xf32>
    %15 = vector.shape_cast %14 : vector<1x1x32x32xf32> to vector<32x32xf32>
    %c0_17 = arith.constant 0 : index
    %c1_18 = arith.constant 1 : index
    %c0_19 = arith.constant 0 : index
    %16 = vector.load %arg16[%c0_17, %c1_18, %c0_19] : memref<2x9x32xf32, #tpu.memory_space<vmem>>, vector<1x1x32xf32>
    %17 = vector.shape_cast %16 : vector<1x1x32xf32> to vector<1x32xf32>
    %cst_20 = arith.constant dense<0.000000e+00> : vector<8x32xf32>
    %18 = tpu.matmul %6, %15, %cst_20 {dimension_numbers = #tpu.dot_dimension_numbers<[1], [0], [0], [1], [0, 0, 1, 1], [], []>} : vector<8x32xf32>, vector<32x32xf32>, vector<8x32xf32> -> vector<8x32xf32>
    %19 = vector.broadcast %17 : vector<1x32xf32> to vector<8x32xf32>
    %20 = arith.addf %18, %19 : vector<8x32xf32>
    %c0_21 = arith.constant 0 : index
    %c2 = arith.constant 2 : index
    %c0_22 = arith.constant 0 : index
    %c0_23 = arith.constant 0 : index
    %21 = vector.load %arg13[%c0_21, %c2, %c0_22, %c0_23] : memref<2x4x32x32xf32, #tpu.memory_space<vmem>>, vector<1x1x32x32xf32>
    %22 = vector.shape_cast %21 : vector<1x1x32x32xf32> to vector<32x32xf32>
    %c0_24 = arith.constant 0 : index
    %c2_25 = arith.constant 2 : index
    %c0_26 = arith.constant 0 : index
    %23 = vector.load %arg16[%c0_24, %c2_25, %c0_26] : memref<2x9x32xf32, #tpu.memory_space<vmem>>, vector<1x1x32xf32>
    %24 = vector.shape_cast %23 : vector<1x1x32xf32> to vector<1x32xf32>
    %cst_27 = arith.constant dense<0.000000e+00> : vector<8x32xf32>
    %25 = tpu.matmul %6, %22, %cst_27 {dimension_numbers = #tpu.dot_dimension_numbers<[1], [0], [0], [1], [0, 0, 1, 1], [], []>} : vector<8x32xf32>, vector<32x32xf32>, vector<8x32xf32> -> vector<8x32xf32>
    %26 = vector.broadcast %24 : vector<1x32xf32> to vector<8x32xf32>
    %27 = arith.addf %25, %26 : vector<8x32xf32>
    %c0_28 = arith.constant 0 : index
    %c3 = arith.constant 3 : index
    %c0_29 = arith.constant 0 : index
    %c0_30 = arith.constant 0 : index
    %28 = vector.load %arg13[%c0_28, %c3, %c0_29, %c0_30] : memref<2x4x32x32xf32, #tpu.memory_space<vmem>>, vector<1x1x32x32xf32>
    %29 = vector.shape_cast %28 : vector<1x1x32x32xf32> to vector<32x32xf32>
    %c0_31 = arith.constant 0 : index
    %c3_32 = arith.constant 3 : index
    %c0_33 = arith.constant 0 : index
    %30 = vector.load %arg16[%c0_31, %c3_32, %c0_33] : memref<2x9x32xf32, #tpu.memory_space<vmem>>, vector<1x1x32xf32>
    %31 = vector.shape_cast %30 : vector<1x1x32xf32> to vector<1x32xf32>
    %cst_34 = arith.constant 0.000000e+00 : f32
    %32 = vector.broadcast %cst_34 : f32 to vector<8x32xf32>
    %33 = vector.extract_strided_slice %13 {offsets = [0, 0], sizes = [8, 8], strides = [1, 1]} : vector<8x32xf32> to vector<8x8xf32>
    %34 = vector.extract_strided_slice %20 {offsets = [0, 0], sizes = [8, 8], strides = [1, 1]} : vector<8x32xf32> to vector<8x8xf32>
    %cst_35 = arith.constant dense<0.000000e+00> : vector<8x8xf32>
    %35 = tpu.matmul %33, %34, %cst_35 {dimension_numbers = #tpu.dot_dimension_numbers<[1], [1], [0], [0], [0, 0, 1, 0], [], []>} : vector<8x8xf32>, vector<8x8xf32>, vector<8x8xf32> -> vector<8x8xf32>
    %cst_36 = arith.constant 0.353553385 : f32
    %36 = vector.broadcast %cst_36 : f32 to vector<8x8xf32>
    %37 = arith.mulf %35, %36 : vector<8x8xf32>
    %cst_37 = arith.constant dense<0xFF800000> : vector<8xf32>
    %38 = vector.multi_reduction <maximumf>, %37, %cst_37 [1] : vector<8x8xf32> to vector<8xf32>
    %39 = vector.shape_cast %38 : vector<8xf32> to vector<8x1xf32>
    %40 = vector.broadcast %39 : vector<8x1xf32> to vector<8x8xf32>
    %41 = arith.subf %37, %40 : vector<8x8xf32>
    %42 = math.exp %41 : vector<8x8xf32>
    %cst_38 = arith.constant dense<0.000000e+00> : vector<8xf32>
    %43 = vector.multi_reduction <add>, %42, %cst_38 [1] : vector<8x8xf32> to vector<8xf32>
    %44 = vector.shape_cast %43 : vector<8xf32> to vector<8x1xf32>
    %45 = tpu.reciprocal %44 {approx = true} : vector<8x1xf32> -> vector<8x1xf32>
    %46 = vector.broadcast %45 : vector<8x1xf32> to vector<8x8xf32>
    %47 = arith.mulf %42, %46 : vector<8x8xf32>
    %48 = vector.extract_strided_slice %27 {offsets = [0, 0], sizes = [8, 8], strides = [1, 1]} : vector<8x32xf32> to vector<8x8xf32>
    %cst_39 = arith.constant dense<0.000000e+00> : vector<8x8xf32>
    %49 = tpu.matmul %47, %48, %cst_39 {dimension_numbers = #tpu.dot_dimension_numbers<[1], [0], [0], [1], [0, 0, 1, 1], [], []>} : vector<8x8xf32>, vector<8x8xf32>, vector<8x8xf32> -> vector<8x8xf32>
    %50 = vector.extract_strided_slice %29 {offsets = [0, 0], sizes = [8, 32], strides = [1, 1]} : vector<32x32xf32> to vector<8x32xf32>
    %cst_40 = arith.constant dense<0.000000e+00> : vector<8x32xf32>
    %51 = tpu.matmul %49, %50, %cst_40 {dimension_numbers = #tpu.dot_dimension_numbers<[1], [0], [0], [1], [0, 0, 1, 1], [], []>} : vector<8x8xf32>, vector<8x32xf32>, vector<8x32xf32> -> vector<8x32xf32>
    %52 = arith.addf %32, %51 : vector<8x32xf32>
    %53 = vector.extract_strided_slice %13 {offsets = [0, 8], sizes = [8, 8], strides = [1, 1]} : vector<8x32xf32> to vector<8x8xf32>
    %54 = vector.extract_strided_slice %20 {offsets = [0, 8], sizes = [8, 8], strides = [1, 1]} : vector<8x32xf32> to vector<8x8xf32>
    %cst_41 = arith.constant dense<0.000000e+00> : vector<8x8xf32>
    %55 = tpu.matmul %53, %54, %cst_41 {dimension_numbers = #tpu.dot_dimension_numbers<[1], [1], [0], [0], [0, 0, 1, 0], [], []>} : vector<8x8xf32>, vector<8x8xf32>, vector<8x8xf32> -> vector<8x8xf32>
    %cst_42 = arith.constant 0.353553385 : f32
    %56 = vector.broadcast %cst_42 : f32 to vector<8x8xf32>
    %57 = arith.mulf %55, %56 : vector<8x8xf32>
    %cst_43 = arith.constant dense<0xFF800000> : vector<8xf32>
    %58 = vector.multi_reduction <maximumf>, %57, %cst_43 [1] : vector<8x8xf32> to vector<8xf32>
    %59 = vector.shape_cast %58 : vector<8xf32> to vector<8x1xf32>
    %60 = vector.broadcast %59 : vector<8x1xf32> to vector<8x8xf32>
    %61 = arith.subf %57, %60 : vector<8x8xf32>
    %62 = math.exp %61 : vector<8x8xf32>
    %cst_44 = arith.constant dense<0.000000e+00> : vector<8xf32>
    %63 = vector.multi_reduction <add>, %62, %cst_44 [1] : vector<8x8xf32> to vector<8xf32>
    %64 = vector.shape_cast %63 : vector<8xf32> to vector<8x1xf32>
    %65 = tpu.reciprocal %64 {approx = true} : vector<8x1xf32> -> vector<8x1xf32>
    %66 = vector.broadcast %65 : vector<8x1xf32> to vector<8x8xf32>
    %67 = arith.mulf %62, %66 : vector<8x8xf32>
    %68 = vector.extract_strided_slice %27 {offsets = [0, 8], sizes = [8, 8], strides = [1, 1]} : vector<8x32xf32> to vector<8x8xf32>
    %cst_45 = arith.constant dense<0.000000e+00> : vector<8x8xf32>
    %69 = tpu.matmul %67, %68, %cst_45 {dimension_numbers = #tpu.dot_dimension_numbers<[1], [0], [0], [1], [0, 0, 1, 1], [], []>} : vector<8x8xf32>, vector<8x8xf32>, vector<8x8xf32> -> vector<8x8xf32>
    %70 = vector.extract_strided_slice %29 {offsets = [8, 0], sizes = [8, 32], strides = [1, 1]} : vector<32x32xf32> to vector<8x32xf32>
    %cst_46 = arith.constant dense<0.000000e+00> : vector<8x32xf32>
    %71 = tpu.matmul %69, %70, %cst_46 {dimension_numbers = #tpu.dot_dimension_numbers<[1], [0], [0], [1], [0, 0, 1, 1], [], []>} : vector<8x8xf32>, vector<8x32xf32>, vector<8x32xf32> -> vector<8x32xf32>
    %72 = arith.addf %52, %71 : vector<8x32xf32>
    %73 = vector.extract_strided_slice %13 {offsets = [0, 16], sizes = [8, 8], strides = [1, 1]} : vector<8x32xf32> to vector<8x8xf32>
    %74 = vector.extract_strided_slice %20 {offsets = [0, 16], sizes = [8, 8], strides = [1, 1]} : vector<8x32xf32> to vector<8x8xf32>
    %cst_47 = arith.constant dense<0.000000e+00> : vector<8x8xf32>
    %75 = tpu.matmul %73, %74, %cst_47 {dimension_numbers = #tpu.dot_dimension_numbers<[1], [1], [0], [0], [0, 0, 1, 0], [], []>} : vector<8x8xf32>, vector<8x8xf32>, vector<8x8xf32> -> vector<8x8xf32>
    %cst_48 = arith.constant 0.353553385 : f32
    %76 = vector.broadcast %cst_48 : f32 to vector<8x8xf32>
    %77 = arith.mulf %75, %76 : vector<8x8xf32>
    %cst_49 = arith.constant dense<0xFF800000> : vector<8xf32>
    %78 = vector.multi_reduction <maximumf>, %77, %cst_49 [1] : vector<8x8xf32> to vector<8xf32>
    %79 = vector.shape_cast %78 : vector<8xf32> to vector<8x1xf32>
    %80 = vector.broadcast %79 : vector<8x1xf32> to vector<8x8xf32>
    %81 = arith.subf %77, %80 : vector<8x8xf32>
    %82 = math.exp %81 : vector<8x8xf32>
    %cst_50 = arith.constant dense<0.000000e+00> : vector<8xf32>
    %83 = vector.multi_reduction <add>, %82, %cst_50 [1] : vector<8x8xf32> to vector<8xf32>
    %84 = vector.shape_cast %83 : vector<8xf32> to vector<8x1xf32>
    %85 = tpu.reciprocal %84 {approx = true} : vector<8x1xf32> -> vector<8x1xf32>
    %86 = vector.broadcast %85 : vector<8x1xf32> to vector<8x8xf32>
    %87 = arith.mulf %82, %86 : vector<8x8xf32>
    %88 = vector.extract_strided_slice %27 {offsets = [0, 16], sizes = [8, 8], strides = [1, 1]} : vector<8x32xf32> to vector<8x8xf32>
    %cst_51 = arith.constant dense<0.000000e+00> : vector<8x8xf32>
    %89 = tpu.matmul %87, %88, %cst_51 {dimension_numbers = #tpu.dot_dimension_numbers<[1], [0], [0], [1], [0, 0, 1, 1], [], []>} : vector<8x8xf32>, vector<8x8xf32>, vector<8x8xf32> -> vector<8x8xf32>
    %90 = vector.extract_strided_slice %29 {offsets = [16, 0], sizes = [8, 32], strides = [1, 1]} : vector<32x32xf32> to vector<8x32xf32>
    %cst_52 = arith.constant dense<0.000000e+00> : vector<8x32xf32>
    %91 = tpu.matmul %89, %90, %cst_52 {dimension_numbers = #tpu.dot_dimension_numbers<[1], [0], [0], [1], [0, 0, 1, 1], [], []>} : vector<8x8xf32>, vector<8x32xf32>, vector<8x32xf32> -> vector<8x32xf32>
    %92 = arith.addf %72, %91 : vector<8x32xf32>
    %93 = vector.extract_strided_slice %13 {offsets = [0, 24], sizes = [8, 8], strides = [1, 1]} : vector<8x32xf32> to vector<8x8xf32>
    %94 = vector.extract_strided_slice %20 {offsets = [0, 24], sizes = [8, 8], strides = [1, 1]} : vector<8x32xf32> to vector<8x8xf32>
    %cst_53 = arith.constant dense<0.000000e+00> : vector<8x8xf32>
    %95 = tpu.matmul %93, %94, %cst_53 {dimension_numbers = #tpu.dot_dimension_numbers<[1], [1], [0], [0], [0, 0, 1, 0], [], []>} : vector<8x8xf32>, vector<8x8xf32>, vector<8x8xf32> -> vector<8x8xf32>
    %cst_54 = arith.constant 0.353553385 : f32
    %96 = vector.broadcast %cst_54 : f32 to vector<8x8xf32>
    %97 = arith.mulf %95, %96 : vector<8x8xf32>
    %cst_55 = arith.constant dense<0xFF800000> : vector<8xf32>
    %98 = vector.multi_reduction <maximumf>, %97, %cst_55 [1] : vector<8x8xf32> to vector<8xf32>
    %99 = vector.shape_cast %98 : vector<8xf32> to vector<8x1xf32>
    %100 = vector.broadcast %99 : vector<8x1xf32> to vector<8x8xf32>
    %101 = arith.subf %97, %100 : vector<8x8xf32>
    %102 = math.exp %101 : vector<8x8xf32>
    %cst_56 = arith.constant dense<0.000000e+00> : vector<8xf32>
    %103 = vector.multi_reduction <add>, %102, %cst_56 [1] : vector<8x8xf32> to vector<8xf32>
    %104 = vector.shape_cast %103 : vector<8xf32> to vector<8x1xf32>
    %105 = tpu.reciprocal %104 {approx = true} : vector<8x1xf32> -> vector<8x1xf32>
    %106 = vector.broadcast %105 : vector<8x1xf32> to vector<8x8xf32>
    %107 = arith.mulf %102, %106 : vector<8x8xf32>
    %108 = vector.extract_strided_slice %27 {offsets = [0, 24], sizes = [8, 8], strides = [1, 1]} : vector<8x32xf32> to vector<8x8xf32>
    %cst_57 = arith.constant dense<0.000000e+00> : vector<8x8xf32>
    %109 = tpu.matmul %107, %108, %cst_57 {dimension_numbers = #tpu.dot_dimension_numbers<[1], [0], [0], [1], [0, 0, 1, 1], [], []>} : vector<8x8xf32>, vector<8x8xf32>, vector<8x8xf32> -> vector<8x8xf32>
    %110 = vector.extract_strided_slice %29 {offsets = [24, 0], sizes = [8, 32], strides = [1, 1]} : vector<32x32xf32> to vector<8x32xf32>
    %cst_58 = arith.constant dense<0.000000e+00> : vector<8x32xf32>
    %111 = tpu.matmul %109, %110, %cst_58 {dimension_numbers = #tpu.dot_dimension_numbers<[1], [0], [0], [1], [0, 0, 1, 1], [], []>} : vector<8x8xf32>, vector<8x32xf32>, vector<8x32xf32> -> vector<8x32xf32>
    %112 = arith.addf %92, %111 : vector<8x32xf32>
    %113 = vector.broadcast %31 : vector<1x32xf32> to vector<8x32xf32>
    %114 = arith.addf %112, %113 : vector<8x32xf32>
    %115 = arith.addf %6, %114 : vector<8x32xf32>
    %c0_59 = arith.constant 0 : index
    %c4 = arith.constant 4 : index
    %c0_60 = arith.constant 0 : index
    %116 = vector.load %arg16[%c0_59, %c4, %c0_60] : memref<2x9x32xf32, #tpu.memory_space<vmem>>, vector<1x1x32xf32>
    %117 = vector.shape_cast %116 : vector<1x1x32xf32> to vector<1x32xf32>
    %c0_61 = arith.constant 0 : index
    %c5 = arith.constant 5 : index
    %c0_62 = arith.constant 0 : index
    %118 = vector.load %arg16[%c0_61, %c5, %c0_62] : memref<2x9x32xf32, #tpu.memory_space<vmem>>, vector<1x1x32xf32>
    %119 = vector.shape_cast %118 : vector<1x1x32xf32> to vector<1x32xf32>
    %cst_63 = arith.constant dense<0.000000e+00> : vector<8xf32>
    %120 = vector.multi_reduction <add>, %115, %cst_63 [1] : vector<8x32xf32> to vector<8xf32>
    %121 = vector.shape_cast %120 : vector<8xf32> to vector<8x1xf32>
    %cst_64 = arith.constant 3.200000e+01 : f32
    %122 = vector.broadcast %cst_64 : f32 to vector<8x1xf32>
    %123 = arith.divf %121, %122 : vector<8x1xf32>
    %124 = vector.broadcast %123 : vector<8x1xf32> to vector<8x32xf32>
    %125 = arith.subf %115, %124 : vector<8x32xf32>
    %126 = arith.mulf %125, %125 : vector<8x32xf32>
    %cst_65 = arith.constant dense<0.000000e+00> : vector<8xf32>
    %127 = vector.multi_reduction <add>, %126, %cst_65 [1] : vector<8x32xf32> to vector<8xf32>
    %128 = vector.shape_cast %127 : vector<8xf32> to vector<8x1xf32>
    %cst_66 = arith.constant 3.200000e+01 : f32
    %129 = vector.broadcast %cst_66 : f32 to vector<8x1xf32>
    %130 = arith.divf %128, %129 : vector<8x1xf32>
    %cst_67 = arith.constant 9.99999974E-6 : f32
    %131 = vector.broadcast %cst_67 : f32 to vector<8x1xf32>
    %132 = arith.addf %130, %131 : vector<8x1xf32>
    %133 = math.rsqrt %132 : vector<8x1xf32>
    %134 = vector.broadcast %133 : vector<8x1xf32> to vector<8x32xf32>
    %135 = arith.mulf %125, %134 : vector<8x32xf32>
    %136 = vector.broadcast %117 : vector<1x32xf32> to vector<8x32xf32>
    %137 = arith.mulf %135, %136 : vector<8x32xf32>
    %138 = vector.broadcast %119 : vector<1x32xf32> to vector<8x32xf32>
    %139 = arith.addf %137, %138 : vector<8x32xf32>
    %c0_68 = arith.constant 0 : index
    %c0_69 = arith.constant 0 : index
    %c0_70 = arith.constant 0 : index
    %140 = vector.load %arg14[%c0_68, %c0_69, %c0_70] : memref<2x32x64xf32, #tpu.memory_space<vmem>>, vector<1x32x64xf32>
    %141 = vector.shape_cast %140 : vector<1x32x64xf32> to vector<32x64xf32>
    %c0_71 = arith.constant 0 : index
    %c0_72 = arith.constant 0 : index
    %c0_73 = arith.constant 0 : index
    %142 = vector.load %arg17[%c0_71, %c0_72, %c0_73] : memref<2x1x64xf32, #tpu.memory_space<vmem>>, vector<1x1x64xf32>
    %143 = vector.shape_cast %142 : vector<1x1x64xf32> to vector<1x64xf32>
    %cst_74 = arith.constant dense<0.000000e+00> : vector<8x64xf32>
    %144 = tpu.matmul %139, %141, %cst_74 {dimension_numbers = #tpu.dot_dimension_numbers<[1], [0], [0], [1], [0, 0, 1, 1], [], []>} : vector<8x32xf32>, vector<32x64xf32>, vector<8x64xf32> -> vector<8x64xf32>
    %145 = vector.broadcast %143 : vector<1x64xf32> to vector<8x64xf32>
    %146 = arith.addf %144, %145 : vector<8x64xf32>
    %cst_75 = arith.constant 0.000000e+00 : f32
    %147 = vector.broadcast %cst_75 : f32 to vector<8x64xf32>
    %148 = arith.maximumf %146, %147 : vector<8x64xf32>
    %c0_76 = arith.constant 0 : index
    %c0_77 = arith.constant 0 : index
    %c0_78 = arith.constant 0 : index
    %149 = vector.load %arg15[%c0_76, %c0_77, %c0_78] : memref<2x64x32xf32, #tpu.memory_space<vmem>>, vector<1x64x32xf32>
    %150 = vector.shape_cast %149 : vector<1x64x32xf32> to vector<64x32xf32>
    %c0_79 = arith.constant 0 : index
    %c6 = arith.constant 6 : index
    %c0_80 = arith.constant 0 : index
    %151 = vector.load %arg16[%c0_79, %c6, %c0_80] : memref<2x9x32xf32, #tpu.memory_space<vmem>>, vector<1x1x32xf32>
    %152 = vector.shape_cast %151 : vector<1x1x32xf32> to vector<1x32xf32>
    %cst_81 = arith.constant dense<0.000000e+00> : vector<8x32xf32>
    %153 = tpu.matmul %148, %150, %cst_81 {dimension_numbers = #tpu.dot_dimension_numbers<[1], [0], [0], [1], [0, 0, 1, 1], [], []>} : vector<8x64xf32>, vector<64x32xf32>, vector<8x32xf32> -> vector<8x32xf32>
    %154 = vector.broadcast %152 : vector<1x32xf32> to vector<8x32xf32>
    %155 = arith.addf %153, %154 : vector<8x32xf32>
    %156 = arith.addf %139, %155 : vector<8x32xf32>
    %c0_82 = arith.constant 0 : index
    %c7 = arith.constant 7 : index
    %c0_83 = arith.constant 0 : index
    %157 = vector.load %arg16[%c0_82, %c7, %c0_83] : memref<2x9x32xf32, #tpu.memory_space<vmem>>, vector<1x1x32xf32>
    %158 = vector.shape_cast %157 : vector<1x1x32xf32> to vector<1x32xf32>
    %c0_84 = arith.constant 0 : index
    %c8 = arith.constant 8 : index
    %c0_85 = arith.constant 0 : index
    %159 = vector.load %arg16[%c0_84, %c8, %c0_85] : memref<2x9x32xf32, #tpu.memory_space<vmem>>, vector<1x1x32xf32>
    %160 = vector.shape_cast %159 : vector<1x1x32xf32> to vector<1x32xf32>
    %cst_86 = arith.constant dense<0.000000e+00> : vector<8xf32>
    %161 = vector.multi_reduction <add>, %156, %cst_86 [1] : vector<8x32xf32> to vector<8xf32>
    %162 = vector.shape_cast %161 : vector<8xf32> to vector<8x1xf32>
    %cst_87 = arith.constant 3.200000e+01 : f32
    %163 = vector.broadcast %cst_87 : f32 to vector<8x1xf32>
    %164 = arith.divf %162, %163 : vector<8x1xf32>
    %165 = vector.broadcast %164 : vector<8x1xf32> to vector<8x32xf32>
    %166 = arith.subf %156, %165 : vector<8x32xf32>
    %167 = arith.mulf %166, %166 : vector<8x32xf32>
    %cst_88 = arith.constant dense<0.000000e+00> : vector<8xf32>
    %168 = vector.multi_reduction <add>, %167, %cst_88 [1] : vector<8x32xf32> to vector<8xf32>
    %169 = vector.shape_cast %168 : vector<8xf32> to vector<8x1xf32>
    %cst_89 = arith.constant 3.200000e+01 : f32
    %170 = vector.broadcast %cst_89 : f32 to vector<8x1xf32>
    %171 = arith.divf %169, %170 : vector<8x1xf32>
    %cst_90 = arith.constant 9.99999974E-6 : f32
    %172 = vector.broadcast %cst_90 : f32 to vector<8x1xf32>
    %173 = arith.addf %171, %172 : vector<8x1xf32>
    %174 = math.rsqrt %173 : vector<8x1xf32>
    %175 = vector.broadcast %174 : vector<8x1xf32> to vector<8x32xf32>
    %176 = arith.mulf %166, %175 : vector<8x32xf32>
    %177 = vector.broadcast %158 : vector<1x32xf32> to vector<8x32xf32>
    %178 = arith.mulf %176, %177 : vector<8x32xf32>
    %179 = vector.broadcast %160 : vector<1x32xf32> to vector<8x32xf32>
    %180 = arith.addf %178, %179 : vector<8x32xf32>
    %c1_91 = arith.constant 1 : index
    %c0_92 = arith.constant 0 : index
    %c0_93 = arith.constant 0 : index
    %c0_94 = arith.constant 0 : index
    %181 = vector.load %arg13[%c1_91, %c0_92, %c0_93, %c0_94] : memref<2x4x32x32xf32, #tpu.memory_space<vmem>>, vector<1x1x32x32xf32>
    %182 = vector.shape_cast %181 : vector<1x1x32x32xf32> to vector<32x32xf32>
    %c1_95 = arith.constant 1 : index
    %c0_96 = arith.constant 0 : index
    %c0_97 = arith.constant 0 : index
    %183 = vector.load %arg16[%c1_95, %c0_96, %c0_97] : memref<2x9x32xf32, #tpu.memory_space<vmem>>, vector<1x1x32xf32>
    %184 = vector.shape_cast %183 : vector<1x1x32xf32> to vector<1x32xf32>
    %cst_98 = arith.constant dense<0.000000e+00> : vector<8x32xf32>
    %185 = tpu.matmul %180, %182, %cst_98 {dimension_numbers = #tpu.dot_dimension_numbers<[1], [0], [0], [1], [0, 0, 1, 1], [], []>} : vector<8x32xf32>, vector<32x32xf32>, vector<8x32xf32> -> vector<8x32xf32>
    %186 = vector.broadcast %184 : vector<1x32xf32> to vector<8x32xf32>
    %187 = arith.addf %185, %186 : vector<8x32xf32>
    %c1_99 = arith.constant 1 : index
    %c1_100 = arith.constant 1 : index
    %c0_101 = arith.constant 0 : index
    %c0_102 = arith.constant 0 : index
    %188 = vector.load %arg13[%c1_99, %c1_100, %c0_101, %c0_102] : memref<2x4x32x32xf32, #tpu.memory_space<vmem>>, vector<1x1x32x32xf32>
    %189 = vector.shape_cast %188 : vector<1x1x32x32xf32> to vector<32x32xf32>
    %c1_103 = arith.constant 1 : index
    %c1_104 = arith.constant 1 : index
    %c0_105 = arith.constant 0 : index
    %190 = vector.load %arg16[%c1_103, %c1_104, %c0_105] : memref<2x9x32xf32, #tpu.memory_space<vmem>>, vector<1x1x32xf32>
    %191 = vector.shape_cast %190 : vector<1x1x32xf32> to vector<1x32xf32>
    %cst_106 = arith.constant dense<0.000000e+00> : vector<8x32xf32>
    %192 = tpu.matmul %180, %189, %cst_106 {dimension_numbers = #tpu.dot_dimension_numbers<[1], [0], [0], [1], [0, 0, 1, 1], [], []>} : vector<8x32xf32>, vector<32x32xf32>, vector<8x32xf32> -> vector<8x32xf32>
    %193 = vector.broadcast %191 : vector<1x32xf32> to vector<8x32xf32>
    %194 = arith.addf %192, %193 : vector<8x32xf32>
    %c1_107 = arith.constant 1 : index
    %c2_108 = arith.constant 2 : index
    %c0_109 = arith.constant 0 : index
    %c0_110 = arith.constant 0 : index
    %195 = vector.load %arg13[%c1_107, %c2_108, %c0_109, %c0_110] : memref<2x4x32x32xf32, #tpu.memory_space<vmem>>, vector<1x1x32x32xf32>
    %196 = vector.shape_cast %195 : vector<1x1x32x32xf32> to vector<32x32xf32>
    %c1_111 = arith.constant 1 : index
    %c2_112 = arith.constant 2 : index
    %c0_113 = arith.constant 0 : index
    %197 = vector.load %arg16[%c1_111, %c2_112, %c0_113] : memref<2x9x32xf32, #tpu.memory_space<vmem>>, vector<1x1x32xf32>
    %198 = vector.shape_cast %197 : vector<1x1x32xf32> to vector<1x32xf32>
    %cst_114 = arith.constant dense<0.000000e+00> : vector<8x32xf32>
    %199 = tpu.matmul %180, %196, %cst_114 {dimension_numbers = #tpu.dot_dimension_numbers<[1], [0], [0], [1], [0, 0, 1, 1], [], []>} : vector<8x32xf32>, vector<32x32xf32>, vector<8x32xf32> -> vector<8x32xf32>
    %200 = vector.broadcast %198 : vector<1x32xf32> to vector<8x32xf32>
    %201 = arith.addf %199, %200 : vector<8x32xf32>
    %c1_115 = arith.constant 1 : index
    %c3_116 = arith.constant 3 : index
    %c0_117 = arith.constant 0 : index
    %c0_118 = arith.constant 0 : index
    %202 = vector.load %arg13[%c1_115, %c3_116, %c0_117, %c0_118] : memref<2x4x32x32xf32, #tpu.memory_space<vmem>>, vector<1x1x32x32xf32>
    %203 = vector.shape_cast %202 : vector<1x1x32x32xf32> to vector<32x32xf32>
    %c1_119 = arith.constant 1 : index
    %c3_120 = arith.constant 3 : index
    %c0_121 = arith.constant 0 : index
    %204 = vector.load %arg16[%c1_119, %c3_120, %c0_121] : memref<2x9x32xf32, #tpu.memory_space<vmem>>, vector<1x1x32xf32>
    %205 = vector.shape_cast %204 : vector<1x1x32xf32> to vector<1x32xf32>
    %cst_122 = arith.constant 0.000000e+00 : f32
    %206 = vector.broadcast %cst_122 : f32 to vector<8x32xf32>
    %207 = vector.extract_strided_slice %187 {offsets = [0, 0], sizes = [8, 8], strides = [1, 1]} : vector<8x32xf32> to vector<8x8xf32>
    %208 = vector.extract_strided_slice %194 {offsets = [0, 0], sizes = [8, 8], strides = [1, 1]} : vector<8x32xf32> to vector<8x8xf32>
    %cst_123 = arith.constant dense<0.000000e+00> : vector<8x8xf32>
    %209 = tpu.matmul %207, %208, %cst_123 {dimension_numbers = #tpu.dot_dimension_numbers<[1], [1], [0], [0], [0, 0, 1, 0], [], []>} : vector<8x8xf32>, vector<8x8xf32>, vector<8x8xf32> -> vector<8x8xf32>
    %cst_124 = arith.constant 0.353553385 : f32
    %210 = vector.broadcast %cst_124 : f32 to vector<8x8xf32>
    %211 = arith.mulf %209, %210 : vector<8x8xf32>
    %cst_125 = arith.constant dense<0xFF800000> : vector<8xf32>
    %212 = vector.multi_reduction <maximumf>, %211, %cst_125 [1] : vector<8x8xf32> to vector<8xf32>
    %213 = vector.shape_cast %212 : vector<8xf32> to vector<8x1xf32>
    %214 = vector.broadcast %213 : vector<8x1xf32> to vector<8x8xf32>
    %215 = arith.subf %211, %214 : vector<8x8xf32>
    %216 = math.exp %215 : vector<8x8xf32>
    %cst_126 = arith.constant dense<0.000000e+00> : vector<8xf32>
    %217 = vector.multi_reduction <add>, %216, %cst_126 [1] : vector<8x8xf32> to vector<8xf32>
    %218 = vector.shape_cast %217 : vector<8xf32> to vector<8x1xf32>
    %219 = tpu.reciprocal %218 {approx = true} : vector<8x1xf32> -> vector<8x1xf32>
    %220 = vector.broadcast %219 : vector<8x1xf32> to vector<8x8xf32>
    %221 = arith.mulf %216, %220 : vector<8x8xf32>
    %222 = vector.extract_strided_slice %201 {offsets = [0, 0], sizes = [8, 8], strides = [1, 1]} : vector<8x32xf32> to vector<8x8xf32>
    %cst_127 = arith.constant dense<0.000000e+00> : vector<8x8xf32>
    %223 = tpu.matmul %221, %222, %cst_127 {dimension_numbers = #tpu.dot_dimension_numbers<[1], [0], [0], [1], [0, 0, 1, 1], [], []>} : vector<8x8xf32>, vector<8x8xf32>, vector<8x8xf32> -> vector<8x8xf32>
    %224 = vector.extract_strided_slice %203 {offsets = [0, 0], sizes = [8, 32], strides = [1, 1]} : vector<32x32xf32> to vector<8x32xf32>
    %cst_128 = arith.constant dense<0.000000e+00> : vector<8x32xf32>
    %225 = tpu.matmul %223, %224, %cst_128 {dimension_numbers = #tpu.dot_dimension_numbers<[1], [0], [0], [1], [0, 0, 1, 1], [], []>} : vector<8x8xf32>, vector<8x32xf32>, vector<8x32xf32> -> vector<8x32xf32>
    %226 = arith.addf %206, %225 : vector<8x32xf32>
    %227 = vector.extract_strided_slice %187 {offsets = [0, 8], sizes = [8, 8], strides = [1, 1]} : vector<8x32xf32> to vector<8x8xf32>
    %228 = vector.extract_strided_slice %194 {offsets = [0, 8], sizes = [8, 8], strides = [1, 1]} : vector<8x32xf32> to vector<8x8xf32>
    %cst_129 = arith.constant dense<0.000000e+00> : vector<8x8xf32>
    %229 = tpu.matmul %227, %228, %cst_129 {dimension_numbers = #tpu.dot_dimension_numbers<[1], [1], [0], [0], [0, 0, 1, 0], [], []>} : vector<8x8xf32>, vector<8x8xf32>, vector<8x8xf32> -> vector<8x8xf32>
    %cst_130 = arith.constant 0.353553385 : f32
    %230 = vector.broadcast %cst_130 : f32 to vector<8x8xf32>
    %231 = arith.mulf %229, %230 : vector<8x8xf32>
    %cst_131 = arith.constant dense<0xFF800000> : vector<8xf32>
    %232 = vector.multi_reduction <maximumf>, %231, %cst_131 [1] : vector<8x8xf32> to vector<8xf32>
    %233 = vector.shape_cast %232 : vector<8xf32> to vector<8x1xf32>
    %234 = vector.broadcast %233 : vector<8x1xf32> to vector<8x8xf32>
    %235 = arith.subf %231, %234 : vector<8x8xf32>
    %236 = math.exp %235 : vector<8x8xf32>
    %cst_132 = arith.constant dense<0.000000e+00> : vector<8xf32>
    %237 = vector.multi_reduction <add>, %236, %cst_132 [1] : vector<8x8xf32> to vector<8xf32>
    %238 = vector.shape_cast %237 : vector<8xf32> to vector<8x1xf32>
    %239 = tpu.reciprocal %238 {approx = true} : vector<8x1xf32> -> vector<8x1xf32>
    %240 = vector.broadcast %239 : vector<8x1xf32> to vector<8x8xf32>
    %241 = arith.mulf %236, %240 : vector<8x8xf32>
    %242 = vector.extract_strided_slice %201 {offsets = [0, 8], sizes = [8, 8], strides = [1, 1]} : vector<8x32xf32> to vector<8x8xf32>
    %cst_133 = arith.constant dense<0.000000e+00> : vector<8x8xf32>
    %243 = tpu.matmul %241, %242, %cst_133 {dimension_numbers = #tpu.dot_dimension_numbers<[1], [0], [0], [1], [0, 0, 1, 1], [], []>} : vector<8x8xf32>, vector<8x8xf32>, vector<8x8xf32> -> vector<8x8xf32>
    %244 = vector.extract_strided_slice %203 {offsets = [8, 0], sizes = [8, 32], strides = [1, 1]} : vector<32x32xf32> to vector<8x32xf32>
    %cst_134 = arith.constant dense<0.000000e+00> : vector<8x32xf32>
    %245 = tpu.matmul %243, %244, %cst_134 {dimension_numbers = #tpu.dot_dimension_numbers<[1], [0], [0], [1], [0, 0, 1, 1], [], []>} : vector<8x8xf32>, vector<8x32xf32>, vector<8x32xf32> -> vector<8x32xf32>
    %246 = arith.addf %226, %245 : vector<8x32xf32>
    %247 = vector.extract_strided_slice %187 {offsets = [0, 16], sizes = [8, 8], strides = [1, 1]} : vector<8x32xf32> to vector<8x8xf32>
    %248 = vector.extract_strided_slice %194 {offsets = [0, 16], sizes = [8, 8], strides = [1, 1]} : vector<8x32xf32> to vector<8x8xf32>
    %cst_135 = arith.constant dense<0.000000e+00> : vector<8x8xf32>
    %249 = tpu.matmul %247, %248, %cst_135 {dimension_numbers = #tpu.dot_dimension_numbers<[1], [1], [0], [0], [0, 0, 1, 0], [], []>} : vector<8x8xf32>, vector<8x8xf32>, vector<8x8xf32> -> vector<8x8xf32>
    %cst_136 = arith.constant 0.353553385 : f32
    %250 = vector.broadcast %cst_136 : f32 to vector<8x8xf32>
    %251 = arith.mulf %249, %250 : vector<8x8xf32>
    %cst_137 = arith.constant dense<0xFF800000> : vector<8xf32>
    %252 = vector.multi_reduction <maximumf>, %251, %cst_137 [1] : vector<8x8xf32> to vector<8xf32>
    %253 = vector.shape_cast %252 : vector<8xf32> to vector<8x1xf32>
    %254 = vector.broadcast %253 : vector<8x1xf32> to vector<8x8xf32>
    %255 = arith.subf %251, %254 : vector<8x8xf32>
    %256 = math.exp %255 : vector<8x8xf32>
    %cst_138 = arith.constant dense<0.000000e+00> : vector<8xf32>
    %257 = vector.multi_reduction <add>, %256, %cst_138 [1] : vector<8x8xf32> to vector<8xf32>
    %258 = vector.shape_cast %257 : vector<8xf32> to vector<8x1xf32>
    %259 = tpu.reciprocal %258 {approx = true} : vector<8x1xf32> -> vector<8x1xf32>
    %260 = vector.broadcast %259 : vector<8x1xf32> to vector<8x8xf32>
    %261 = arith.mulf %256, %260 : vector<8x8xf32>
    %262 = vector.extract_strided_slice %201 {offsets = [0, 16], sizes = [8, 8], strides = [1, 1]} : vector<8x32xf32> to vector<8x8xf32>
    %cst_139 = arith.constant dense<0.000000e+00> : vector<8x8xf32>
    %263 = tpu.matmul %261, %262, %cst_139 {dimension_numbers = #tpu.dot_dimension_numbers<[1], [0], [0], [1], [0, 0, 1, 1], [], []>} : vector<8x8xf32>, vector<8x8xf32>, vector<8x8xf32> -> vector<8x8xf32>
    %264 = vector.extract_strided_slice %203 {offsets = [16, 0], sizes = [8, 32], strides = [1, 1]} : vector<32x32xf32> to vector<8x32xf32>
    %cst_140 = arith.constant dense<0.000000e+00> : vector<8x32xf32>
    %265 = tpu.matmul %263, %264, %cst_140 {dimension_numbers = #tpu.dot_dimension_numbers<[1], [0], [0], [1], [0, 0, 1, 1], [], []>} : vector<8x8xf32>, vector<8x32xf32>, vector<8x32xf32> -> vector<8x32xf32>
    %266 = arith.addf %246, %265 : vector<8x32xf32>
    %267 = vector.extract_strided_slice %187 {offsets = [0, 24], sizes = [8, 8], strides = [1, 1]} : vector<8x32xf32> to vector<8x8xf32>
    %268 = vector.extract_strided_slice %194 {offsets = [0, 24], sizes = [8, 8], strides = [1, 1]} : vector<8x32xf32> to vector<8x8xf32>
    %cst_141 = arith.constant dense<0.000000e+00> : vector<8x8xf32>
    %269 = tpu.matmul %267, %268, %cst_141 {dimension_numbers = #tpu.dot_dimension_numbers<[1], [1], [0], [0], [0, 0, 1, 0], [], []>} : vector<8x8xf32>, vector<8x8xf32>, vector<8x8xf32> -> vector<8x8xf32>
    %cst_142 = arith.constant 0.353553385 : f32
    %270 = vector.broadcast %cst_142 : f32 to vector<8x8xf32>
    %271 = arith.mulf %269, %270 : vector<8x8xf32>
    %cst_143 = arith.constant dense<0xFF800000> : vector<8xf32>
    %272 = vector.multi_reduction <maximumf>, %271, %cst_143 [1] : vector<8x8xf32> to vector<8xf32>
    %273 = vector.shape_cast %272 : vector<8xf32> to vector<8x1xf32>
    %274 = vector.broadcast %273 : vector<8x1xf32> to vector<8x8xf32>
    %275 = arith.subf %271, %274 : vector<8x8xf32>
    %276 = math.exp %275 : vector<8x8xf32>
    %cst_144 = arith.constant dense<0.000000e+00> : vector<8xf32>
    %277 = vector.multi_reduction <add>, %276, %cst_144 [1] : vector<8x8xf32> to vector<8xf32>
    %278 = vector.shape_cast %277 : vector<8xf32> to vector<8x1xf32>
    %279 = tpu.reciprocal %278 {approx = true} : vector<8x1xf32> -> vector<8x1xf32>
    %280 = vector.broadcast %279 : vector<8x1xf32> to vector<8x8xf32>
    %281 = arith.mulf %276, %280 : vector<8x8xf32>
    %282 = vector.extract_strided_slice %201 {offsets = [0, 24], sizes = [8, 8], strides = [1, 1]} : vector<8x32xf32> to vector<8x8xf32>
    %cst_145 = arith.constant dense<0.000000e+00> : vector<8x8xf32>
    %283 = tpu.matmul %281, %282, %cst_145 {dimension_numbers = #tpu.dot_dimension_numbers<[1], [0], [0], [1], [0, 0, 1, 1], [], []>} : vector<8x8xf32>, vector<8x8xf32>, vector<8x8xf32> -> vector<8x8xf32>
    %284 = vector.extract_strided_slice %203 {offsets = [24, 0], sizes = [8, 32], strides = [1, 1]} : vector<32x32xf32> to vector<8x32xf32>
    %cst_146 = arith.constant dense<0.000000e+00> : vector<8x32xf32>
    %285 = tpu.matmul %283, %284, %cst_146 {dimension_numbers = #tpu.dot_dimension_numbers<[1], [0], [0], [1], [0, 0, 1, 1], [], []>} : vector<8x8xf32>, vector<8x32xf32>, vector<8x32xf32> -> vector<8x32xf32>
    %286 = arith.addf %266, %285 : vector<8x32xf32>
    %287 = vector.broadcast %205 : vector<1x32xf32> to vector<8x32xf32>
    %288 = arith.addf %286, %287 : vector<8x32xf32>
    %289 = arith.addf %180, %288 : vector<8x32xf32>
    %c1_147 = arith.constant 1 : index
    %c4_148 = arith.constant 4 : index
    %c0_149 = arith.constant 0 : index
    %290 = vector.load %arg16[%c1_147, %c4_148, %c0_149] : memref<2x9x32xf32, #tpu.memory_space<vmem>>, vector<1x1x32xf32>
    %291 = vector.shape_cast %290 : vector<1x1x32xf32> to vector<1x32xf32>
    %c1_150 = arith.constant 1 : index
    %c5_151 = arith.constant 5 : index
    %c0_152 = arith.constant 0 : index
    %292 = vector.load %arg16[%c1_150, %c5_151, %c0_152] : memref<2x9x32xf32, #tpu.memory_space<vmem>>, vector<1x1x32xf32>
    %293 = vector.shape_cast %292 : vector<1x1x32xf32> to vector<1x32xf32>
    %cst_153 = arith.constant dense<0.000000e+00> : vector<8xf32>
    %294 = vector.multi_reduction <add>, %289, %cst_153 [1] : vector<8x32xf32> to vector<8xf32>
    %295 = vector.shape_cast %294 : vector<8xf32> to vector<8x1xf32>
    %cst_154 = arith.constant 3.200000e+01 : f32
    %296 = vector.broadcast %cst_154 : f32 to vector<8x1xf32>
    %297 = arith.divf %295, %296 : vector<8x1xf32>
    %298 = vector.broadcast %297 : vector<8x1xf32> to vector<8x32xf32>
    %299 = arith.subf %289, %298 : vector<8x32xf32>
    %300 = arith.mulf %299, %299 : vector<8x32xf32>
    %cst_155 = arith.constant dense<0.000000e+00> : vector<8xf32>
    %301 = vector.multi_reduction <add>, %300, %cst_155 [1] : vector<8x32xf32> to vector<8xf32>
    %302 = vector.shape_cast %301 : vector<8xf32> to vector<8x1xf32>
    %cst_156 = arith.constant 3.200000e+01 : f32
    %303 = vector.broadcast %cst_156 : f32 to vector<8x1xf32>
    %304 = arith.divf %302, %303 : vector<8x1xf32>
    %cst_157 = arith.constant 9.99999974E-6 : f32
    %305 = vector.broadcast %cst_157 : f32 to vector<8x1xf32>
    %306 = arith.addf %304, %305 : vector<8x1xf32>
    %307 = math.rsqrt %306 : vector<8x1xf32>
    %308 = vector.broadcast %307 : vector<8x1xf32> to vector<8x32xf32>
    %309 = arith.mulf %299, %308 : vector<8x32xf32>
    %310 = vector.broadcast %291 : vector<1x32xf32> to vector<8x32xf32>
    %311 = arith.mulf %309, %310 : vector<8x32xf32>
    %312 = vector.broadcast %293 : vector<1x32xf32> to vector<8x32xf32>
    %313 = arith.addf %311, %312 : vector<8x32xf32>
    %c1_158 = arith.constant 1 : index
    %c0_159 = arith.constant 0 : index
    %c0_160 = arith.constant 0 : index
    %314 = vector.load %arg14[%c1_158, %c0_159, %c0_160] : memref<2x32x64xf32, #tpu.memory_space<vmem>>, vector<1x32x64xf32>
    %315 = vector.shape_cast %314 : vector<1x32x64xf32> to vector<32x64xf32>
    %c1_161 = arith.constant 1 : index
    %c0_162 = arith.constant 0 : index
    %c0_163 = arith.constant 0 : index
    %316 = vector.load %arg17[%c1_161, %c0_162, %c0_163] : memref<2x1x64xf32, #tpu.memory_space<vmem>>, vector<1x1x64xf32>
    %317 = vector.shape_cast %316 : vector<1x1x64xf32> to vector<1x64xf32>
    %cst_164 = arith.constant dense<0.000000e+00> : vector<8x64xf32>
    %318 = tpu.matmul %313, %315, %cst_164 {dimension_numbers = #tpu.dot_dimension_numbers<[1], [0], [0], [1], [0, 0, 1, 1], [], []>} : vector<8x32xf32>, vector<32x64xf32>, vector<8x64xf32> -> vector<8x64xf32>
    %319 = vector.broadcast %317 : vector<1x64xf32> to vector<8x64xf32>
    %320 = arith.addf %318, %319 : vector<8x64xf32>
    %cst_165 = arith.constant 0.000000e+00 : f32
    %321 = vector.broadcast %cst_165 : f32 to vector<8x64xf32>
    %322 = arith.maximumf %320, %321 : vector<8x64xf32>
    %c1_166 = arith.constant 1 : index
    %c0_167 = arith.constant 0 : index
    %c0_168 = arith.constant 0 : index
    %323 = vector.load %arg15[%c1_166, %c0_167, %c0_168] : memref<2x64x32xf32, #tpu.memory_space<vmem>>, vector<1x64x32xf32>
    %324 = vector.shape_cast %323 : vector<1x64x32xf32> to vector<64x32xf32>
    %c1_169 = arith.constant 1 : index
    %c6_170 = arith.constant 6 : index
    %c0_171 = arith.constant 0 : index
    %325 = vector.load %arg16[%c1_169, %c6_170, %c0_171] : memref<2x9x32xf32, #tpu.memory_space<vmem>>, vector<1x1x32xf32>
    %326 = vector.shape_cast %325 : vector<1x1x32xf32> to vector<1x32xf32>
    %cst_172 = arith.constant dense<0.000000e+00> : vector<8x32xf32>
    %327 = tpu.matmul %322, %324, %cst_172 {dimension_numbers = #tpu.dot_dimension_numbers<[1], [0], [0], [1], [0, 0, 1, 1], [], []>} : vector<8x64xf32>, vector<64x32xf32>, vector<8x32xf32> -> vector<8x32xf32>
    %328 = vector.broadcast %326 : vector<1x32xf32> to vector<8x32xf32>
    %329 = arith.addf %327, %328 : vector<8x32xf32>
    %330 = arith.addf %313, %329 : vector<8x32xf32>
    %c1_173 = arith.constant 1 : index
    %c7_174 = arith.constant 7 : index
    %c0_175 = arith.constant 0 : index
    %331 = vector.load %arg16[%c1_173, %c7_174, %c0_175] : memref<2x9x32xf32, #tpu.memory_space<vmem>>, vector<1x1x32xf32>
    %332 = vector.shape_cast %331 : vector<1x1x32xf32> to vector<1x32xf32>
    %c1_176 = arith.constant 1 : index
    %c8_177 = arith.constant 8 : index
    %c0_178 = arith.constant 0 : index
    %333 = vector.load %arg16[%c1_176, %c8_177, %c0_178] : memref<2x9x32xf32, #tpu.memory_space<vmem>>, vector<1x1x32xf32>
    %334 = vector.shape_cast %333 : vector<1x1x32xf32> to vector<1x32xf32>
    %cst_179 = arith.constant dense<0.000000e+00> : vector<8xf32>
    %335 = vector.multi_reduction <add>, %330, %cst_179 [1] : vector<8x32xf32> to vector<8xf32>
    %336 = vector.shape_cast %335 : vector<8xf32> to vector<8x1xf32>
    %cst_180 = arith.constant 3.200000e+01 : f32
    %337 = vector.broadcast %cst_180 : f32 to vector<8x1xf32>
    %338 = arith.divf %336, %337 : vector<8x1xf32>
    %339 = vector.broadcast %338 : vector<8x1xf32> to vector<8x32xf32>
    %340 = arith.subf %330, %339 : vector<8x32xf32>
    %341 = arith.mulf %340, %340 : vector<8x32xf32>
    %cst_181 = arith.constant dense<0.000000e+00> : vector<8xf32>
    %342 = vector.multi_reduction <add>, %341, %cst_181 [1] : vector<8x32xf32> to vector<8xf32>
    %343 = vector.shape_cast %342 : vector<8xf32> to vector<8x1xf32>
    %cst_182 = arith.constant 3.200000e+01 : f32
    %344 = vector.broadcast %cst_182 : f32 to vector<8x1xf32>
    %345 = arith.divf %343, %344 : vector<8x1xf32>
    %cst_183 = arith.constant 9.99999974E-6 : f32
    %346 = vector.broadcast %cst_183 : f32 to vector<8x1xf32>
    %347 = arith.addf %345, %346 : vector<8x1xf32>
    %348 = math.rsqrt %347 : vector<8x1xf32>
    %349 = vector.broadcast %348 : vector<8x1xf32> to vector<8x32xf32>
    %350 = arith.mulf %340, %349 : vector<8x32xf32>
    %351 = vector.broadcast %332 : vector<1x32xf32> to vector<8x32xf32>
    %352 = arith.mulf %350, %351 : vector<8x32xf32>
    %353 = vector.broadcast %334 : vector<1x32xf32> to vector<8x32xf32>
    %354 = arith.addf %352, %353 : vector<8x32xf32>
    %c1_184 = arith.constant 1 : index
    %c0_185 = arith.constant 0 : index
    %355 = vector.load %arg5[%c1_184, %c0_185] : memref<7x32xf32, #tpu.memory_space<vmem>>, vector<1x32xf32>
    %c2_186 = arith.constant 2 : index
    %c0_187 = arith.constant 0 : index
    %356 = vector.load %arg5[%c2_186, %c0_187] : memref<7x32xf32, #tpu.memory_space<vmem>>, vector<1x32xf32>
    %cst_188 = arith.constant dense<0.000000e+00> : vector<8xf32>
    %357 = vector.multi_reduction <add>, %354, %cst_188 [1] : vector<8x32xf32> to vector<8xf32>
    %358 = vector.shape_cast %357 : vector<8xf32> to vector<8x1xf32>
    %cst_189 = arith.constant 3.200000e+01 : f32
    %359 = vector.broadcast %cst_189 : f32 to vector<8x1xf32>
    %360 = arith.divf %358, %359 : vector<8x1xf32>
    %361 = vector.broadcast %360 : vector<8x1xf32> to vector<8x32xf32>
    %362 = arith.subf %354, %361 : vector<8x32xf32>
    %363 = arith.mulf %362, %362 : vector<8x32xf32>
    %cst_190 = arith.constant dense<0.000000e+00> : vector<8xf32>
    %364 = vector.multi_reduction <add>, %363, %cst_190 [1] : vector<8x32xf32> to vector<8xf32>
    %365 = vector.shape_cast %364 : vector<8xf32> to vector<8x1xf32>
    %cst_191 = arith.constant 3.200000e+01 : f32
    %366 = vector.broadcast %cst_191 : f32 to vector<8x1xf32>
    %367 = arith.divf %365, %366 : vector<8x1xf32>
    %cst_192 = arith.constant 9.99999974E-6 : f32
    %368 = vector.broadcast %cst_192 : f32 to vector<8x1xf32>
    %369 = arith.addf %367, %368 : vector<8x1xf32>
    %370 = math.rsqrt %369 : vector<8x1xf32>
    %371 = vector.broadcast %370 : vector<8x1xf32> to vector<8x32xf32>
    %372 = arith.mulf %362, %371 : vector<8x32xf32>
    %373 = vector.broadcast %355 : vector<1x32xf32> to vector<8x32xf32>
    %374 = arith.mulf %372, %373 : vector<8x32xf32>
    %375 = vector.broadcast %356 : vector<1x32xf32> to vector<8x32xf32>
    %376 = arith.addf %374, %375 : vector<8x32xf32>
    %c0_193 = arith.constant 0 : index
    %c0_194 = arith.constant 0 : index
    %377 = vector.load %arg8[%c0_193, %c0_194] : memref<32x16xf32, #tpu.memory_space<vmem>>, vector<32x16xf32>
    %c0_195 = arith.constant 0 : index
    %c0_196 = arith.constant 0 : index
    %378 = vector.load %arg6[%c0_195, %c0_196] : memref<2x16xf32, #tpu.memory_space<vmem>>, vector<1x16xf32>
    %cst_197 = arith.constant dense<0.000000e+00> : vector<8x16xf32>
    %379 = tpu.matmul %376, %377, %cst_197 {dimension_numbers = #tpu.dot_dimension_numbers<[1], [0], [0], [1], [0, 0, 1, 1], [], []>} : vector<8x32xf32>, vector<32x16xf32>, vector<8x16xf32> -> vector<8x16xf32>
    %380 = vector.broadcast %378 : vector<1x16xf32> to vector<8x16xf32>
    %381 = arith.addf %379, %380 : vector<8x16xf32>
    %c0_198 = arith.constant 0 : index
    %c0_199 = arith.constant 0 : index
    %382 = vector.load %arg9[%c0_198, %c0_199] : memref<32x16xf32, #tpu.memory_space<vmem>>, vector<32x16xf32>
    %c1_200 = arith.constant 1 : index
    %c0_201 = arith.constant 0 : index
    %383 = vector.load %arg6[%c1_200, %c0_201] : memref<2x16xf32, #tpu.memory_space<vmem>>, vector<1x16xf32>
    %cst_202 = arith.constant dense<0.000000e+00> : vector<8x16xf32>
    %384 = tpu.matmul %376, %382, %cst_202 {dimension_numbers = #tpu.dot_dimension_numbers<[1], [0], [0], [1], [0, 0, 1, 1], [], []>} : vector<8x32xf32>, vector<32x16xf32>, vector<8x16xf32> -> vector<8x16xf32>
    %385 = vector.broadcast %383 : vector<1x16xf32> to vector<8x16xf32>
    %386 = arith.addf %384, %385 : vector<8x16xf32>
    %cst_203 = arith.constant 0.000000e+00 : f32
    %387 = vector.broadcast %cst_203 : f32 to vector<8x16xf32>
    %388 = arith.maximumf %386, %387 : vector<8x16xf32>
    %389 = math.absf %386 : vector<8x16xf32>
    %cst_204 = arith.constant 0.000000e+00 : f32
    %390 = vector.broadcast %cst_204 : f32 to vector<8x16xf32>
    %391 = arith.subf %390, %389 : vector<8x16xf32>
    %392 = math.exp %391 : vector<8x16xf32>
    %cst_205 = arith.constant 1.000000e+00 : f32
    %393 = vector.broadcast %cst_205 : f32 to vector<8x16xf32>
    %394 = arith.addf %393, %392 : vector<8x16xf32>
    %395 = math.log %394 : vector<8x16xf32>
    %396 = arith.addf %388, %395 : vector<8x16xf32>
    %cst_206 = arith.constant 2.000000e+01 : f32
    %397 = vector.broadcast %cst_206 : f32 to vector<8x16xf32>
    %398 = arith.cmpf ogt, %386, %397 : vector<8x16xf32>
    %399 = arith.select %398, %386, %396 : vector<8x16xi1>, vector<8x16xf32>
    %cst_207 = arith.constant 9.99999993E-9 : f32
    %400 = vector.broadcast %cst_207 : f32 to vector<8x16xf32>
    %401 = arith.addf %399, %400 : vector<8x16xf32>
    %c0_208 = arith.constant 0 : index
    %c0_209 = arith.constant 0 : index
    %c0_210 = arith.constant 0 : index
    %402 = vector.load %arg3[%c0_208, %c0_209, %c0_210] : memref<1x8x16xf32, #tpu.memory_space<vmem>>, vector<1x8x16xf32>
    %403 = vector.shape_cast %402 : vector<1x8x16xf32> to vector<8x16xf32>
    %404 = arith.mulf %401, %403 : vector<8x16xf32>
    %405 = arith.addf %381, %404 : vector<8x16xf32>
    %c0_211 = arith.constant 0 : index
    %c0_212 = arith.constant 0 : index
    %406 = vector.load %arg10[%c0_211, %c0_212] : memref<16x32xf32, #tpu.memory_space<vmem>>, vector<16x32xf32>
    %c3_213 = arith.constant 3 : index
    %c0_214 = arith.constant 0 : index
    %407 = vector.load %arg5[%c3_213, %c0_214] : memref<7x32xf32, #tpu.memory_space<vmem>>, vector<1x32xf32>
    %cst_215 = arith.constant dense<0.000000e+00> : vector<8x32xf32>
    %408 = tpu.matmul %405, %406, %cst_215 {dimension_numbers = #tpu.dot_dimension_numbers<[1], [0], [0], [1], [0, 0, 1, 1], [], []>} : vector<8x16xf32>, vector<16x32xf32>, vector<8x32xf32> -> vector<8x32xf32>
    %409 = vector.broadcast %407 : vector<1x32xf32> to vector<8x32xf32>
    %410 = arith.addf %408, %409 : vector<8x32xf32>
    %c0_216 = arith.constant 0 : index
    %c0_217 = arith.constant 0 : index
    %c0_218 = arith.constant 0 : index
    %411 = vector.load %arg2[%c0_216, %c0_217, %c0_218] : memref<1x8x4xf32, #tpu.memory_space<vmem>>, vector<1x8x4xf32>
    %412 = vector.shape_cast %411 : vector<1x8x4xf32> to vector<8x4xf32>
    %c0_219 = arith.constant 0 : index
    %c0_220 = arith.constant 0 : index
    %413 = vector.load %arg11[%c0_219, %c0_220] : memref<4x32xf32, #tpu.memory_space<vmem>>, vector<4x32xf32>
    %c4_221 = arith.constant 4 : index
    %c0_222 = arith.constant 0 : index
    %414 = vector.load %arg5[%c4_221, %c0_222] : memref<7x32xf32, #tpu.memory_space<vmem>>, vector<1x32xf32>
    %cst_223 = arith.constant dense<0.000000e+00> : vector<8x32xf32>
    %415 = tpu.matmul %412, %413, %cst_223 {dimension_numbers = #tpu.dot_dimension_numbers<[1], [0], [0], [1], [0, 0, 1, 1], [], []>} : vector<8x4xf32>, vector<4x32xf32>, vector<8x32xf32> -> vector<8x32xf32>
    %416 = vector.broadcast %414 : vector<1x32xf32> to vector<8x32xf32>
    %417 = arith.addf %415, %416 : vector<8x32xf32>
    %c0_224 = arith.constant 0 : index
    %c0_225 = arith.constant 0 : index
    %c0_226 = arith.constant 0 : index
    %c0_227 = arith.constant 0 : index
    %418 = vector.load %arg18[%c0_224, %c0_225, %c0_226, %c0_227] : memref<2x4x32x32xf32, #tpu.memory_space<vmem>>, vector<1x1x32x32xf32>
    %419 = vector.shape_cast %418 : vector<1x1x32x32xf32> to vector<32x32xf32>
    %c0_228 = arith.constant 0 : index
    %c0_229 = arith.constant 0 : index
    %c0_230 = arith.constant 0 : index
    %420 = vector.load %arg22[%c0_228, %c0_229, %c0_230] : memref<2x15x32xf32, #tpu.memory_space<vmem>>, vector<1x1x32xf32>
    %421 = vector.shape_cast %420 : vector<1x1x32xf32> to vector<1x32xf32>
    %cst_231 = arith.constant dense<0.000000e+00> : vector<8x32xf32>
    %422 = tpu.matmul %417, %419, %cst_231 {dimension_numbers = #tpu.dot_dimension_numbers<[1], [0], [0], [1], [0, 0, 1, 1], [], []>} : vector<8x32xf32>, vector<32x32xf32>, vector<8x32xf32> -> vector<8x32xf32>
    %423 = vector.broadcast %421 : vector<1x32xf32> to vector<8x32xf32>
    %424 = arith.addf %422, %423 : vector<8x32xf32>
    %c0_232 = arith.constant 0 : index
    %c1_233 = arith.constant 1 : index
    %c0_234 = arith.constant 0 : index
    %c0_235 = arith.constant 0 : index
    %425 = vector.load %arg18[%c0_232, %c1_233, %c0_234, %c0_235] : memref<2x4x32x32xf32, #tpu.memory_space<vmem>>, vector<1x1x32x32xf32>
    %426 = vector.shape_cast %425 : vector<1x1x32x32xf32> to vector<32x32xf32>
    %c0_236 = arith.constant 0 : index
    %c1_237 = arith.constant 1 : index
    %c0_238 = arith.constant 0 : index
    %427 = vector.load %arg22[%c0_236, %c1_237, %c0_238] : memref<2x15x32xf32, #tpu.memory_space<vmem>>, vector<1x1x32xf32>
    %428 = vector.shape_cast %427 : vector<1x1x32xf32> to vector<1x32xf32>
    %cst_239 = arith.constant dense<0.000000e+00> : vector<8x32xf32>
    %429 = tpu.matmul %417, %426, %cst_239 {dimension_numbers = #tpu.dot_dimension_numbers<[1], [0], [0], [1], [0, 0, 1, 1], [], []>} : vector<8x32xf32>, vector<32x32xf32>, vector<8x32xf32> -> vector<8x32xf32>
    %430 = vector.broadcast %428 : vector<1x32xf32> to vector<8x32xf32>
    %431 = arith.addf %429, %430 : vector<8x32xf32>
    %c0_240 = arith.constant 0 : index
    %c2_241 = arith.constant 2 : index
    %c0_242 = arith.constant 0 : index
    %c0_243 = arith.constant 0 : index
    %432 = vector.load %arg18[%c0_240, %c2_241, %c0_242, %c0_243] : memref<2x4x32x32xf32, #tpu.memory_space<vmem>>, vector<1x1x32x32xf32>
    %433 = vector.shape_cast %432 : vector<1x1x32x32xf32> to vector<32x32xf32>
    %c0_244 = arith.constant 0 : index
    %c2_245 = arith.constant 2 : index
    %c0_246 = arith.constant 0 : index
    %434 = vector.load %arg22[%c0_244, %c2_245, %c0_246] : memref<2x15x32xf32, #tpu.memory_space<vmem>>, vector<1x1x32xf32>
    %435 = vector.shape_cast %434 : vector<1x1x32xf32> to vector<1x32xf32>
    %cst_247 = arith.constant dense<0.000000e+00> : vector<8x32xf32>
    %436 = tpu.matmul %417, %433, %cst_247 {dimension_numbers = #tpu.dot_dimension_numbers<[1], [0], [0], [1], [0, 0, 1, 1], [], []>} : vector<8x32xf32>, vector<32x32xf32>, vector<8x32xf32> -> vector<8x32xf32>
    %437 = vector.broadcast %435 : vector<1x32xf32> to vector<8x32xf32>
    %438 = arith.addf %436, %437 : vector<8x32xf32>
    %c0_248 = arith.constant 0 : index
    %c3_249 = arith.constant 3 : index
    %c0_250 = arith.constant 0 : index
    %c0_251 = arith.constant 0 : index
    %439 = vector.load %arg18[%c0_248, %c3_249, %c0_250, %c0_251] : memref<2x4x32x32xf32, #tpu.memory_space<vmem>>, vector<1x1x32x32xf32>
    %440 = vector.shape_cast %439 : vector<1x1x32x32xf32> to vector<32x32xf32>
    %c0_252 = arith.constant 0 : index
    %c3_253 = arith.constant 3 : index
    %c0_254 = arith.constant 0 : index
    %441 = vector.load %arg22[%c0_252, %c3_253, %c0_254] : memref<2x15x32xf32, #tpu.memory_space<vmem>>, vector<1x1x32xf32>
    %442 = vector.shape_cast %441 : vector<1x1x32xf32> to vector<1x32xf32>
    %443 = tpu.iota {dimensions = array<i32: 0>} : vector<8x8xi32>
    %444 = tpu.iota {dimensions = array<i32: 1>} : vector<8x8xi32>
    %445 = arith.cmpi sle, %444, %443 : vector<8x8xi32>
    %cst_255 = arith.constant 0.000000e+00 : f32
    %446 = vector.broadcast %cst_255 : f32 to vector<8x32xf32>
    %447 = vector.extract_strided_slice %424 {offsets = [0, 0], sizes = [8, 8], strides = [1, 1]} : vector<8x32xf32> to vector<8x8xf32>
    %448 = vector.extract_strided_slice %431 {offsets = [0, 0], sizes = [8, 8], strides = [1, 1]} : vector<8x32xf32> to vector<8x8xf32>
    %cst_256 = arith.constant dense<0.000000e+00> : vector<8x8xf32>
    %449 = tpu.matmul %447, %448, %cst_256 {dimension_numbers = #tpu.dot_dimension_numbers<[1], [1], [0], [0], [0, 0, 1, 0], [], []>} : vector<8x8xf32>, vector<8x8xf32>, vector<8x8xf32> -> vector<8x8xf32>
    %cst_257 = arith.constant 0.353553385 : f32
    %450 = vector.broadcast %cst_257 : f32 to vector<8x8xf32>
    %451 = arith.mulf %449, %450 : vector<8x8xf32>
    %cst_258 = arith.constant -1.000000e+30 : f32
    %452 = vector.broadcast %cst_258 : f32 to vector<8x8xf32>
    %453 = arith.select %445, %451, %452 : vector<8x8xi1>, vector<8x8xf32>
    %cst_259 = arith.constant dense<0xFF800000> : vector<8xf32>
    %454 = vector.multi_reduction <maximumf>, %453, %cst_259 [1] : vector<8x8xf32> to vector<8xf32>
    %455 = vector.shape_cast %454 : vector<8xf32> to vector<8x1xf32>
    %456 = vector.broadcast %455 : vector<8x1xf32> to vector<8x8xf32>
    %457 = arith.subf %453, %456 : vector<8x8xf32>
    %458 = math.exp %457 : vector<8x8xf32>
    %cst_260 = arith.constant dense<0.000000e+00> : vector<8xf32>
    %459 = vector.multi_reduction <add>, %458, %cst_260 [1] : vector<8x8xf32> to vector<8xf32>
    %460 = vector.shape_cast %459 : vector<8xf32> to vector<8x1xf32>
    %461 = tpu.reciprocal %460 {approx = true} : vector<8x1xf32> -> vector<8x1xf32>
    %462 = vector.broadcast %461 : vector<8x1xf32> to vector<8x8xf32>
    %463 = arith.mulf %458, %462 : vector<8x8xf32>
    %464 = vector.extract_strided_slice %438 {offsets = [0, 0], sizes = [8, 8], strides = [1, 1]} : vector<8x32xf32> to vector<8x8xf32>
    %cst_261 = arith.constant dense<0.000000e+00> : vector<8x8xf32>
    %465 = tpu.matmul %463, %464, %cst_261 {dimension_numbers = #tpu.dot_dimension_numbers<[1], [0], [0], [1], [0, 0, 1, 1], [], []>} : vector<8x8xf32>, vector<8x8xf32>, vector<8x8xf32> -> vector<8x8xf32>
    %466 = vector.extract_strided_slice %440 {offsets = [0, 0], sizes = [8, 32], strides = [1, 1]} : vector<32x32xf32> to vector<8x32xf32>
    %cst_262 = arith.constant dense<0.000000e+00> : vector<8x32xf32>
    %467 = tpu.matmul %465, %466, %cst_262 {dimension_numbers = #tpu.dot_dimension_numbers<[1], [0], [0], [1], [0, 0, 1, 1], [], []>} : vector<8x8xf32>, vector<8x32xf32>, vector<8x32xf32> -> vector<8x32xf32>
    %468 = arith.addf %446, %467 : vector<8x32xf32>
    %469 = vector.extract_strided_slice %424 {offsets = [0, 8], sizes = [8, 8], strides = [1, 1]} : vector<8x32xf32> to vector<8x8xf32>
    %470 = vector.extract_strided_slice %431 {offsets = [0, 8], sizes = [8, 8], strides = [1, 1]} : vector<8x32xf32> to vector<8x8xf32>
    %cst_263 = arith.constant dense<0.000000e+00> : vector<8x8xf32>
    %471 = tpu.matmul %469, %470, %cst_263 {dimension_numbers = #tpu.dot_dimension_numbers<[1], [1], [0], [0], [0, 0, 1, 0], [], []>} : vector<8x8xf32>, vector<8x8xf32>, vector<8x8xf32> -> vector<8x8xf32>
    %cst_264 = arith.constant 0.353553385 : f32
    %472 = vector.broadcast %cst_264 : f32 to vector<8x8xf32>
    %473 = arith.mulf %471, %472 : vector<8x8xf32>
    %cst_265 = arith.constant -1.000000e+30 : f32
    %474 = vector.broadcast %cst_265 : f32 to vector<8x8xf32>
    %475 = arith.select %445, %473, %474 : vector<8x8xi1>, vector<8x8xf32>
    %cst_266 = arith.constant dense<0xFF800000> : vector<8xf32>
    %476 = vector.multi_reduction <maximumf>, %475, %cst_266 [1] : vector<8x8xf32> to vector<8xf32>
    %477 = vector.shape_cast %476 : vector<8xf32> to vector<8x1xf32>
    %478 = vector.broadcast %477 : vector<8x1xf32> to vector<8x8xf32>
    %479 = arith.subf %475, %478 : vector<8x8xf32>
    %480 = math.exp %479 : vector<8x8xf32>
    %cst_267 = arith.constant dense<0.000000e+00> : vector<8xf32>
    %481 = vector.multi_reduction <add>, %480, %cst_267 [1] : vector<8x8xf32> to vector<8xf32>
    %482 = vector.shape_cast %481 : vector<8xf32> to vector<8x1xf32>
    %483 = tpu.reciprocal %482 {approx = true} : vector<8x1xf32> -> vector<8x1xf32>
    %484 = vector.broadcast %483 : vector<8x1xf32> to vector<8x8xf32>
    %485 = arith.mulf %480, %484 : vector<8x8xf32>
    %486 = vector.extract_strided_slice %438 {offsets = [0, 8], sizes = [8, 8], strides = [1, 1]} : vector<8x32xf32> to vector<8x8xf32>
    %cst_268 = arith.constant dense<0.000000e+00> : vector<8x8xf32>
    %487 = tpu.matmul %485, %486, %cst_268 {dimension_numbers = #tpu.dot_dimension_numbers<[1], [0], [0], [1], [0, 0, 1, 1], [], []>} : vector<8x8xf32>, vector<8x8xf32>, vector<8x8xf32> -> vector<8x8xf32>
    %488 = vector.extract_strided_slice %440 {offsets = [8, 0], sizes = [8, 32], strides = [1, 1]} : vector<32x32xf32> to vector<8x32xf32>
    %cst_269 = arith.constant dense<0.000000e+00> : vector<8x32xf32>
    %489 = tpu.matmul %487, %488, %cst_269 {dimension_numbers = #tpu.dot_dimension_numbers<[1], [0], [0], [1], [0, 0, 1, 1], [], []>} : vector<8x8xf32>, vector<8x32xf32>, vector<8x32xf32> -> vector<8x32xf32>
    %490 = arith.addf %468, %489 : vector<8x32xf32>
    %491 = vector.extract_strided_slice %424 {offsets = [0, 16], sizes = [8, 8], strides = [1, 1]} : vector<8x32xf32> to vector<8x8xf32>
    %492 = vector.extract_strided_slice %431 {offsets = [0, 16], sizes = [8, 8], strides = [1, 1]} : vector<8x32xf32> to vector<8x8xf32>
    %cst_270 = arith.constant dense<0.000000e+00> : vector<8x8xf32>
    %493 = tpu.matmul %491, %492, %cst_270 {dimension_numbers = #tpu.dot_dimension_numbers<[1], [1], [0], [0], [0, 0, 1, 0], [], []>} : vector<8x8xf32>, vector<8x8xf32>, vector<8x8xf32> -> vector<8x8xf32>
    %cst_271 = arith.constant 0.353553385 : f32
    %494 = vector.broadcast %cst_271 : f32 to vector<8x8xf32>
    %495 = arith.mulf %493, %494 : vector<8x8xf32>
    %cst_272 = arith.constant -1.000000e+30 : f32
    %496 = vector.broadcast %cst_272 : f32 to vector<8x8xf32>
    %497 = arith.select %445, %495, %496 : vector<8x8xi1>, vector<8x8xf32>
    %cst_273 = arith.constant dense<0xFF800000> : vector<8xf32>
    %498 = vector.multi_reduction <maximumf>, %497, %cst_273 [1] : vector<8x8xf32> to vector<8xf32>
    %499 = vector.shape_cast %498 : vector<8xf32> to vector<8x1xf32>
    %500 = vector.broadcast %499 : vector<8x1xf32> to vector<8x8xf32>
    %501 = arith.subf %497, %500 : vector<8x8xf32>
    %502 = math.exp %501 : vector<8x8xf32>
    %cst_274 = arith.constant dense<0.000000e+00> : vector<8xf32>
    %503 = vector.multi_reduction <add>, %502, %cst_274 [1] : vector<8x8xf32> to vector<8xf32>
    %504 = vector.shape_cast %503 : vector<8xf32> to vector<8x1xf32>
    %505 = tpu.reciprocal %504 {approx = true} : vector<8x1xf32> -> vector<8x1xf32>
    %506 = vector.broadcast %505 : vector<8x1xf32> to vector<8x8xf32>
    %507 = arith.mulf %502, %506 : vector<8x8xf32>
    %508 = vector.extract_strided_slice %438 {offsets = [0, 16], sizes = [8, 8], strides = [1, 1]} : vector<8x32xf32> to vector<8x8xf32>
    %cst_275 = arith.constant dense<0.000000e+00> : vector<8x8xf32>
    %509 = tpu.matmul %507, %508, %cst_275 {dimension_numbers = #tpu.dot_dimension_numbers<[1], [0], [0], [1], [0, 0, 1, 1], [], []>} : vector<8x8xf32>, vector<8x8xf32>, vector<8x8xf32> -> vector<8x8xf32>
    %510 = vector.extract_strided_slice %440 {offsets = [16, 0], sizes = [8, 32], strides = [1, 1]} : vector<32x32xf32> to vector<8x32xf32>
    %cst_276 = arith.constant dense<0.000000e+00> : vector<8x32xf32>
    %511 = tpu.matmul %509, %510, %cst_276 {dimension_numbers = #tpu.dot_dimension_numbers<[1], [0], [0], [1], [0, 0, 1, 1], [], []>} : vector<8x8xf32>, vector<8x32xf32>, vector<8x32xf32> -> vector<8x32xf32>
    %512 = arith.addf %490, %511 : vector<8x32xf32>
    %513 = vector.extract_strided_slice %424 {offsets = [0, 24], sizes = [8, 8], strides = [1, 1]} : vector<8x32xf32> to vector<8x8xf32>
    %514 = vector.extract_strided_slice %431 {offsets = [0, 24], sizes = [8, 8], strides = [1, 1]} : vector<8x32xf32> to vector<8x8xf32>
    %cst_277 = arith.constant dense<0.000000e+00> : vector<8x8xf32>
    %515 = tpu.matmul %513, %514, %cst_277 {dimension_numbers = #tpu.dot_dimension_numbers<[1], [1], [0], [0], [0, 0, 1, 0], [], []>} : vector<8x8xf32>, vector<8x8xf32>, vector<8x8xf32> -> vector<8x8xf32>
    %cst_278 = arith.constant 0.353553385 : f32
    %516 = vector.broadcast %cst_278 : f32 to vector<8x8xf32>
    %517 = arith.mulf %515, %516 : vector<8x8xf32>
    %cst_279 = arith.constant -1.000000e+30 : f32
    %518 = vector.broadcast %cst_279 : f32 to vector<8x8xf32>
    %519 = arith.select %445, %517, %518 : vector<8x8xi1>, vector<8x8xf32>
    %cst_280 = arith.constant dense<0xFF800000> : vector<8xf32>
    %520 = vector.multi_reduction <maximumf>, %519, %cst_280 [1] : vector<8x8xf32> to vector<8xf32>
    %521 = vector.shape_cast %520 : vector<8xf32> to vector<8x1xf32>
    %522 = vector.broadcast %521 : vector<8x1xf32> to vector<8x8xf32>
    %523 = arith.subf %519, %522 : vector<8x8xf32>
    %524 = math.exp %523 : vector<8x8xf32>
    %cst_281 = arith.constant dense<0.000000e+00> : vector<8xf32>
    %525 = vector.multi_reduction <add>, %524, %cst_281 [1] : vector<8x8xf32> to vector<8xf32>
    %526 = vector.shape_cast %525 : vector<8xf32> to vector<8x1xf32>
    %527 = tpu.reciprocal %526 {approx = true} : vector<8x1xf32> -> vector<8x1xf32>
    %528 = vector.broadcast %527 : vector<8x1xf32> to vector<8x8xf32>
    %529 = arith.mulf %524, %528 : vector<8x8xf32>
    %530 = vector.extract_strided_slice %438 {offsets = [0, 24], sizes = [8, 8], strides = [1, 1]} : vector<8x32xf32> to vector<8x8xf32>
    %cst_282 = arith.constant dense<0.000000e+00> : vector<8x8xf32>
    %531 = tpu.matmul %529, %530, %cst_282 {dimension_numbers = #tpu.dot_dimension_numbers<[1], [0], [0], [1], [0, 0, 1, 1], [], []>} : vector<8x8xf32>, vector<8x8xf32>, vector<8x8xf32> -> vector<8x8xf32>
    %532 = vector.extract_strided_slice %440 {offsets = [24, 0], sizes = [8, 32], strides = [1, 1]} : vector<32x32xf32> to vector<8x32xf32>
    %cst_283 = arith.constant dense<0.000000e+00> : vector<8x32xf32>
    %533 = tpu.matmul %531, %532, %cst_283 {dimension_numbers = #tpu.dot_dimension_numbers<[1], [0], [0], [1], [0, 0, 1, 1], [], []>} : vector<8x8xf32>, vector<8x32xf32>, vector<8x32xf32> -> vector<8x32xf32>
    %534 = arith.addf %512, %533 : vector<8x32xf32>
    %535 = vector.broadcast %442 : vector<1x32xf32> to vector<8x32xf32>
    %536 = arith.addf %534, %535 : vector<8x32xf32>
    %537 = arith.addf %417, %536 : vector<8x32xf32>
    %c0_284 = arith.constant 0 : index
    %c4_285 = arith.constant 4 : index
    %c0_286 = arith.constant 0 : index
    %538 = vector.load %arg22[%c0_284, %c4_285, %c0_286] : memref<2x15x32xf32, #tpu.memory_space<vmem>>, vector<1x1x32xf32>
    %539 = vector.shape_cast %538 : vector<1x1x32xf32> to vector<1x32xf32>
    %c0_287 = arith.constant 0 : index
    %c5_288 = arith.constant 5 : index
    %c0_289 = arith.constant 0 : index
    %540 = vector.load %arg22[%c0_287, %c5_288, %c0_289] : memref<2x15x32xf32, #tpu.memory_space<vmem>>, vector<1x1x32xf32>
    %541 = vector.shape_cast %540 : vector<1x1x32xf32> to vector<1x32xf32>
    %cst_290 = arith.constant dense<0.000000e+00> : vector<8xf32>
    %542 = vector.multi_reduction <add>, %537, %cst_290 [1] : vector<8x32xf32> to vector<8xf32>
    %543 = vector.shape_cast %542 : vector<8xf32> to vector<8x1xf32>
    %cst_291 = arith.constant 3.200000e+01 : f32
    %544 = vector.broadcast %cst_291 : f32 to vector<8x1xf32>
    %545 = arith.divf %543, %544 : vector<8x1xf32>
    %546 = vector.broadcast %545 : vector<8x1xf32> to vector<8x32xf32>
    %547 = arith.subf %537, %546 : vector<8x32xf32>
    %548 = arith.mulf %547, %547 : vector<8x32xf32>
    %cst_292 = arith.constant dense<0.000000e+00> : vector<8xf32>
    %549 = vector.multi_reduction <add>, %548, %cst_292 [1] : vector<8x32xf32> to vector<8xf32>
    %550 = vector.shape_cast %549 : vector<8xf32> to vector<8x1xf32>
    %cst_293 = arith.constant 3.200000e+01 : f32
    %551 = vector.broadcast %cst_293 : f32 to vector<8x1xf32>
    %552 = arith.divf %550, %551 : vector<8x1xf32>
    %cst_294 = arith.constant 9.99999974E-6 : f32
    %553 = vector.broadcast %cst_294 : f32 to vector<8x1xf32>
    %554 = arith.addf %552, %553 : vector<8x1xf32>
    %555 = math.rsqrt %554 : vector<8x1xf32>
    %556 = vector.broadcast %555 : vector<8x1xf32> to vector<8x32xf32>
    %557 = arith.mulf %547, %556 : vector<8x32xf32>
    %558 = vector.broadcast %539 : vector<1x32xf32> to vector<8x32xf32>
    %559 = arith.mulf %557, %558 : vector<8x32xf32>
    %560 = vector.broadcast %541 : vector<1x32xf32> to vector<8x32xf32>
    %561 = arith.addf %559, %560 : vector<8x32xf32>
    %c0_295 = arith.constant 0 : index
    %c0_296 = arith.constant 0 : index
    %c0_297 = arith.constant 0 : index
    %c0_298 = arith.constant 0 : index
    %562 = vector.load %arg19[%c0_295, %c0_296, %c0_297, %c0_298] : memref<2x4x32x32xf32, #tpu.memory_space<vmem>>, vector<1x1x32x32xf32>
    %563 = vector.shape_cast %562 : vector<1x1x32x32xf32> to vector<32x32xf32>
    %c0_299 = arith.constant 0 : index
    %c6_300 = arith.constant 6 : index
    %c0_301 = arith.constant 0 : index
    %564 = vector.load %arg22[%c0_299, %c6_300, %c0_301] : memref<2x15x32xf32, #tpu.memory_space<vmem>>, vector<1x1x32xf32>
    %565 = vector.shape_cast %564 : vector<1x1x32xf32> to vector<1x32xf32>
    %cst_302 = arith.constant dense<0.000000e+00> : vector<8x32xf32>
    %566 = tpu.matmul %561, %563, %cst_302 {dimension_numbers = #tpu.dot_dimension_numbers<[1], [0], [0], [1], [0, 0, 1, 1], [], []>} : vector<8x32xf32>, vector<32x32xf32>, vector<8x32xf32> -> vector<8x32xf32>
    %567 = vector.broadcast %565 : vector<1x32xf32> to vector<8x32xf32>
    %568 = arith.addf %566, %567 : vector<8x32xf32>
    %c0_303 = arith.constant 0 : index
    %c1_304 = arith.constant 1 : index
    %c0_305 = arith.constant 0 : index
    %c0_306 = arith.constant 0 : index
    %569 = vector.load %arg19[%c0_303, %c1_304, %c0_305, %c0_306] : memref<2x4x32x32xf32, #tpu.memory_space<vmem>>, vector<1x1x32x32xf32>
    %570 = vector.shape_cast %569 : vector<1x1x32x32xf32> to vector<32x32xf32>
    %c0_307 = arith.constant 0 : index
    %c7_308 = arith.constant 7 : index
    %c0_309 = arith.constant 0 : index
    %571 = vector.load %arg22[%c0_307, %c7_308, %c0_309] : memref<2x15x32xf32, #tpu.memory_space<vmem>>, vector<1x1x32xf32>
    %572 = vector.shape_cast %571 : vector<1x1x32xf32> to vector<1x32xf32>
    %cst_310 = arith.constant dense<0.000000e+00> : vector<8x32xf32>
    %573 = tpu.matmul %410, %570, %cst_310 {dimension_numbers = #tpu.dot_dimension_numbers<[1], [0], [0], [1], [0, 0, 1, 1], [], []>} : vector<8x32xf32>, vector<32x32xf32>, vector<8x32xf32> -> vector<8x32xf32>
    %574 = vector.broadcast %572 : vector<1x32xf32> to vector<8x32xf32>
    %575 = arith.addf %573, %574 : vector<8x32xf32>
    %c0_311 = arith.constant 0 : index
    %c2_312 = arith.constant 2 : index
    %c0_313 = arith.constant 0 : index
    %c0_314 = arith.constant 0 : index
    %576 = vector.load %arg19[%c0_311, %c2_312, %c0_313, %c0_314] : memref<2x4x32x32xf32, #tpu.memory_space<vmem>>, vector<1x1x32x32xf32>
    %577 = vector.shape_cast %576 : vector<1x1x32x32xf32> to vector<32x32xf32>
    %c0_315 = arith.constant 0 : index
    %c8_316 = arith.constant 8 : index
    %c0_317 = arith.constant 0 : index
    %578 = vector.load %arg22[%c0_315, %c8_316, %c0_317] : memref<2x15x32xf32, #tpu.memory_space<vmem>>, vector<1x1x32xf32>
    %579 = vector.shape_cast %578 : vector<1x1x32xf32> to vector<1x32xf32>
    %cst_318 = arith.constant dense<0.000000e+00> : vector<8x32xf32>
    %580 = tpu.matmul %410, %577, %cst_318 {dimension_numbers = #tpu.dot_dimension_numbers<[1], [0], [0], [1], [0, 0, 1, 1], [], []>} : vector<8x32xf32>, vector<32x32xf32>, vector<8x32xf32> -> vector<8x32xf32>
    %581 = vector.broadcast %579 : vector<1x32xf32> to vector<8x32xf32>
    %582 = arith.addf %580, %581 : vector<8x32xf32>
    %c0_319 = arith.constant 0 : index
    %c3_320 = arith.constant 3 : index
    %c0_321 = arith.constant 0 : index
    %c0_322 = arith.constant 0 : index
    %583 = vector.load %arg19[%c0_319, %c3_320, %c0_321, %c0_322] : memref<2x4x32x32xf32, #tpu.memory_space<vmem>>, vector<1x1x32x32xf32>
    %584 = vector.shape_cast %583 : vector<1x1x32x32xf32> to vector<32x32xf32>
    %c0_323 = arith.constant 0 : index
    %c9 = arith.constant 9 : index
    %c0_324 = arith.constant 0 : index
    %585 = vector.load %arg22[%c0_323, %c9, %c0_324] : memref<2x15x32xf32, #tpu.memory_space<vmem>>, vector<1x1x32xf32>
    %586 = vector.shape_cast %585 : vector<1x1x32xf32> to vector<1x32xf32>
    %cst_325 = arith.constant 0.000000e+00 : f32
    %587 = vector.broadcast %cst_325 : f32 to vector<8x32xf32>
    %588 = vector.extract_strided_slice %568 {offsets = [0, 0], sizes = [8, 8], strides = [1, 1]} : vector<8x32xf32> to vector<8x8xf32>
    %589 = vector.extract_strided_slice %575 {offsets = [0, 0], sizes = [8, 8], strides = [1, 1]} : vector<8x32xf32> to vector<8x8xf32>
    %cst_326 = arith.constant dense<0.000000e+00> : vector<8x8xf32>
    %590 = tpu.matmul %588, %589, %cst_326 {dimension_numbers = #tpu.dot_dimension_numbers<[1], [1], [0], [0], [0, 0, 1, 0], [], []>} : vector<8x8xf32>, vector<8x8xf32>, vector<8x8xf32> -> vector<8x8xf32>
    %cst_327 = arith.constant 0.353553385 : f32
    %591 = vector.broadcast %cst_327 : f32 to vector<8x8xf32>
    %592 = arith.mulf %590, %591 : vector<8x8xf32>
    %cst_328 = arith.constant dense<0xFF800000> : vector<8xf32>
    %593 = vector.multi_reduction <maximumf>, %592, %cst_328 [1] : vector<8x8xf32> to vector<8xf32>
    %594 = vector.shape_cast %593 : vector<8xf32> to vector<8x1xf32>
    %595 = vector.broadcast %594 : vector<8x1xf32> to vector<8x8xf32>
    %596 = arith.subf %592, %595 : vector<8x8xf32>
    %597 = math.exp %596 : vector<8x8xf32>
    %cst_329 = arith.constant dense<0.000000e+00> : vector<8xf32>
    %598 = vector.multi_reduction <add>, %597, %cst_329 [1] : vector<8x8xf32> to vector<8xf32>
    %599 = vector.shape_cast %598 : vector<8xf32> to vector<8x1xf32>
    %600 = tpu.reciprocal %599 {approx = true} : vector<8x1xf32> -> vector<8x1xf32>
    %601 = vector.broadcast %600 : vector<8x1xf32> to vector<8x8xf32>
    %602 = arith.mulf %597, %601 : vector<8x8xf32>
    %603 = vector.extract_strided_slice %582 {offsets = [0, 0], sizes = [8, 8], strides = [1, 1]} : vector<8x32xf32> to vector<8x8xf32>
    %cst_330 = arith.constant dense<0.000000e+00> : vector<8x8xf32>
    %604 = tpu.matmul %602, %603, %cst_330 {dimension_numbers = #tpu.dot_dimension_numbers<[1], [0], [0], [1], [0, 0, 1, 1], [], []>} : vector<8x8xf32>, vector<8x8xf32>, vector<8x8xf32> -> vector<8x8xf32>
    %605 = vector.extract_strided_slice %584 {offsets = [0, 0], sizes = [8, 32], strides = [1, 1]} : vector<32x32xf32> to vector<8x32xf32>
    %cst_331 = arith.constant dense<0.000000e+00> : vector<8x32xf32>
    %606 = tpu.matmul %604, %605, %cst_331 {dimension_numbers = #tpu.dot_dimension_numbers<[1], [0], [0], [1], [0, 0, 1, 1], [], []>} : vector<8x8xf32>, vector<8x32xf32>, vector<8x32xf32> -> vector<8x32xf32>
    %607 = arith.addf %587, %606 : vector<8x32xf32>
    %608 = vector.extract_strided_slice %568 {offsets = [0, 8], sizes = [8, 8], strides = [1, 1]} : vector<8x32xf32> to vector<8x8xf32>
    %609 = vector.extract_strided_slice %575 {offsets = [0, 8], sizes = [8, 8], strides = [1, 1]} : vector<8x32xf32> to vector<8x8xf32>
    %cst_332 = arith.constant dense<0.000000e+00> : vector<8x8xf32>
    %610 = tpu.matmul %608, %609, %cst_332 {dimension_numbers = #tpu.dot_dimension_numbers<[1], [1], [0], [0], [0, 0, 1, 0], [], []>} : vector<8x8xf32>, vector<8x8xf32>, vector<8x8xf32> -> vector<8x8xf32>
    %cst_333 = arith.constant 0.353553385 : f32
    %611 = vector.broadcast %cst_333 : f32 to vector<8x8xf32>
    %612 = arith.mulf %610, %611 : vector<8x8xf32>
    %cst_334 = arith.constant dense<0xFF800000> : vector<8xf32>
    %613 = vector.multi_reduction <maximumf>, %612, %cst_334 [1] : vector<8x8xf32> to vector<8xf32>
    %614 = vector.shape_cast %613 : vector<8xf32> to vector<8x1xf32>
    %615 = vector.broadcast %614 : vector<8x1xf32> to vector<8x8xf32>
    %616 = arith.subf %612, %615 : vector<8x8xf32>
    %617 = math.exp %616 : vector<8x8xf32>
    %cst_335 = arith.constant dense<0.000000e+00> : vector<8xf32>
    %618 = vector.multi_reduction <add>, %617, %cst_335 [1] : vector<8x8xf32> to vector<8xf32>
    %619 = vector.shape_cast %618 : vector<8xf32> to vector<8x1xf32>
    %620 = tpu.reciprocal %619 {approx = true} : vector<8x1xf32> -> vector<8x1xf32>
    %621 = vector.broadcast %620 : vector<8x1xf32> to vector<8x8xf32>
    %622 = arith.mulf %617, %621 : vector<8x8xf32>
    %623 = vector.extract_strided_slice %582 {offsets = [0, 8], sizes = [8, 8], strides = [1, 1]} : vector<8x32xf32> to vector<8x8xf32>
    %cst_336 = arith.constant dense<0.000000e+00> : vector<8x8xf32>
    %624 = tpu.matmul %622, %623, %cst_336 {dimension_numbers = #tpu.dot_dimension_numbers<[1], [0], [0], [1], [0, 0, 1, 1], [], []>} : vector<8x8xf32>, vector<8x8xf32>, vector<8x8xf32> -> vector<8x8xf32>
    %625 = vector.extract_strided_slice %584 {offsets = [8, 0], sizes = [8, 32], strides = [1, 1]} : vector<32x32xf32> to vector<8x32xf32>
    %cst_337 = arith.constant dense<0.000000e+00> : vector<8x32xf32>
    %626 = tpu.matmul %624, %625, %cst_337 {dimension_numbers = #tpu.dot_dimension_numbers<[1], [0], [0], [1], [0, 0, 1, 1], [], []>} : vector<8x8xf32>, vector<8x32xf32>, vector<8x32xf32> -> vector<8x32xf32>
    %627 = arith.addf %607, %626 : vector<8x32xf32>
    %628 = vector.extract_strided_slice %568 {offsets = [0, 16], sizes = [8, 8], strides = [1, 1]} : vector<8x32xf32> to vector<8x8xf32>
    %629 = vector.extract_strided_slice %575 {offsets = [0, 16], sizes = [8, 8], strides = [1, 1]} : vector<8x32xf32> to vector<8x8xf32>
    %cst_338 = arith.constant dense<0.000000e+00> : vector<8x8xf32>
    %630 = tpu.matmul %628, %629, %cst_338 {dimension_numbers = #tpu.dot_dimension_numbers<[1], [1], [0], [0], [0, 0, 1, 0], [], []>} : vector<8x8xf32>, vector<8x8xf32>, vector<8x8xf32> -> vector<8x8xf32>
    %cst_339 = arith.constant 0.353553385 : f32
    %631 = vector.broadcast %cst_339 : f32 to vector<8x8xf32>
    %632 = arith.mulf %630, %631 : vector<8x8xf32>
    %cst_340 = arith.constant dense<0xFF800000> : vector<8xf32>
    %633 = vector.multi_reduction <maximumf>, %632, %cst_340 [1] : vector<8x8xf32> to vector<8xf32>
    %634 = vector.shape_cast %633 : vector<8xf32> to vector<8x1xf32>
    %635 = vector.broadcast %634 : vector<8x1xf32> to vector<8x8xf32>
    %636 = arith.subf %632, %635 : vector<8x8xf32>
    %637 = math.exp %636 : vector<8x8xf32>
    %cst_341 = arith.constant dense<0.000000e+00> : vector<8xf32>
    %638 = vector.multi_reduction <add>, %637, %cst_341 [1] : vector<8x8xf32> to vector<8xf32>
    %639 = vector.shape_cast %638 : vector<8xf32> to vector<8x1xf32>
    %640 = tpu.reciprocal %639 {approx = true} : vector<8x1xf32> -> vector<8x1xf32>
    %641 = vector.broadcast %640 : vector<8x1xf32> to vector<8x8xf32>
    %642 = arith.mulf %637, %641 : vector<8x8xf32>
    %643 = vector.extract_strided_slice %582 {offsets = [0, 16], sizes = [8, 8], strides = [1, 1]} : vector<8x32xf32> to vector<8x8xf32>
    %cst_342 = arith.constant dense<0.000000e+00> : vector<8x8xf32>
    %644 = tpu.matmul %642, %643, %cst_342 {dimension_numbers = #tpu.dot_dimension_numbers<[1], [0], [0], [1], [0, 0, 1, 1], [], []>} : vector<8x8xf32>, vector<8x8xf32>, vector<8x8xf32> -> vector<8x8xf32>
    %645 = vector.extract_strided_slice %584 {offsets = [16, 0], sizes = [8, 32], strides = [1, 1]} : vector<32x32xf32> to vector<8x32xf32>
    %cst_343 = arith.constant dense<0.000000e+00> : vector<8x32xf32>
    %646 = tpu.matmul %644, %645, %cst_343 {dimension_numbers = #tpu.dot_dimension_numbers<[1], [0], [0], [1], [0, 0, 1, 1], [], []>} : vector<8x8xf32>, vector<8x32xf32>, vector<8x32xf32> -> vector<8x32xf32>
    %647 = arith.addf %627, %646 : vector<8x32xf32>
    %648 = vector.extract_strided_slice %568 {offsets = [0, 24], sizes = [8, 8], strides = [1, 1]} : vector<8x32xf32> to vector<8x8xf32>
    %649 = vector.extract_strided_slice %575 {offsets = [0, 24], sizes = [8, 8], strides = [1, 1]} : vector<8x32xf32> to vector<8x8xf32>
    %cst_344 = arith.constant dense<0.000000e+00> : vector<8x8xf32>
    %650 = tpu.matmul %648, %649, %cst_344 {dimension_numbers = #tpu.dot_dimension_numbers<[1], [1], [0], [0], [0, 0, 1, 0], [], []>} : vector<8x8xf32>, vector<8x8xf32>, vector<8x8xf32> -> vector<8x8xf32>
    %cst_345 = arith.constant 0.353553385 : f32
    %651 = vector.broadcast %cst_345 : f32 to vector<8x8xf32>
    %652 = arith.mulf %650, %651 : vector<8x8xf32>
    %cst_346 = arith.constant dense<0xFF800000> : vector<8xf32>
    %653 = vector.multi_reduction <maximumf>, %652, %cst_346 [1] : vector<8x8xf32> to vector<8xf32>
    %654 = vector.shape_cast %653 : vector<8xf32> to vector<8x1xf32>
    %655 = vector.broadcast %654 : vector<8x1xf32> to vector<8x8xf32>
    %656 = arith.subf %652, %655 : vector<8x8xf32>
    %657 = math.exp %656 : vector<8x8xf32>
    %cst_347 = arith.constant dense<0.000000e+00> : vector<8xf32>
    %658 = vector.multi_reduction <add>, %657, %cst_347 [1] : vector<8x8xf32> to vector<8xf32>
    %659 = vector.shape_cast %658 : vector<8xf32> to vector<8x1xf32>
    %660 = tpu.reciprocal %659 {approx = true} : vector<8x1xf32> -> vector<8x1xf32>
    %661 = vector.broadcast %660 : vector<8x1xf32> to vector<8x8xf32>
    %662 = arith.mulf %657, %661 : vector<8x8xf32>
    %663 = vector.extract_strided_slice %582 {offsets = [0, 24], sizes = [8, 8], strides = [1, 1]} : vector<8x32xf32> to vector<8x8xf32>
    %cst_348 = arith.constant dense<0.000000e+00> : vector<8x8xf32>
    %664 = tpu.matmul %662, %663, %cst_348 {dimension_numbers = #tpu.dot_dimension_numbers<[1], [0], [0], [1], [0, 0, 1, 1], [], []>} : vector<8x8xf32>, vector<8x8xf32>, vector<8x8xf32> -> vector<8x8xf32>
    %665 = vector.extract_strided_slice %584 {offsets = [24, 0], sizes = [8, 32], strides = [1, 1]} : vector<32x32xf32> to vector<8x32xf32>
    %cst_349 = arith.constant dense<0.000000e+00> : vector<8x32xf32>
    %666 = tpu.matmul %664, %665, %cst_349 {dimension_numbers = #tpu.dot_dimension_numbers<[1], [0], [0], [1], [0, 0, 1, 1], [], []>} : vector<8x8xf32>, vector<8x32xf32>, vector<8x32xf32> -> vector<8x32xf32>
    %667 = arith.addf %647, %666 : vector<8x32xf32>
    %668 = vector.broadcast %586 : vector<1x32xf32> to vector<8x32xf32>
    %669 = arith.addf %667, %668 : vector<8x32xf32>
    %670 = arith.addf %561, %669 : vector<8x32xf32>
    %c0_350 = arith.constant 0 : index
    %c10 = arith.constant 10 : index
    %c0_351 = arith.constant 0 : index
    %671 = vector.load %arg22[%c0_350, %c10, %c0_351] : memref<2x15x32xf32, #tpu.memory_space<vmem>>, vector<1x1x32xf32>
    %672 = vector.shape_cast %671 : vector<1x1x32xf32> to vector<1x32xf32>
    %c0_352 = arith.constant 0 : index
    %c11 = arith.constant 11 : index
    %c0_353 = arith.constant 0 : index
    %673 = vector.load %arg22[%c0_352, %c11, %c0_353] : memref<2x15x32xf32, #tpu.memory_space<vmem>>, vector<1x1x32xf32>
    %674 = vector.shape_cast %673 : vector<1x1x32xf32> to vector<1x32xf32>
    %cst_354 = arith.constant dense<0.000000e+00> : vector<8xf32>
    %675 = vector.multi_reduction <add>, %670, %cst_354 [1] : vector<8x32xf32> to vector<8xf32>
    %676 = vector.shape_cast %675 : vector<8xf32> to vector<8x1xf32>
    %cst_355 = arith.constant 3.200000e+01 : f32
    %677 = vector.broadcast %cst_355 : f32 to vector<8x1xf32>
    %678 = arith.divf %676, %677 : vector<8x1xf32>
    %679 = vector.broadcast %678 : vector<8x1xf32> to vector<8x32xf32>
    %680 = arith.subf %670, %679 : vector<8x32xf32>
    %681 = arith.mulf %680, %680 : vector<8x32xf32>
    %cst_356 = arith.constant dense<0.000000e+00> : vector<8xf32>
    %682 = vector.multi_reduction <add>, %681, %cst_356 [1] : vector<8x32xf32> to vector<8xf32>
    %683 = vector.shape_cast %682 : vector<8xf32> to vector<8x1xf32>
    %cst_357 = arith.constant 3.200000e+01 : f32
    %684 = vector.broadcast %cst_357 : f32 to vector<8x1xf32>
    %685 = arith.divf %683, %684 : vector<8x1xf32>
    %cst_358 = arith.constant 9.99999974E-6 : f32
    %686 = vector.broadcast %cst_358 : f32 to vector<8x1xf32>
    %687 = arith.addf %685, %686 : vector<8x1xf32>
    %688 = math.rsqrt %687 : vector<8x1xf32>
    %689 = vector.broadcast %688 : vector<8x1xf32> to vector<8x32xf32>
    %690 = arith.mulf %680, %689 : vector<8x32xf32>
    %691 = vector.broadcast %672 : vector<1x32xf32> to vector<8x32xf32>
    %692 = arith.mulf %690, %691 : vector<8x32xf32>
    %693 = vector.broadcast %674 : vector<1x32xf32> to vector<8x32xf32>
    %694 = arith.addf %692, %693 : vector<8x32xf32>
    %c0_359 = arith.constant 0 : index
    %c0_360 = arith.constant 0 : index
    %c0_361 = arith.constant 0 : index
    %695 = vector.load %arg20[%c0_359, %c0_360, %c0_361] : memref<2x32x64xf32, #tpu.memory_space<vmem>>, vector<1x32x64xf32>
    %696 = vector.shape_cast %695 : vector<1x32x64xf32> to vector<32x64xf32>
    %c0_362 = arith.constant 0 : index
    %c0_363 = arith.constant 0 : index
    %c0_364 = arith.constant 0 : index
    %697 = vector.load %arg23[%c0_362, %c0_363, %c0_364] : memref<2x1x64xf32, #tpu.memory_space<vmem>>, vector<1x1x64xf32>
    %698 = vector.shape_cast %697 : vector<1x1x64xf32> to vector<1x64xf32>
    %cst_365 = arith.constant dense<0.000000e+00> : vector<8x64xf32>
    %699 = tpu.matmul %694, %696, %cst_365 {dimension_numbers = #tpu.dot_dimension_numbers<[1], [0], [0], [1], [0, 0, 1, 1], [], []>} : vector<8x32xf32>, vector<32x64xf32>, vector<8x64xf32> -> vector<8x64xf32>
    %700 = vector.broadcast %698 : vector<1x64xf32> to vector<8x64xf32>
    %701 = arith.addf %699, %700 : vector<8x64xf32>
    %cst_366 = arith.constant 0.000000e+00 : f32
    %702 = vector.broadcast %cst_366 : f32 to vector<8x64xf32>
    %703 = arith.maximumf %701, %702 : vector<8x64xf32>
    %c0_367 = arith.constant 0 : index
    %c0_368 = arith.constant 0 : index
    %c0_369 = arith.constant 0 : index
    %704 = vector.load %arg21[%c0_367, %c0_368, %c0_369] : memref<2x64x32xf32, #tpu.memory_space<vmem>>, vector<1x64x32xf32>
    %705 = vector.shape_cast %704 : vector<1x64x32xf32> to vector<64x32xf32>
    %c0_370 = arith.constant 0 : index
    %c12 = arith.constant 12 : index
    %c0_371 = arith.constant 0 : index
    %706 = vector.load %arg22[%c0_370, %c12, %c0_371] : memref<2x15x32xf32, #tpu.memory_space<vmem>>, vector<1x1x32xf32>
    %707 = vector.shape_cast %706 : vector<1x1x32xf32> to vector<1x32xf32>
    %cst_372 = arith.constant dense<0.000000e+00> : vector<8x32xf32>
    %708 = tpu.matmul %703, %705, %cst_372 {dimension_numbers = #tpu.dot_dimension_numbers<[1], [0], [0], [1], [0, 0, 1, 1], [], []>} : vector<8x64xf32>, vector<64x32xf32>, vector<8x32xf32> -> vector<8x32xf32>
    %709 = vector.broadcast %707 : vector<1x32xf32> to vector<8x32xf32>
    %710 = arith.addf %708, %709 : vector<8x32xf32>
    %711 = arith.addf %694, %710 : vector<8x32xf32>
    %c0_373 = arith.constant 0 : index
    %c13 = arith.constant 13 : index
    %c0_374 = arith.constant 0 : index
    %712 = vector.load %arg22[%c0_373, %c13, %c0_374] : memref<2x15x32xf32, #tpu.memory_space<vmem>>, vector<1x1x32xf32>
    %713 = vector.shape_cast %712 : vector<1x1x32xf32> to vector<1x32xf32>
    %c0_375 = arith.constant 0 : index
    %c14 = arith.constant 14 : index
    %c0_376 = arith.constant 0 : index
    %714 = vector.load %arg22[%c0_375, %c14, %c0_376] : memref<2x15x32xf32, #tpu.memory_space<vmem>>, vector<1x1x32xf32>
    %715 = vector.shape_cast %714 : vector<1x1x32xf32> to vector<1x32xf32>
    %cst_377 = arith.constant dense<0.000000e+00> : vector<8xf32>
    %716 = vector.multi_reduction <add>, %711, %cst_377 [1] : vector<8x32xf32> to vector<8xf32>
    %717 = vector.shape_cast %716 : vector<8xf32> to vector<8x1xf32>
    %cst_378 = arith.constant 3.200000e+01 : f32
    %718 = vector.broadcast %cst_378 : f32 to vector<8x1xf32>
    %719 = arith.divf %717, %718 : vector<8x1xf32>
    %720 = vector.broadcast %719 : vector<8x1xf32> to vector<8x32xf32>
    %721 = arith.subf %711, %720 : vector<8x32xf32>
    %722 = arith.mulf %721, %721 : vector<8x32xf32>
    %cst_379 = arith.constant dense<0.000000e+00> : vector<8xf32>
    %723 = vector.multi_reduction <add>, %722, %cst_379 [1] : vector<8x32xf32> to vector<8xf32>
    %724 = vector.shape_cast %723 : vector<8xf32> to vector<8x1xf32>
    %cst_380 = arith.constant 3.200000e+01 : f32
    %725 = vector.broadcast %cst_380 : f32 to vector<8x1xf32>
    %726 = arith.divf %724, %725 : vector<8x1xf32>
    %cst_381 = arith.constant 9.99999974E-6 : f32
    %727 = vector.broadcast %cst_381 : f32 to vector<8x1xf32>
    %728 = arith.addf %726, %727 : vector<8x1xf32>
    %729 = math.rsqrt %728 : vector<8x1xf32>
    %730 = vector.broadcast %729 : vector<8x1xf32> to vector<8x32xf32>
    %731 = arith.mulf %721, %730 : vector<8x32xf32>
    %732 = vector.broadcast %713 : vector<1x32xf32> to vector<8x32xf32>
    %733 = arith.mulf %731, %732 : vector<8x32xf32>
    %734 = vector.broadcast %715 : vector<1x32xf32> to vector<8x32xf32>
    %735 = arith.addf %733, %734 : vector<8x32xf32>
    %c1_382 = arith.constant 1 : index
    %c0_383 = arith.constant 0 : index
    %c0_384 = arith.constant 0 : index
    %c0_385 = arith.constant 0 : index
    %736 = vector.load %arg18[%c1_382, %c0_383, %c0_384, %c0_385] : memref<2x4x32x32xf32, #tpu.memory_space<vmem>>, vector<1x1x32x32xf32>
    %737 = vector.shape_cast %736 : vector<1x1x32x32xf32> to vector<32x32xf32>
    %c1_386 = arith.constant 1 : index
    %c0_387 = arith.constant 0 : index
    %c0_388 = arith.constant 0 : index
    %738 = vector.load %arg22[%c1_386, %c0_387, %c0_388] : memref<2x15x32xf32, #tpu.memory_space<vmem>>, vector<1x1x32xf32>
    %739 = vector.shape_cast %738 : vector<1x1x32xf32> to vector<1x32xf32>
    %cst_389 = arith.constant dense<0.000000e+00> : vector<8x32xf32>
    %740 = tpu.matmul %735, %737, %cst_389 {dimension_numbers = #tpu.dot_dimension_numbers<[1], [0], [0], [1], [0, 0, 1, 1], [], []>} : vector<8x32xf32>, vector<32x32xf32>, vector<8x32xf32> -> vector<8x32xf32>
    %741 = vector.broadcast %739 : vector<1x32xf32> to vector<8x32xf32>
    %742 = arith.addf %740, %741 : vector<8x32xf32>
    %c1_390 = arith.constant 1 : index
    %c1_391 = arith.constant 1 : index
    %c0_392 = arith.constant 0 : index
    %c0_393 = arith.constant 0 : index
    %743 = vector.load %arg18[%c1_390, %c1_391, %c0_392, %c0_393] : memref<2x4x32x32xf32, #tpu.memory_space<vmem>>, vector<1x1x32x32xf32>
    %744 = vector.shape_cast %743 : vector<1x1x32x32xf32> to vector<32x32xf32>
    %c1_394 = arith.constant 1 : index
    %c1_395 = arith.constant 1 : index
    %c0_396 = arith.constant 0 : index
    %745 = vector.load %arg22[%c1_394, %c1_395, %c0_396] : memref<2x15x32xf32, #tpu.memory_space<vmem>>, vector<1x1x32xf32>
    %746 = vector.shape_cast %745 : vector<1x1x32xf32> to vector<1x32xf32>
    %cst_397 = arith.constant dense<0.000000e+00> : vector<8x32xf32>
    %747 = tpu.matmul %735, %744, %cst_397 {dimension_numbers = #tpu.dot_dimension_numbers<[1], [0], [0], [1], [0, 0, 1, 1], [], []>} : vector<8x32xf32>, vector<32x32xf32>, vector<8x32xf32> -> vector<8x32xf32>
    %748 = vector.broadcast %746 : vector<1x32xf32> to vector<8x32xf32>
    %749 = arith.addf %747, %748 : vector<8x32xf32>
    %c1_398 = arith.constant 1 : index
    %c2_399 = arith.constant 2 : index
    %c0_400 = arith.constant 0 : index
    %c0_401 = arith.constant 0 : index
    %750 = vector.load %arg18[%c1_398, %c2_399, %c0_400, %c0_401] : memref<2x4x32x32xf32, #tpu.memory_space<vmem>>, vector<1x1x32x32xf32>
    %751 = vector.shape_cast %750 : vector<1x1x32x32xf32> to vector<32x32xf32>
    %c1_402 = arith.constant 1 : index
    %c2_403 = arith.constant 2 : index
    %c0_404 = arith.constant 0 : index
    %752 = vector.load %arg22[%c1_402, %c2_403, %c0_404] : memref<2x15x32xf32, #tpu.memory_space<vmem>>, vector<1x1x32xf32>
    %753 = vector.shape_cast %752 : vector<1x1x32xf32> to vector<1x32xf32>
    %cst_405 = arith.constant dense<0.000000e+00> : vector<8x32xf32>
    %754 = tpu.matmul %735, %751, %cst_405 {dimension_numbers = #tpu.dot_dimension_numbers<[1], [0], [0], [1], [0, 0, 1, 1], [], []>} : vector<8x32xf32>, vector<32x32xf32>, vector<8x32xf32> -> vector<8x32xf32>
    %755 = vector.broadcast %753 : vector<1x32xf32> to vector<8x32xf32>
    %756 = arith.addf %754, %755 : vector<8x32xf32>
    %c1_406 = arith.constant 1 : index
    %c3_407 = arith.constant 3 : index
    %c0_408 = arith.constant 0 : index
    %c0_409 = arith.constant 0 : index
    %757 = vector.load %arg18[%c1_406, %c3_407, %c0_408, %c0_409] : memref<2x4x32x32xf32, #tpu.memory_space<vmem>>, vector<1x1x32x32xf32>
    %758 = vector.shape_cast %757 : vector<1x1x32x32xf32> to vector<32x32xf32>
    %c1_410 = arith.constant 1 : index
    %c3_411 = arith.constant 3 : index
    %c0_412 = arith.constant 0 : index
    %759 = vector.load %arg22[%c1_410, %c3_411, %c0_412] : memref<2x15x32xf32, #tpu.memory_space<vmem>>, vector<1x1x32xf32>
    %760 = vector.shape_cast %759 : vector<1x1x32xf32> to vector<1x32xf32>
    %761 = tpu.iota {dimensions = array<i32: 0>} : vector<8x8xi32>
    %762 = tpu.iota {dimensions = array<i32: 1>} : vector<8x8xi32>
    %763 = arith.cmpi sle, %762, %761 : vector<8x8xi32>
    %cst_413 = arith.constant 0.000000e+00 : f32
    %764 = vector.broadcast %cst_413 : f32 to vector<8x32xf32>
    %765 = vector.extract_strided_slice %742 {offsets = [0, 0], sizes = [8, 8], strides = [1, 1]} : vector<8x32xf32> to vector<8x8xf32>
    %766 = vector.extract_strided_slice %749 {offsets = [0, 0], sizes = [8, 8], strides = [1, 1]} : vector<8x32xf32> to vector<8x8xf32>
    %cst_414 = arith.constant dense<0.000000e+00> : vector<8x8xf32>
    %767 = tpu.matmul %765, %766, %cst_414 {dimension_numbers = #tpu.dot_dimension_numbers<[1], [1], [0], [0], [0, 0, 1, 0], [], []>} : vector<8x8xf32>, vector<8x8xf32>, vector<8x8xf32> -> vector<8x8xf32>
    %cst_415 = arith.constant 0.353553385 : f32
    %768 = vector.broadcast %cst_415 : f32 to vector<8x8xf32>
    %769 = arith.mulf %767, %768 : vector<8x8xf32>
    %cst_416 = arith.constant -1.000000e+30 : f32
    %770 = vector.broadcast %cst_416 : f32 to vector<8x8xf32>
    %771 = arith.select %763, %769, %770 : vector<8x8xi1>, vector<8x8xf32>
    %cst_417 = arith.constant dense<0xFF800000> : vector<8xf32>
    %772 = vector.multi_reduction <maximumf>, %771, %cst_417 [1] : vector<8x8xf32> to vector<8xf32>
    %773 = vector.shape_cast %772 : vector<8xf32> to vector<8x1xf32>
    %774 = vector.broadcast %773 : vector<8x1xf32> to vector<8x8xf32>
    %775 = arith.subf %771, %774 : vector<8x8xf32>
    %776 = math.exp %775 : vector<8x8xf32>
    %cst_418 = arith.constant dense<0.000000e+00> : vector<8xf32>
    %777 = vector.multi_reduction <add>, %776, %cst_418 [1] : vector<8x8xf32> to vector<8xf32>
    %778 = vector.shape_cast %777 : vector<8xf32> to vector<8x1xf32>
    %779 = tpu.reciprocal %778 {approx = true} : vector<8x1xf32> -> vector<8x1xf32>
    %780 = vector.broadcast %779 : vector<8x1xf32> to vector<8x8xf32>
    %781 = arith.mulf %776, %780 : vector<8x8xf32>
    %782 = vector.extract_strided_slice %756 {offsets = [0, 0], sizes = [8, 8], strides = [1, 1]} : vector<8x32xf32> to vector<8x8xf32>
    %cst_419 = arith.constant dense<0.000000e+00> : vector<8x8xf32>
    %783 = tpu.matmul %781, %782, %cst_419 {dimension_numbers = #tpu.dot_dimension_numbers<[1], [0], [0], [1], [0, 0, 1, 1], [], []>} : vector<8x8xf32>, vector<8x8xf32>, vector<8x8xf32> -> vector<8x8xf32>
    %784 = vector.extract_strided_slice %758 {offsets = [0, 0], sizes = [8, 32], strides = [1, 1]} : vector<32x32xf32> to vector<8x32xf32>
    %cst_420 = arith.constant dense<0.000000e+00> : vector<8x32xf32>
    %785 = tpu.matmul %783, %784, %cst_420 {dimension_numbers = #tpu.dot_dimension_numbers<[1], [0], [0], [1], [0, 0, 1, 1], [], []>} : vector<8x8xf32>, vector<8x32xf32>, vector<8x32xf32> -> vector<8x32xf32>
    %786 = arith.addf %764, %785 : vector<8x32xf32>
    %787 = vector.extract_strided_slice %742 {offsets = [0, 8], sizes = [8, 8], strides = [1, 1]} : vector<8x32xf32> to vector<8x8xf32>
    %788 = vector.extract_strided_slice %749 {offsets = [0, 8], sizes = [8, 8], strides = [1, 1]} : vector<8x32xf32> to vector<8x8xf32>
    %cst_421 = arith.constant dense<0.000000e+00> : vector<8x8xf32>
    %789 = tpu.matmul %787, %788, %cst_421 {dimension_numbers = #tpu.dot_dimension_numbers<[1], [1], [0], [0], [0, 0, 1, 0], [], []>} : vector<8x8xf32>, vector<8x8xf32>, vector<8x8xf32> -> vector<8x8xf32>
    %cst_422 = arith.constant 0.353553385 : f32
    %790 = vector.broadcast %cst_422 : f32 to vector<8x8xf32>
    %791 = arith.mulf %789, %790 : vector<8x8xf32>
    %cst_423 = arith.constant -1.000000e+30 : f32
    %792 = vector.broadcast %cst_423 : f32 to vector<8x8xf32>
    %793 = arith.select %763, %791, %792 : vector<8x8xi1>, vector<8x8xf32>
    %cst_424 = arith.constant dense<0xFF800000> : vector<8xf32>
    %794 = vector.multi_reduction <maximumf>, %793, %cst_424 [1] : vector<8x8xf32> to vector<8xf32>
    %795 = vector.shape_cast %794 : vector<8xf32> to vector<8x1xf32>
    %796 = vector.broadcast %795 : vector<8x1xf32> to vector<8x8xf32>
    %797 = arith.subf %793, %796 : vector<8x8xf32>
    %798 = math.exp %797 : vector<8x8xf32>
    %cst_425 = arith.constant dense<0.000000e+00> : vector<8xf32>
    %799 = vector.multi_reduction <add>, %798, %cst_425 [1] : vector<8x8xf32> to vector<8xf32>
    %800 = vector.shape_cast %799 : vector<8xf32> to vector<8x1xf32>
    %801 = tpu.reciprocal %800 {approx = true} : vector<8x1xf32> -> vector<8x1xf32>
    %802 = vector.broadcast %801 : vector<8x1xf32> to vector<8x8xf32>
    %803 = arith.mulf %798, %802 : vector<8x8xf32>
    %804 = vector.extract_strided_slice %756 {offsets = [0, 8], sizes = [8, 8], strides = [1, 1]} : vector<8x32xf32> to vector<8x8xf32>
    %cst_426 = arith.constant dense<0.000000e+00> : vector<8x8xf32>
    %805 = tpu.matmul %803, %804, %cst_426 {dimension_numbers = #tpu.dot_dimension_numbers<[1], [0], [0], [1], [0, 0, 1, 1], [], []>} : vector<8x8xf32>, vector<8x8xf32>, vector<8x8xf32> -> vector<8x8xf32>
    %806 = vector.extract_strided_slice %758 {offsets = [8, 0], sizes = [8, 32], strides = [1, 1]} : vector<32x32xf32> to vector<8x32xf32>
    %cst_427 = arith.constant dense<0.000000e+00> : vector<8x32xf32>
    %807 = tpu.matmul %805, %806, %cst_427 {dimension_numbers = #tpu.dot_dimension_numbers<[1], [0], [0], [1], [0, 0, 1, 1], [], []>} : vector<8x8xf32>, vector<8x32xf32>, vector<8x32xf32> -> vector<8x32xf32>
    %808 = arith.addf %786, %807 : vector<8x32xf32>
    %809 = vector.extract_strided_slice %742 {offsets = [0, 16], sizes = [8, 8], strides = [1, 1]} : vector<8x32xf32> to vector<8x8xf32>
    %810 = vector.extract_strided_slice %749 {offsets = [0, 16], sizes = [8, 8], strides = [1, 1]} : vector<8x32xf32> to vector<8x8xf32>
    %cst_428 = arith.constant dense<0.000000e+00> : vector<8x8xf32>
    %811 = tpu.matmul %809, %810, %cst_428 {dimension_numbers = #tpu.dot_dimension_numbers<[1], [1], [0], [0], [0, 0, 1, 0], [], []>} : vector<8x8xf32>, vector<8x8xf32>, vector<8x8xf32> -> vector<8x8xf32>
    %cst_429 = arith.constant 0.353553385 : f32
    %812 = vector.broadcast %cst_429 : f32 to vector<8x8xf32>
    %813 = arith.mulf %811, %812 : vector<8x8xf32>
    %cst_430 = arith.constant -1.000000e+30 : f32
    %814 = vector.broadcast %cst_430 : f32 to vector<8x8xf32>
    %815 = arith.select %763, %813, %814 : vector<8x8xi1>, vector<8x8xf32>
    %cst_431 = arith.constant dense<0xFF800000> : vector<8xf32>
    %816 = vector.multi_reduction <maximumf>, %815, %cst_431 [1] : vector<8x8xf32> to vector<8xf32>
    %817 = vector.shape_cast %816 : vector<8xf32> to vector<8x1xf32>
    %818 = vector.broadcast %817 : vector<8x1xf32> to vector<8x8xf32>
    %819 = arith.subf %815, %818 : vector<8x8xf32>
    %820 = math.exp %819 : vector<8x8xf32>
    %cst_432 = arith.constant dense<0.000000e+00> : vector<8xf32>
    %821 = vector.multi_reduction <add>, %820, %cst_432 [1] : vector<8x8xf32> to vector<8xf32>
    %822 = vector.shape_cast %821 : vector<8xf32> to vector<8x1xf32>
    %823 = tpu.reciprocal %822 {approx = true} : vector<8x1xf32> -> vector<8x1xf32>
    %824 = vector.broadcast %823 : vector<8x1xf32> to vector<8x8xf32>
    %825 = arith.mulf %820, %824 : vector<8x8xf32>
    %826 = vector.extract_strided_slice %756 {offsets = [0, 16], sizes = [8, 8], strides = [1, 1]} : vector<8x32xf32> to vector<8x8xf32>
    %cst_433 = arith.constant dense<0.000000e+00> : vector<8x8xf32>
    %827 = tpu.matmul %825, %826, %cst_433 {dimension_numbers = #tpu.dot_dimension_numbers<[1], [0], [0], [1], [0, 0, 1, 1], [], []>} : vector<8x8xf32>, vector<8x8xf32>, vector<8x8xf32> -> vector<8x8xf32>
    %828 = vector.extract_strided_slice %758 {offsets = [16, 0], sizes = [8, 32], strides = [1, 1]} : vector<32x32xf32> to vector<8x32xf32>
    %cst_434 = arith.constant dense<0.000000e+00> : vector<8x32xf32>
    %829 = tpu.matmul %827, %828, %cst_434 {dimension_numbers = #tpu.dot_dimension_numbers<[1], [0], [0], [1], [0, 0, 1, 1], [], []>} : vector<8x8xf32>, vector<8x32xf32>, vector<8x32xf32> -> vector<8x32xf32>
    %830 = arith.addf %808, %829 : vector<8x32xf32>
    %831 = vector.extract_strided_slice %742 {offsets = [0, 24], sizes = [8, 8], strides = [1, 1]} : vector<8x32xf32> to vector<8x8xf32>
    %832 = vector.extract_strided_slice %749 {offsets = [0, 24], sizes = [8, 8], strides = [1, 1]} : vector<8x32xf32> to vector<8x8xf32>
    %cst_435 = arith.constant dense<0.000000e+00> : vector<8x8xf32>
    %833 = tpu.matmul %831, %832, %cst_435 {dimension_numbers = #tpu.dot_dimension_numbers<[1], [1], [0], [0], [0, 0, 1, 0], [], []>} : vector<8x8xf32>, vector<8x8xf32>, vector<8x8xf32> -> vector<8x8xf32>
    %cst_436 = arith.constant 0.353553385 : f32
    %834 = vector.broadcast %cst_436 : f32 to vector<8x8xf32>
    %835 = arith.mulf %833, %834 : vector<8x8xf32>
    %cst_437 = arith.constant -1.000000e+30 : f32
    %836 = vector.broadcast %cst_437 : f32 to vector<8x8xf32>
    %837 = arith.select %763, %835, %836 : vector<8x8xi1>, vector<8x8xf32>
    %cst_438 = arith.constant dense<0xFF800000> : vector<8xf32>
    %838 = vector.multi_reduction <maximumf>, %837, %cst_438 [1] : vector<8x8xf32> to vector<8xf32>
    %839 = vector.shape_cast %838 : vector<8xf32> to vector<8x1xf32>
    %840 = vector.broadcast %839 : vector<8x1xf32> to vector<8x8xf32>
    %841 = arith.subf %837, %840 : vector<8x8xf32>
    %842 = math.exp %841 : vector<8x8xf32>
    %cst_439 = arith.constant dense<0.000000e+00> : vector<8xf32>
    %843 = vector.multi_reduction <add>, %842, %cst_439 [1] : vector<8x8xf32> to vector<8xf32>
    %844 = vector.shape_cast %843 : vector<8xf32> to vector<8x1xf32>
    %845 = tpu.reciprocal %844 {approx = true} : vector<8x1xf32> -> vector<8x1xf32>
    %846 = vector.broadcast %845 : vector<8x1xf32> to vector<8x8xf32>
    %847 = arith.mulf %842, %846 : vector<8x8xf32>
    %848 = vector.extract_strided_slice %756 {offsets = [0, 24], sizes = [8, 8], strides = [1, 1]} : vector<8x32xf32> to vector<8x8xf32>
    %cst_440 = arith.constant dense<0.000000e+00> : vector<8x8xf32>
    %849 = tpu.matmul %847, %848, %cst_440 {dimension_numbers = #tpu.dot_dimension_numbers<[1], [0], [0], [1], [0, 0, 1, 1], [], []>} : vector<8x8xf32>, vector<8x8xf32>, vector<8x8xf32> -> vector<8x8xf32>
    %850 = vector.extract_strided_slice %758 {offsets = [24, 0], sizes = [8, 32], strides = [1, 1]} : vector<32x32xf32> to vector<8x32xf32>
    %cst_441 = arith.constant dense<0.000000e+00> : vector<8x32xf32>
    %851 = tpu.matmul %849, %850, %cst_441 {dimension_numbers = #tpu.dot_dimension_numbers<[1], [0], [0], [1], [0, 0, 1, 1], [], []>} : vector<8x8xf32>, vector<8x32xf32>, vector<8x32xf32> -> vector<8x32xf32>
    %852 = arith.addf %830, %851 : vector<8x32xf32>
    %853 = vector.broadcast %760 : vector<1x32xf32> to vector<8x32xf32>
    %854 = arith.addf %852, %853 : vector<8x32xf32>
    %855 = arith.addf %735, %854 : vector<8x32xf32>
    %c1_442 = arith.constant 1 : index
    %c4_443 = arith.constant 4 : index
    %c0_444 = arith.constant 0 : index
    %856 = vector.load %arg22[%c1_442, %c4_443, %c0_444] : memref<2x15x32xf32, #tpu.memory_space<vmem>>, vector<1x1x32xf32>
    %857 = vector.shape_cast %856 : vector<1x1x32xf32> to vector<1x32xf32>
    %c1_445 = arith.constant 1 : index
    %c5_446 = arith.constant 5 : index
    %c0_447 = arith.constant 0 : index
    %858 = vector.load %arg22[%c1_445, %c5_446, %c0_447] : memref<2x15x32xf32, #tpu.memory_space<vmem>>, vector<1x1x32xf32>
    %859 = vector.shape_cast %858 : vector<1x1x32xf32> to vector<1x32xf32>
    %cst_448 = arith.constant dense<0.000000e+00> : vector<8xf32>
    %860 = vector.multi_reduction <add>, %855, %cst_448 [1] : vector<8x32xf32> to vector<8xf32>
    %861 = vector.shape_cast %860 : vector<8xf32> to vector<8x1xf32>
    %cst_449 = arith.constant 3.200000e+01 : f32
    %862 = vector.broadcast %cst_449 : f32 to vector<8x1xf32>
    %863 = arith.divf %861, %862 : vector<8x1xf32>
    %864 = vector.broadcast %863 : vector<8x1xf32> to vector<8x32xf32>
    %865 = arith.subf %855, %864 : vector<8x32xf32>
    %866 = arith.mulf %865, %865 : vector<8x32xf32>
    %cst_450 = arith.constant dense<0.000000e+00> : vector<8xf32>
    %867 = vector.multi_reduction <add>, %866, %cst_450 [1] : vector<8x32xf32> to vector<8xf32>
    %868 = vector.shape_cast %867 : vector<8xf32> to vector<8x1xf32>
    %cst_451 = arith.constant 3.200000e+01 : f32
    %869 = vector.broadcast %cst_451 : f32 to vector<8x1xf32>
    %870 = arith.divf %868, %869 : vector<8x1xf32>
    %cst_452 = arith.constant 9.99999974E-6 : f32
    %871 = vector.broadcast %cst_452 : f32 to vector<8x1xf32>
    %872 = arith.addf %870, %871 : vector<8x1xf32>
    %873 = math.rsqrt %872 : vector<8x1xf32>
    %874 = vector.broadcast %873 : vector<8x1xf32> to vector<8x32xf32>
    %875 = arith.mulf %865, %874 : vector<8x32xf32>
    %876 = vector.broadcast %857 : vector<1x32xf32> to vector<8x32xf32>
    %877 = arith.mulf %875, %876 : vector<8x32xf32>
    %878 = vector.broadcast %859 : vector<1x32xf32> to vector<8x32xf32>
    %879 = arith.addf %877, %878 : vector<8x32xf32>
    %c1_453 = arith.constant 1 : index
    %c0_454 = arith.constant 0 : index
    %c0_455 = arith.constant 0 : index
    %c0_456 = arith.constant 0 : index
    %880 = vector.load %arg19[%c1_453, %c0_454, %c0_455, %c0_456] : memref<2x4x32x32xf32, #tpu.memory_space<vmem>>, vector<1x1x32x32xf32>
    %881 = vector.shape_cast %880 : vector<1x1x32x32xf32> to vector<32x32xf32>
    %c1_457 = arith.constant 1 : index
    %c6_458 = arith.constant 6 : index
    %c0_459 = arith.constant 0 : index
    %882 = vector.load %arg22[%c1_457, %c6_458, %c0_459] : memref<2x15x32xf32, #tpu.memory_space<vmem>>, vector<1x1x32xf32>
    %883 = vector.shape_cast %882 : vector<1x1x32xf32> to vector<1x32xf32>
    %cst_460 = arith.constant dense<0.000000e+00> : vector<8x32xf32>
    %884 = tpu.matmul %879, %881, %cst_460 {dimension_numbers = #tpu.dot_dimension_numbers<[1], [0], [0], [1], [0, 0, 1, 1], [], []>} : vector<8x32xf32>, vector<32x32xf32>, vector<8x32xf32> -> vector<8x32xf32>
    %885 = vector.broadcast %883 : vector<1x32xf32> to vector<8x32xf32>
    %886 = arith.addf %884, %885 : vector<8x32xf32>
    %c1_461 = arith.constant 1 : index
    %c1_462 = arith.constant 1 : index
    %c0_463 = arith.constant 0 : index
    %c0_464 = arith.constant 0 : index
    %887 = vector.load %arg19[%c1_461, %c1_462, %c0_463, %c0_464] : memref<2x4x32x32xf32, #tpu.memory_space<vmem>>, vector<1x1x32x32xf32>
    %888 = vector.shape_cast %887 : vector<1x1x32x32xf32> to vector<32x32xf32>
    %c1_465 = arith.constant 1 : index
    %c7_466 = arith.constant 7 : index
    %c0_467 = arith.constant 0 : index
    %889 = vector.load %arg22[%c1_465, %c7_466, %c0_467] : memref<2x15x32xf32, #tpu.memory_space<vmem>>, vector<1x1x32xf32>
    %890 = vector.shape_cast %889 : vector<1x1x32xf32> to vector<1x32xf32>
    %cst_468 = arith.constant dense<0.000000e+00> : vector<8x32xf32>
    %891 = tpu.matmul %410, %888, %cst_468 {dimension_numbers = #tpu.dot_dimension_numbers<[1], [0], [0], [1], [0, 0, 1, 1], [], []>} : vector<8x32xf32>, vector<32x32xf32>, vector<8x32xf32> -> vector<8x32xf32>
    %892 = vector.broadcast %890 : vector<1x32xf32> to vector<8x32xf32>
    %893 = arith.addf %891, %892 : vector<8x32xf32>
    %c1_469 = arith.constant 1 : index
    %c2_470 = arith.constant 2 : index
    %c0_471 = arith.constant 0 : index
    %c0_472 = arith.constant 0 : index
    %894 = vector.load %arg19[%c1_469, %c2_470, %c0_471, %c0_472] : memref<2x4x32x32xf32, #tpu.memory_space<vmem>>, vector<1x1x32x32xf32>
    %895 = vector.shape_cast %894 : vector<1x1x32x32xf32> to vector<32x32xf32>
    %c1_473 = arith.constant 1 : index
    %c8_474 = arith.constant 8 : index
    %c0_475 = arith.constant 0 : index
    %896 = vector.load %arg22[%c1_473, %c8_474, %c0_475] : memref<2x15x32xf32, #tpu.memory_space<vmem>>, vector<1x1x32xf32>
    %897 = vector.shape_cast %896 : vector<1x1x32xf32> to vector<1x32xf32>
    %cst_476 = arith.constant dense<0.000000e+00> : vector<8x32xf32>
    %898 = tpu.matmul %410, %895, %cst_476 {dimension_numbers = #tpu.dot_dimension_numbers<[1], [0], [0], [1], [0, 0, 1, 1], [], []>} : vector<8x32xf32>, vector<32x32xf32>, vector<8x32xf32> -> vector<8x32xf32>
    %899 = vector.broadcast %897 : vector<1x32xf32> to vector<8x32xf32>
    %900 = arith.addf %898, %899 : vector<8x32xf32>
    %c1_477 = arith.constant 1 : index
    %c3_478 = arith.constant 3 : index
    %c0_479 = arith.constant 0 : index
    %c0_480 = arith.constant 0 : index
    %901 = vector.load %arg19[%c1_477, %c3_478, %c0_479, %c0_480] : memref<2x4x32x32xf32, #tpu.memory_space<vmem>>, vector<1x1x32x32xf32>
    %902 = vector.shape_cast %901 : vector<1x1x32x32xf32> to vector<32x32xf32>
    %c1_481 = arith.constant 1 : index
    %c9_482 = arith.constant 9 : index
    %c0_483 = arith.constant 0 : index
    %903 = vector.load %arg22[%c1_481, %c9_482, %c0_483] : memref<2x15x32xf32, #tpu.memory_space<vmem>>, vector<1x1x32xf32>
    %904 = vector.shape_cast %903 : vector<1x1x32xf32> to vector<1x32xf32>
    %cst_484 = arith.constant 0.000000e+00 : f32
    %905 = vector.broadcast %cst_484 : f32 to vector<8x32xf32>
    %906 = vector.extract_strided_slice %886 {offsets = [0, 0], sizes = [8, 8], strides = [1, 1]} : vector<8x32xf32> to vector<8x8xf32>
    %907 = vector.extract_strided_slice %893 {offsets = [0, 0], sizes = [8, 8], strides = [1, 1]} : vector<8x32xf32> to vector<8x8xf32>
    %cst_485 = arith.constant dense<0.000000e+00> : vector<8x8xf32>
    %908 = tpu.matmul %906, %907, %cst_485 {dimension_numbers = #tpu.dot_dimension_numbers<[1], [1], [0], [0], [0, 0, 1, 0], [], []>} : vector<8x8xf32>, vector<8x8xf32>, vector<8x8xf32> -> vector<8x8xf32>
    %cst_486 = arith.constant 0.353553385 : f32
    %909 = vector.broadcast %cst_486 : f32 to vector<8x8xf32>
    %910 = arith.mulf %908, %909 : vector<8x8xf32>
    %cst_487 = arith.constant dense<0xFF800000> : vector<8xf32>
    %911 = vector.multi_reduction <maximumf>, %910, %cst_487 [1] : vector<8x8xf32> to vector<8xf32>
    %912 = vector.shape_cast %911 : vector<8xf32> to vector<8x1xf32>
    %913 = vector.broadcast %912 : vector<8x1xf32> to vector<8x8xf32>
    %914 = arith.subf %910, %913 : vector<8x8xf32>
    %915 = math.exp %914 : vector<8x8xf32>
    %cst_488 = arith.constant dense<0.000000e+00> : vector<8xf32>
    %916 = vector.multi_reduction <add>, %915, %cst_488 [1] : vector<8x8xf32> to vector<8xf32>
    %917 = vector.shape_cast %916 : vector<8xf32> to vector<8x1xf32>
    %918 = tpu.reciprocal %917 {approx = true} : vector<8x1xf32> -> vector<8x1xf32>
    %919 = vector.broadcast %918 : vector<8x1xf32> to vector<8x8xf32>
    %920 = arith.mulf %915, %919 : vector<8x8xf32>
    %921 = vector.extract_strided_slice %900 {offsets = [0, 0], sizes = [8, 8], strides = [1, 1]} : vector<8x32xf32> to vector<8x8xf32>
    %cst_489 = arith.constant dense<0.000000e+00> : vector<8x8xf32>
    %922 = tpu.matmul %920, %921, %cst_489 {dimension_numbers = #tpu.dot_dimension_numbers<[1], [0], [0], [1], [0, 0, 1, 1], [], []>} : vector<8x8xf32>, vector<8x8xf32>, vector<8x8xf32> -> vector<8x8xf32>
    %923 = vector.extract_strided_slice %902 {offsets = [0, 0], sizes = [8, 32], strides = [1, 1]} : vector<32x32xf32> to vector<8x32xf32>
    %cst_490 = arith.constant dense<0.000000e+00> : vector<8x32xf32>
    %924 = tpu.matmul %922, %923, %cst_490 {dimension_numbers = #tpu.dot_dimension_numbers<[1], [0], [0], [1], [0, 0, 1, 1], [], []>} : vector<8x8xf32>, vector<8x32xf32>, vector<8x32xf32> -> vector<8x32xf32>
    %925 = arith.addf %905, %924 : vector<8x32xf32>
    %926 = vector.extract_strided_slice %886 {offsets = [0, 8], sizes = [8, 8], strides = [1, 1]} : vector<8x32xf32> to vector<8x8xf32>
    %927 = vector.extract_strided_slice %893 {offsets = [0, 8], sizes = [8, 8], strides = [1, 1]} : vector<8x32xf32> to vector<8x8xf32>
    %cst_491 = arith.constant dense<0.000000e+00> : vector<8x8xf32>
    %928 = tpu.matmul %926, %927, %cst_491 {dimension_numbers = #tpu.dot_dimension_numbers<[1], [1], [0], [0], [0, 0, 1, 0], [], []>} : vector<8x8xf32>, vector<8x8xf32>, vector<8x8xf32> -> vector<8x8xf32>
    %cst_492 = arith.constant 0.353553385 : f32
    %929 = vector.broadcast %cst_492 : f32 to vector<8x8xf32>
    %930 = arith.mulf %928, %929 : vector<8x8xf32>
    %cst_493 = arith.constant dense<0xFF800000> : vector<8xf32>
    %931 = vector.multi_reduction <maximumf>, %930, %cst_493 [1] : vector<8x8xf32> to vector<8xf32>
    %932 = vector.shape_cast %931 : vector<8xf32> to vector<8x1xf32>
    %933 = vector.broadcast %932 : vector<8x1xf32> to vector<8x8xf32>
    %934 = arith.subf %930, %933 : vector<8x8xf32>
    %935 = math.exp %934 : vector<8x8xf32>
    %cst_494 = arith.constant dense<0.000000e+00> : vector<8xf32>
    %936 = vector.multi_reduction <add>, %935, %cst_494 [1] : vector<8x8xf32> to vector<8xf32>
    %937 = vector.shape_cast %936 : vector<8xf32> to vector<8x1xf32>
    %938 = tpu.reciprocal %937 {approx = true} : vector<8x1xf32> -> vector<8x1xf32>
    %939 = vector.broadcast %938 : vector<8x1xf32> to vector<8x8xf32>
    %940 = arith.mulf %935, %939 : vector<8x8xf32>
    %941 = vector.extract_strided_slice %900 {offsets = [0, 8], sizes = [8, 8], strides = [1, 1]} : vector<8x32xf32> to vector<8x8xf32>
    %cst_495 = arith.constant dense<0.000000e+00> : vector<8x8xf32>
    %942 = tpu.matmul %940, %941, %cst_495 {dimension_numbers = #tpu.dot_dimension_numbers<[1], [0], [0], [1], [0, 0, 1, 1], [], []>} : vector<8x8xf32>, vector<8x8xf32>, vector<8x8xf32> -> vector<8x8xf32>
    %943 = vector.extract_strided_slice %902 {offsets = [8, 0], sizes = [8, 32], strides = [1, 1]} : vector<32x32xf32> to vector<8x32xf32>
    %cst_496 = arith.constant dense<0.000000e+00> : vector<8x32xf32>
    %944 = tpu.matmul %942, %943, %cst_496 {dimension_numbers = #tpu.dot_dimension_numbers<[1], [0], [0], [1], [0, 0, 1, 1], [], []>} : vector<8x8xf32>, vector<8x32xf32>, vector<8x32xf32> -> vector<8x32xf32>
    %945 = arith.addf %925, %944 : vector<8x32xf32>
    %946 = vector.extract_strided_slice %886 {offsets = [0, 16], sizes = [8, 8], strides = [1, 1]} : vector<8x32xf32> to vector<8x8xf32>
    %947 = vector.extract_strided_slice %893 {offsets = [0, 16], sizes = [8, 8], strides = [1, 1]} : vector<8x32xf32> to vector<8x8xf32>
    %cst_497 = arith.constant dense<0.000000e+00> : vector<8x8xf32>
    %948 = tpu.matmul %946, %947, %cst_497 {dimension_numbers = #tpu.dot_dimension_numbers<[1], [1], [0], [0], [0, 0, 1, 0], [], []>} : vector<8x8xf32>, vector<8x8xf32>, vector<8x8xf32> -> vector<8x8xf32>
    %cst_498 = arith.constant 0.353553385 : f32
    %949 = vector.broadcast %cst_498 : f32 to vector<8x8xf32>
    %950 = arith.mulf %948, %949 : vector<8x8xf32>
    %cst_499 = arith.constant dense<0xFF800000> : vector<8xf32>
    %951 = vector.multi_reduction <maximumf>, %950, %cst_499 [1] : vector<8x8xf32> to vector<8xf32>
    %952 = vector.shape_cast %951 : vector<8xf32> to vector<8x1xf32>
    %953 = vector.broadcast %952 : vector<8x1xf32> to vector<8x8xf32>
    %954 = arith.subf %950, %953 : vector<8x8xf32>
    %955 = math.exp %954 : vector<8x8xf32>
    %cst_500 = arith.constant dense<0.000000e+00> : vector<8xf32>
    %956 = vector.multi_reduction <add>, %955, %cst_500 [1] : vector<8x8xf32> to vector<8xf32>
    %957 = vector.shape_cast %956 : vector<8xf32> to vector<8x1xf32>
    %958 = tpu.reciprocal %957 {approx = true} : vector<8x1xf32> -> vector<8x1xf32>
    %959 = vector.broadcast %958 : vector<8x1xf32> to vector<8x8xf32>
    %960 = arith.mulf %955, %959 : vector<8x8xf32>
    %961 = vector.extract_strided_slice %900 {offsets = [0, 16], sizes = [8, 8], strides = [1, 1]} : vector<8x32xf32> to vector<8x8xf32>
    %cst_501 = arith.constant dense<0.000000e+00> : vector<8x8xf32>
    %962 = tpu.matmul %960, %961, %cst_501 {dimension_numbers = #tpu.dot_dimension_numbers<[1], [0], [0], [1], [0, 0, 1, 1], [], []>} : vector<8x8xf32>, vector<8x8xf32>, vector<8x8xf32> -> vector<8x8xf32>
    %963 = vector.extract_strided_slice %902 {offsets = [16, 0], sizes = [8, 32], strides = [1, 1]} : vector<32x32xf32> to vector<8x32xf32>
    %cst_502 = arith.constant dense<0.000000e+00> : vector<8x32xf32>
    %964 = tpu.matmul %962, %963, %cst_502 {dimension_numbers = #tpu.dot_dimension_numbers<[1], [0], [0], [1], [0, 0, 1, 1], [], []>} : vector<8x8xf32>, vector<8x32xf32>, vector<8x32xf32> -> vector<8x32xf32>
    %965 = arith.addf %945, %964 : vector<8x32xf32>
    %966 = vector.extract_strided_slice %886 {offsets = [0, 24], sizes = [8, 8], strides = [1, 1]} : vector<8x32xf32> to vector<8x8xf32>
    %967 = vector.extract_strided_slice %893 {offsets = [0, 24], sizes = [8, 8], strides = [1, 1]} : vector<8x32xf32> to vector<8x8xf32>
    %cst_503 = arith.constant dense<0.000000e+00> : vector<8x8xf32>
    %968 = tpu.matmul %966, %967, %cst_503 {dimension_numbers = #tpu.dot_dimension_numbers<[1], [1], [0], [0], [0, 0, 1, 0], [], []>} : vector<8x8xf32>, vector<8x8xf32>, vector<8x8xf32> -> vector<8x8xf32>
    %cst_504 = arith.constant 0.353553385 : f32
    %969 = vector.broadcast %cst_504 : f32 to vector<8x8xf32>
    %970 = arith.mulf %968, %969 : vector<8x8xf32>
    %cst_505 = arith.constant dense<0xFF800000> : vector<8xf32>
    %971 = vector.multi_reduction <maximumf>, %970, %cst_505 [1] : vector<8x8xf32> to vector<8xf32>
    %972 = vector.shape_cast %971 : vector<8xf32> to vector<8x1xf32>
    %973 = vector.broadcast %972 : vector<8x1xf32> to vector<8x8xf32>
    %974 = arith.subf %970, %973 : vector<8x8xf32>
    %975 = math.exp %974 : vector<8x8xf32>
    %cst_506 = arith.constant dense<0.000000e+00> : vector<8xf32>
    %976 = vector.multi_reduction <add>, %975, %cst_506 [1] : vector<8x8xf32> to vector<8xf32>
    %977 = vector.shape_cast %976 : vector<8xf32> to vector<8x1xf32>
    %978 = tpu.reciprocal %977 {approx = true} : vector<8x1xf32> -> vector<8x1xf32>
    %979 = vector.broadcast %978 : vector<8x1xf32> to vector<8x8xf32>
    %980 = arith.mulf %975, %979 : vector<8x8xf32>
    %981 = vector.extract_strided_slice %900 {offsets = [0, 24], sizes = [8, 8], strides = [1, 1]} : vector<8x32xf32> to vector<8x8xf32>
    %cst_507 = arith.constant dense<0.000000e+00> : vector<8x8xf32>
    %982 = tpu.matmul %980, %981, %cst_507 {dimension_numbers = #tpu.dot_dimension_numbers<[1], [0], [0], [1], [0, 0, 1, 1], [], []>} : vector<8x8xf32>, vector<8x8xf32>, vector<8x8xf32> -> vector<8x8xf32>
    %983 = vector.extract_strided_slice %902 {offsets = [24, 0], sizes = [8, 32], strides = [1, 1]} : vector<32x32xf32> to vector<8x32xf32>
    %cst_508 = arith.constant dense<0.000000e+00> : vector<8x32xf32>
    %984 = tpu.matmul %982, %983, %cst_508 {dimension_numbers = #tpu.dot_dimension_numbers<[1], [0], [0], [1], [0, 0, 1, 1], [], []>} : vector<8x8xf32>, vector<8x32xf32>, vector<8x32xf32> -> vector<8x32xf32>
    %985 = arith.addf %965, %984 : vector<8x32xf32>
    %986 = vector.broadcast %904 : vector<1x32xf32> to vector<8x32xf32>
    %987 = arith.addf %985, %986 : vector<8x32xf32>
    %988 = arith.addf %879, %987 : vector<8x32xf32>
    %c1_509 = arith.constant 1 : index
    %c10_510 = arith.constant 10 : index
    %c0_511 = arith.constant 0 : index
    %989 = vector.load %arg22[%c1_509, %c10_510, %c0_511] : memref<2x15x32xf32, #tpu.memory_space<vmem>>, vector<1x1x32xf32>
    %990 = vector.shape_cast %989 : vector<1x1x32xf32> to vector<1x32xf32>
    %c1_512 = arith.constant 1 : index
    %c11_513 = arith.constant 11 : index
    %c0_514 = arith.constant 0 : index
    %991 = vector.load %arg22[%c1_512, %c11_513, %c0_514] : memref<2x15x32xf32, #tpu.memory_space<vmem>>, vector<1x1x32xf32>
    %992 = vector.shape_cast %991 : vector<1x1x32xf32> to vector<1x32xf32>
    %cst_515 = arith.constant dense<0.000000e+00> : vector<8xf32>
    %993 = vector.multi_reduction <add>, %988, %cst_515 [1] : vector<8x32xf32> to vector<8xf32>
    %994 = vector.shape_cast %993 : vector<8xf32> to vector<8x1xf32>
    %cst_516 = arith.constant 3.200000e+01 : f32
    %995 = vector.broadcast %cst_516 : f32 to vector<8x1xf32>
    %996 = arith.divf %994, %995 : vector<8x1xf32>
    %997 = vector.broadcast %996 : vector<8x1xf32> to vector<8x32xf32>
    %998 = arith.subf %988, %997 : vector<8x32xf32>
    %999 = arith.mulf %998, %998 : vector<8x32xf32>
    %cst_517 = arith.constant dense<0.000000e+00> : vector<8xf32>
    %1000 = vector.multi_reduction <add>, %999, %cst_517 [1] : vector<8x32xf32> to vector<8xf32>
    %1001 = vector.shape_cast %1000 : vector<8xf32> to vector<8x1xf32>
    %cst_518 = arith.constant 3.200000e+01 : f32
    %1002 = vector.broadcast %cst_518 : f32 to vector<8x1xf32>
    %1003 = arith.divf %1001, %1002 : vector<8x1xf32>
    %cst_519 = arith.constant 9.99999974E-6 : f32
    %1004 = vector.broadcast %cst_519 : f32 to vector<8x1xf32>
    %1005 = arith.addf %1003, %1004 : vector<8x1xf32>
    %1006 = math.rsqrt %1005 : vector<8x1xf32>
    %1007 = vector.broadcast %1006 : vector<8x1xf32> to vector<8x32xf32>
    %1008 = arith.mulf %998, %1007 : vector<8x32xf32>
    %1009 = vector.broadcast %990 : vector<1x32xf32> to vector<8x32xf32>
    %1010 = arith.mulf %1008, %1009 : vector<8x32xf32>
    %1011 = vector.broadcast %992 : vector<1x32xf32> to vector<8x32xf32>
    %1012 = arith.addf %1010, %1011 : vector<8x32xf32>
    %c1_520 = arith.constant 1 : index
    %c0_521 = arith.constant 0 : index
    %c0_522 = arith.constant 0 : index
    %1013 = vector.load %arg20[%c1_520, %c0_521, %c0_522] : memref<2x32x64xf32, #tpu.memory_space<vmem>>, vector<1x32x64xf32>
    %1014 = vector.shape_cast %1013 : vector<1x32x64xf32> to vector<32x64xf32>
    %c1_523 = arith.constant 1 : index
    %c0_524 = arith.constant 0 : index
    %c0_525 = arith.constant 0 : index
    %1015 = vector.load %arg23[%c1_523, %c0_524, %c0_525] : memref<2x1x64xf32, #tpu.memory_space<vmem>>, vector<1x1x64xf32>
    %1016 = vector.shape_cast %1015 : vector<1x1x64xf32> to vector<1x64xf32>
    %cst_526 = arith.constant dense<0.000000e+00> : vector<8x64xf32>
    %1017 = tpu.matmul %1012, %1014, %cst_526 {dimension_numbers = #tpu.dot_dimension_numbers<[1], [0], [0], [1], [0, 0, 1, 1], [], []>} : vector<8x32xf32>, vector<32x64xf32>, vector<8x64xf32> -> vector<8x64xf32>
    %1018 = vector.broadcast %1016 : vector<1x64xf32> to vector<8x64xf32>
    %1019 = arith.addf %1017, %1018 : vector<8x64xf32>
    %cst_527 = arith.constant 0.000000e+00 : f32
    %1020 = vector.broadcast %cst_527 : f32 to vector<8x64xf32>
    %1021 = arith.maximumf %1019, %1020 : vector<8x64xf32>
    %c1_528 = arith.constant 1 : index
    %c0_529 = arith.constant 0 : index
    %c0_530 = arith.constant 0 : index
    %1022 = vector.load %arg21[%c1_528, %c0_529, %c0_530] : memref<2x64x32xf32, #tpu.memory_space<vmem>>, vector<1x64x32xf32>
    %1023 = vector.shape_cast %1022 : vector<1x64x32xf32> to vector<64x32xf32>
    %c1_531 = arith.constant 1 : index
    %c12_532 = arith.constant 12 : index
    %c0_533 = arith.constant 0 : index
    %1024 = vector.load %arg22[%c1_531, %c12_532, %c0_533] : memref<2x15x32xf32, #tpu.memory_space<vmem>>, vector<1x1x32xf32>
    %1025 = vector.shape_cast %1024 : vector<1x1x32xf32> to vector<1x32xf32>
    %cst_534 = arith.constant dense<0.000000e+00> : vector<8x32xf32>
    %1026 = tpu.matmul %1021, %1023, %cst_534 {dimension_numbers = #tpu.dot_dimension_numbers<[1], [0], [0], [1], [0, 0, 1, 1], [], []>} : vector<8x64xf32>, vector<64x32xf32>, vector<8x32xf32> -> vector<8x32xf32>
    %1027 = vector.broadcast %1025 : vector<1x32xf32> to vector<8x32xf32>
    %1028 = arith.addf %1026, %1027 : vector<8x32xf32>
    %1029 = arith.addf %1012, %1028 : vector<8x32xf32>
    %c1_535 = arith.constant 1 : index
    %c13_536 = arith.constant 13 : index
    %c0_537 = arith.constant 0 : index
    %1030 = vector.load %arg22[%c1_535, %c13_536, %c0_537] : memref<2x15x32xf32, #tpu.memory_space<vmem>>, vector<1x1x32xf32>
    %1031 = vector.shape_cast %1030 : vector<1x1x32xf32> to vector<1x32xf32>
    %c1_538 = arith.constant 1 : index
    %c14_539 = arith.constant 14 : index
    %c0_540 = arith.constant 0 : index
    %1032 = vector.load %arg22[%c1_538, %c14_539, %c0_540] : memref<2x15x32xf32, #tpu.memory_space<vmem>>, vector<1x1x32xf32>
    %1033 = vector.shape_cast %1032 : vector<1x1x32xf32> to vector<1x32xf32>
    %cst_541 = arith.constant dense<0.000000e+00> : vector<8xf32>
    %1034 = vector.multi_reduction <add>, %1029, %cst_541 [1] : vector<8x32xf32> to vector<8xf32>
    %1035 = vector.shape_cast %1034 : vector<8xf32> to vector<8x1xf32>
    %cst_542 = arith.constant 3.200000e+01 : f32
    %1036 = vector.broadcast %cst_542 : f32 to vector<8x1xf32>
    %1037 = arith.divf %1035, %1036 : vector<8x1xf32>
    %1038 = vector.broadcast %1037 : vector<8x1xf32> to vector<8x32xf32>
    %1039 = arith.subf %1029, %1038 : vector<8x32xf32>
    %1040 = arith.mulf %1039, %1039 : vector<8x32xf32>
    %cst_543 = arith.constant dense<0.000000e+00> : vector<8xf32>
    %1041 = vector.multi_reduction <add>, %1040, %cst_543 [1] : vector<8x32xf32> to vector<8xf32>
    %1042 = vector.shape_cast %1041 : vector<8xf32> to vector<8x1xf32>
    %cst_544 = arith.constant 3.200000e+01 : f32
    %1043 = vector.broadcast %cst_544 : f32 to vector<8x1xf32>
    %1044 = arith.divf %1042, %1043 : vector<8x1xf32>
    %cst_545 = arith.constant 9.99999974E-6 : f32
    %1045 = vector.broadcast %cst_545 : f32 to vector<8x1xf32>
    %1046 = arith.addf %1044, %1045 : vector<8x1xf32>
    %1047 = math.rsqrt %1046 : vector<8x1xf32>
    %1048 = vector.broadcast %1047 : vector<8x1xf32> to vector<8x32xf32>
    %1049 = arith.mulf %1039, %1048 : vector<8x32xf32>
    %1050 = vector.broadcast %1031 : vector<1x32xf32> to vector<8x32xf32>
    %1051 = arith.mulf %1049, %1050 : vector<8x32xf32>
    %1052 = vector.broadcast %1033 : vector<1x32xf32> to vector<8x32xf32>
    %1053 = arith.addf %1051, %1052 : vector<8x32xf32>
    %c5_546 = arith.constant 5 : index
    %c0_547 = arith.constant 0 : index
    %1054 = vector.load %arg5[%c5_546, %c0_547] : memref<7x32xf32, #tpu.memory_space<vmem>>, vector<1x32xf32>
    %c6_548 = arith.constant 6 : index
    %c0_549 = arith.constant 0 : index
    %1055 = vector.load %arg5[%c6_548, %c0_549] : memref<7x32xf32, #tpu.memory_space<vmem>>, vector<1x32xf32>
    %cst_550 = arith.constant dense<0.000000e+00> : vector<8xf32>
    %1056 = vector.multi_reduction <add>, %1053, %cst_550 [1] : vector<8x32xf32> to vector<8xf32>
    %1057 = vector.shape_cast %1056 : vector<8xf32> to vector<8x1xf32>
    %cst_551 = arith.constant 3.200000e+01 : f32
    %1058 = vector.broadcast %cst_551 : f32 to vector<8x1xf32>
    %1059 = arith.divf %1057, %1058 : vector<8x1xf32>
    %1060 = vector.broadcast %1059 : vector<8x1xf32> to vector<8x32xf32>
    %1061 = arith.subf %1053, %1060 : vector<8x32xf32>
    %1062 = arith.mulf %1061, %1061 : vector<8x32xf32>
    %cst_552 = arith.constant dense<0.000000e+00> : vector<8xf32>
    %1063 = vector.multi_reduction <add>, %1062, %cst_552 [1] : vector<8x32xf32> to vector<8xf32>
    %1064 = vector.shape_cast %1063 : vector<8xf32> to vector<8x1xf32>
    %cst_553 = arith.constant 3.200000e+01 : f32
    %1065 = vector.broadcast %cst_553 : f32 to vector<8x1xf32>
    %1066 = arith.divf %1064, %1065 : vector<8x1xf32>
    %cst_554 = arith.constant 9.99999974E-6 : f32
    %1067 = vector.broadcast %cst_554 : f32 to vector<8x1xf32>
    %1068 = arith.addf %1066, %1067 : vector<8x1xf32>
    %1069 = math.rsqrt %1068 : vector<8x1xf32>
    %1070 = vector.broadcast %1069 : vector<8x1xf32> to vector<8x32xf32>
    %1071 = arith.mulf %1061, %1070 : vector<8x32xf32>
    %1072 = vector.broadcast %1054 : vector<1x32xf32> to vector<8x32xf32>
    %1073 = arith.mulf %1071, %1072 : vector<8x32xf32>
    %1074 = vector.broadcast %1055 : vector<1x32xf32> to vector<8x32xf32>
    %1075 = arith.addf %1073, %1074 : vector<8x32xf32>
    %c0_555 = arith.constant 0 : index
    %c0_556 = arith.constant 0 : index
    %1076 = vector.load %arg12[%c0_555, %c0_556] : memref<32x4xf32, #tpu.memory_space<vmem>>, vector<32x4xf32>
    %c0_557 = arith.constant 0 : index
    %c0_558 = arith.constant 0 : index
    %1077 = vector.load %arg7[%c0_557, %c0_558] : memref<1x4xf32, #tpu.memory_space<vmem>>, vector<1x4xf32>
    %cst_559 = arith.constant dense<0.000000e+00> : vector<8x4xf32>
    %1078 = tpu.matmul %1075, %1076, %cst_559 {dimension_numbers = #tpu.dot_dimension_numbers<[1], [0], [0], [1], [0, 0, 1, 1], [], []>} : vector<8x32xf32>, vector<32x4xf32>, vector<8x4xf32> -> vector<8x4xf32>
    %1079 = vector.broadcast %1077 : vector<1x4xf32> to vector<8x4xf32>
    %1080 = arith.addf %1078, %1079 : vector<8x4xf32>
    %c0_560 = arith.constant 0 : index
    %c0_561 = arith.constant 0 : index
    %c0_562 = arith.constant 0 : index
    %1081 = vector.load %arg24[%c0_560, %c0_561, %c0_562] : memref<1x8x4xf32, #tpu.memory_space<vmem>>, vector<1x8x4xf32>
    %1082 = vector.shape_cast %1081 : vector<1x8x4xf32> to vector<8x4xf32>
    %1083 = vector.shape_cast %1080 : vector<8x4xf32> to vector<1x8x4xf32>
    tpu.vector_store %arg24[%c0_560, %c0_561, %c0_562], %1083 {strides = array<i32>} : memref<1x8x4xf32, #tpu.memory_space<vmem>>, vector<1x8x4xf32>,
    return
  }
  func.func @transform_0(%arg0: i32) -> (i32, i32, i32) {
    %c0_i32 = arith.constant 0 : i32
    %c0_i32_0 = arith.constant 0 : i32
    %c0_i32_1 = arith.constant 0 : i32
    return %arg0, %c0_i32, %c0_i32_0 : i32, i32, i32
  }
  func.func @transform_1(%arg0: i32) -> (i32, i32, i32) {
    %c0_i32 = arith.constant 0 : i32
    %c0_i32_0 = arith.constant 0 : i32
    %c0_i32_1 = arith.constant 0 : i32
    return %arg0, %c0_i32, %c0_i32_0 : i32, i32, i32
  }
  func.func @transform_2(%arg0: i32) -> (i32, i32, i32) {
    %c0_i32 = arith.constant 0 : i32
    %c0_i32_0 = arith.constant 0 : i32
    %c0_i32_1 = arith.constant 0 : i32
    return %arg0, %c0_i32, %c0_i32_0 : i32, i32, i32
  }
  func.func @transform_3(%arg0: i32) -> (i32, i32) {
    %c0_i32 = arith.constant 0 : i32
    %c0_i32_0 = arith.constant 0 : i32
    %c0_i32_1 = arith.constant 0 : i32
    return %c0_i32, %c0_i32_0 : i32, i32
  }
  func.func @transform_4(%arg0: i32) -> (i32, i32) {
    %c0_i32 = arith.constant 0 : i32
    %c0_i32_0 = arith.constant 0 : i32
    %c0_i32_1 = arith.constant 0 : i32
    return %c0_i32, %c0_i32_0 : i32, i32
  }
  func.func @transform_5(%arg0: i32) -> (i32, i32) {
    %c0_i32 = arith.constant 0 : i32
    %c0_i32_0 = arith.constant 0 : i32
    %c0_i32_1 = arith.constant 0 : i32
    return %c0_i32, %c0_i32_0 : i32, i32
  }
  func.func @transform_6(%arg0: i32) -> (i32, i32) {
    %c0_i32 = arith.constant 0 : i32
    %c0_i32_0 = arith.constant 0 : i32
    %c0_i32_1 = arith.constant 0 : i32
    return %c0_i32, %c0_i32_0 : i32, i32
  }
  func.func @transform_7(%arg0: i32) -> (i32, i32) {
    %c0_i32 = arith.constant 0 : i32
    %c0_i32_0 = arith.constant 0 : i32
    %c0_i32_1 = arith.constant 0 : i32
    return %c0_i32, %c0_i32_0 : i32, i32
  }
  func.func @transform_8(%arg0: i32) -> (i32, i32) {
    %c0_i32 = arith.constant 0 : i32
    %c0_i32_0 = arith.constant 0 : i32
    %c0_i32_1 = arith.constant 0 : i32
    return %c0_i32, %c0_i32_0 : i32, i32
  }
  func.func @transform_9(%arg0: i32) -> (i32, i32) {
    %c0_i32 = arith.constant 0 : i32
    %c0_i32_0 = arith.constant 0 : i32
    %c0_i32_1 = arith.constant 0 : i32
    return %c0_i32, %c0_i32_0 : i32, i32
  }
  func.func @transform_10(%arg0: i32) -> (i32, i32) {
    %c0_i32 = arith.constant 0 : i32
    %c0_i32_0 = arith.constant 0 : i32
    %c0_i32_1 = arith.constant 0 : i32
    return %c0_i32, %c0_i32_0 : i32, i32
  }
  func.func @transform_11(%arg0: i32) -> (i32, i32) {
    %c0_i32 = arith.constant 0 : i32
    %c0_i32_0 = arith.constant 0 : i32
    %c0_i32_1 = arith.constant 0 : i32
    return %c0_i32, %c0_i32_0 : i32, i32
  }
  func.func @transform_12(%arg0: i32) -> (i32, i32, i32, i32) {
    %c0_i32 = arith.constant 0 : i32
    %c0_i32_0 = arith.constant 0 : i32
    %c0_i32_1 = arith.constant 0 : i32
    %c0_i32_2 = arith.constant 0 : i32
    %c0_i32_3 = arith.constant 0 : i32
    return %c0_i32, %c0_i32_0, %c0_i32_1, %c0_i32_2 : i32, i32, i32, i32
  }
  func.func @transform_13(%arg0: i32) -> (i32, i32, i32) {
    %c0_i32 = arith.constant 0 : i32
    %c0_i32_0 = arith.constant 0 : i32
    %c0_i32_1 = arith.constant 0 : i32
    %c0_i32_2 = arith.constant 0 : i32
    return %c0_i32, %c0_i32_0, %c0_i32_1 : i32, i32, i32
  }
  func.func @transform_14(%arg0: i32) -> (i32, i32, i32) {
    %c0_i32 = arith.constant 0 : i32
    %c0_i32_0 = arith.constant 0 : i32
    %c0_i32_1 = arith.constant 0 : i32
    %c0_i32_2 = arith.constant 0 : i32
    return %c0_i32, %c0_i32_0, %c0_i32_1 : i32, i32, i32
  }
  func.func @transform_15(%arg0: i32) -> (i32, i32, i32) {
    %c0_i32 = arith.constant 0 : i32
    %c0_i32_0 = arith.constant 0 : i32
    %c0_i32_1 = arith.constant 0 : i32
    %c0_i32_2 = arith.constant 0 : i32
    return %c0_i32, %c0_i32_0, %c0_i32_1 : i32, i32, i32
  }
  func.func @transform_16(%arg0: i32) -> (i32, i32, i32) {
    %c0_i32 = arith.constant 0 : i32
    %c0_i32_0 = arith.constant 0 : i32
    %c0_i32_1 = arith.constant 0 : i32
    %c0_i32_2 = arith.constant 0 : i32
    return %c0_i32, %c0_i32_0, %c0_i32_1 : i32, i32, i32
  }
  func.func @transform_17(%arg0: i32) -> (i32, i32, i32, i32) {
    %c0_i32 = arith.constant 0 : i32
    %c0_i32_0 = arith.constant 0 : i32
    %c0_i32_1 = arith.constant 0 : i32
    %c0_i32_2 = arith.constant 0 : i32
    %c0_i32_3 = arith.constant 0 : i32
    return %c0_i32, %c0_i32_0, %c0_i32_1, %c0_i32_2 : i32, i32, i32, i32
  }
  func.func @transform_18(%arg0: i32) -> (i32, i32, i32, i32) {
    %c0_i32 = arith.constant 0 : i32
    %c0_i32_0 = arith.constant 0 : i32
    %c0_i32_1 = arith.constant 0 : i32
    %c0_i32_2 = arith.constant 0 : i32
    %c0_i32_3 = arith.constant 0 : i32
    return %c0_i32, %c0_i32_0, %c0_i32_1, %c0_i32_2 : i32, i32, i32, i32
  }
  func.func @transform_19(%arg0: i32) -> (i32, i32, i32) {
    %c0_i32 = arith.constant 0 : i32
    %c0_i32_0 = arith.constant 0 : i32
    %c0_i32_1 = arith.constant 0 : i32
    %c0_i32_2 = arith.constant 0 : i32
    return %c0_i32, %c0_i32_0, %c0_i32_1 : i32, i32, i32
  }
  func.func @transform_20(%arg0: i32) -> (i32, i32, i32) {
    %c0_i32 = arith.constant 0 : i32
    %c0_i32_0 = arith.constant 0 : i32
    %c0_i32_1 = arith.constant 0 : i32
    %c0_i32_2 = arith.constant 0 : i32
    return %c0_i32, %c0_i32_0, %c0_i32_1 : i32, i32, i32
  }
  func.func @transform_21(%arg0: i32) -> (i32, i32, i32) {
    %c0_i32 = arith.constant 0 : i32
    %c0_i32_0 = arith.constant 0 : i32
    %c0_i32_1 = arith.constant 0 : i32
    %c0_i32_2 = arith.constant 0 : i32
    return %c0_i32, %c0_i32_0, %c0_i32_1 : i32, i32, i32
  }
  func.func @transform_22(%arg0: i32) -> (i32, i32, i32) {
    %c0_i32 = arith.constant 0 : i32
    %c0_i32_0 = arith.constant 0 : i32
    %c0_i32_1 = arith.constant 0 : i32
    %c0_i32_2 = arith.constant 0 : i32
    return %c0_i32, %c0_i32_0, %c0_i32_1 : i32, i32, i32
  }
  func.func @transform_23(%arg0: i32) -> (i32, i32, i32) {
    %c0_i32 = arith.constant 0 : i32
    %c0_i32_0 = arith.constant 0 : i32
    %c0_i32_1 = arith.constant 0 : i32
    return %arg0, %c0_i32, %c0_i32_0 : i32, i32, i32
  }
}

</mosaic_0001>

<bundles_post_ra>
// kernel: variational_transformer_forward.1
= control target key start
LH: loop header
LB: loop body
LE: loop exit
PB: predicated region body
PF: predicated region fallthrough
CT: control target
= control target key end

     0   :  { %s5950_s0 = inlined_call_operand.vmem [shape: f32[2,8,4], index: 0, kind: input, shape index: {}]   ;;  %s5951_s1 = inlined_call_operand.vmem [shape: f32[2,8,4], index: 1, kind: input, shape index: {}]   ;;  %s5952_s2 = inlined_call_operand.vmem [shape: f32[2,8,16], index: 2, kind: input, shape index: {}]   ;;  %s5953_s3 = inlined_call_operand.vmem [shape: f32[4,32], index: 3, kind: input, shape index: {}]   ;;  %s5954_s4 = inlined_call_operand.vmem [shape: f32[7,32], index: 4, kind: input, shape index: {}]   ;;  %s5955_s5 = inlined_call_operand.vmem [shape: f32[2,16], index: 5, kind: input, shape index: {}]   ;;  %s5956_s6 = inlined_call_operand.vmem [shape: f32[1,4], index: 6, kind: input, shape index: {}]   ;;  %s5957_s7 = inlined_call_operand.vmem [shape: f32[32,16], index: 7, kind: input, shape index: {}]   ;;  %s5958_s8 = inlined_call_operand.vmem [shape: f32[32,16], index: 8, kind: input, shape index: {}]   ;;  %s5959_s9 = inlined_call_operand.vmem [shape: f32[16,32], index: 9, kind: input, shape index: {}]   ;;  %s5960_s10 = inlined_call_operand.vmem [shape: f32[4,32], index: 10, kind: input, shape index: {}]   ;;  %s5961_s11 = inlined_call_operand.vmem [shape: f32[32,4], index: 11, kind: input, shape index: {}]   ;;  %s5962_s12 = inlined_call_operand.vmem [shape: f32[2,4,32,32], index: 12, kind: input, shape index: {}]   ;;  %s5963_s13 = inlined_call_operand.vmem [shape: f32[2,32,64], index: 13, kind: input, shape index: {}]   ;;  %s5964_s14 = inlined_call_operand.vmem [shape: f32[2,64,32], index: 14, kind: input, shape index: {}]   ;;  %s5965_s15 = inlined_call_operand.vmem [shape: f32[2,9,32], index: 15, kind: input, shape index: {}]   ;;  %s5966_s16 = inlined_call_operand.vmem [shape: f32[2,1,64], index: 16, kind: input, shape index: {}]   ;;  %s5967_s17 = inlined_call_operand.hbm [shape: f32[2,4,32,32], index: 17, kind: input, shape index: {}]   ;;  %s5968_s18 = inlined_call_operand.hbm [shape: f32[2,4,32,32], index: 18, kind: input, shape index: {}]   ;;  %s5969_s19 = inlined_call_operand.vmem [shape: f32[2,32,64], index: 19, kind: input, shape index: {}]   ;;  %s5970_s20 = inlined_call_operand.vmem [shape: f32[2,64,32], index: 20, kind: input, shape index: {}]   ;;  %s5971_s21 = inlined_call_operand.vmem [shape: f32[2,15,32], index: 21, kind: input, shape index: {}]   ;;  %s5972_s22 = inlined_call_operand.vmem [shape: f32[2,1,64], index: 22, kind: input, shape index: {}]   ;;  %s5973_s23 = inlined_call_operand.vmem [shape: f32[2,8,4], index: 23, kind: output, shape index: {}]  }
   0x1   :  { %5984 = sst [smem:[#allocation8_spill]] %s5950_s0 }
   0x2   :  { %5985 = sst [smem:[#allocation9_spill]] %s5951_s1 }
   0x3   :  { %5986 = sst [smem:[#allocation10_spill]] %s5952_s2 }
   0x4   :  { %5987 = sst [smem:[#allocation11_spill]] %s5953_s3 }
   0x5   :  { %5988 = sst [smem:[#allocation12_spill]] %s5954_s4 }
   0x6   :  { %5989 = sst [smem:[#allocation13_spill]] %s5955_s5 }
   0x7   :  { %5990 = sst [smem:[#allocation14_spill]] %s5956_s6 }
   0x8   :  { %5991 = sst [smem:[#allocation15_spill]] %s5957_s7 }
   0x9   :  { %5992 = sst [smem:[#allocation16_spill]] %s5958_s8 }
   0xa   :  { %5993 = sst [smem:[#allocation17_spill]] %s5959_s9 }
   0xb   :  { %28 = vsyncpa [#allocation3], 0 }
   0xc   :  { %29 = vsyncpa [#allocation5], 0  ;;  %s5028_s4 = smov 0  }
   0xd LB: > { %s617_s25 = sshll.u32 %s5967_s17, 4  ;;  %s4378_s5 = sadd.s32 4294967295, %s4898_s4   ;;  %s4898_s4 = sphi %s5028_s4, %s35_s4   ;;  %s618_s25 = int_to_ptr.hbm [resolvable:$true] %s617_s25 }
   0xe   : > { %p4380_p0 = scmp.ge.s32.totalorder %s4898_s4, 1  ;;  %p564_p1 = scmp.lt.s32.totalorder %s4898_s4, 3 }
   0xf   : > { %p4616_p2 = scmp.eq.s32.totalorder %s4378_s5, 0  ;;  %s4900_s26 = smov [#allocation2]  }
  0x10   : > { %p5039_p3 = pnand %p4380_p0, %p564_p1  ;;  %s619_s2 = sshll.u32 %s4900_s26, 4  ;;  %s620_s2 = int_to_ptr.vmem [resolvable:$true] %s619_s2 }
  0x11   : > { %s631_s7 = sshll.u32 %s5968_s18, 4  ;;  %s4901_s28 = smov [#allocation4]   ;;  %s632_s7 = int_to_ptr.hbm [resolvable:$true] %s631_s7 }
  0x12   : > { %p4609_p4 = pneg %p5039_p3  ;;  %s633_s29 = sshll.u32 %s4901_s28, 4  ;;  %s634_s29 = int_to_ptr.vmem [resolvable:$true] %s633_s29 }
  0x13   : > { %s4902_s3 = smov 128   ;;  %s4903_s0 = smov 8  }
  0x14   : > { %p4610_p5 = pnand %p4616_p2, %p4609_p4  ;;  %682 = sbr.rel (%p5039_p3) target bundleno = 12603 (0x313b), region = 112 }
  0x16   : > { %4612 = dma.hbm_to_vmem [thread:$0]  (!%p4610_p5), %s618_s25, 4096, %s620_s2, [#allocation3], %s4902_s3, %s4902_s3, %s4903_s0  }
  0x17   : > { %4615 = dma.hbm_to_vmem [thread:$0]  (!%p4610_p5), %s632_s7, 4096, %s634_s29, [#allocation5], %s4902_s3, %s4902_s3, %s4903_s0  }
  0x19   : > { %4889 = dma.done.wait (%p4616_p2), [#allocation3], 4096  }
  0x1a   : > { %4891 = vsyncadd (%p4616_p2), [#allocation3], 4294963200 }
  0x1b   : > { %4893 = dma.done.wait (%p4616_p2), [#allocation5], 4096  }
  0x1c   : > { %4895 = vsyncadd (%p4616_p2), [#allocation5], 4294963200  ;;  %p758_p6 = scmp.lt.s32.totalorder %s4378_s5, 1  ;;  %vm782_vm0 = vcmask 1043456   ;;  %s5995_s26 = sld [smem:[#allocation8_spill]]  ;;  %vm778_vm1 = vcmask 31744  }
  0x1d   : > { %s5996_s27 = sld [smem:[#allocation11_spill]]  ;;  %v809_v2 = vld [vmem:[%s5962_s12 + $0x18] sm:$0xff]  ;;  %v808_v4 = vld [vmem:[%s5962_s12 + $0x10] sm:$0xff]  ;;  %v807_v6 = vld [vmem:[%s5962_s12 + $0x8] sm:$0xff]  ;;  %vm812_vm2 = vcmask 261120   ;;  %vm896_vm3 = vcmask 64512  }
  0x1e   : > { %s6011_s5 = smov (!%p758_p6, %s4378_s5), 1  ;;  %828 = vmatpush.msra.mxu3 %v809_v2  ;;  %v4397_v3 = vld [vmem:[%s5962_s12 + $0x38] sm:$0xff]  ;;  %v4396_v5 = vld [vmem:[%s5962_s12 + $0x30] sm:$0xff]  ;;  %v4395_v7 = vld [vmem:[%s5962_s12 + $0x28] sm:$0xff]  ;;  %s5997_s7 = sld [smem:[#allocation12_spill]]  ;;  %vm1331_vm8 = vcmask 523264  }
  0x1f   : > { %s5055_s30 = sshll.u32 %s6011_s5, 3  ;;  %855 = vmatpush.msra.mxu2 %v4397_v3  ;;  %v806_v8 = vld [vmem:[%s5962_s12] sm:$0xff]  ;;  %v4402_v10 = vld [vmem:[%s5962_s12 + $0x58] sm:$0xff]  ;;  %v4401_v11 = vld [vmem:[%s5962_s12 + $0x50] sm:$0xff]  ;;  %s5979_s0 = smov 112  }
  0x20   : > { %829 = vmatpush.msra.mxu3 %v808_v4  ;;  %v4394_v9 = vld [vmem:[%s5962_s12 + $0x20] sm:$0xff]  ;;  %v4400_v12 = vld [vmem:[%s5962_s12 + $0x48] sm:$0xff]  ;;  %s5981_s24 = smov 120   ;;  %s5999_s3 = sld [smem:[#allocation15_spill]] }
  0x21   : > { %856 = vmatpush.msra.mxu2 %v4396_v5  ;;  %v4399_v13 = vld [vmem:[%s5962_s12 + $0x40] sm:$0xff]  ;;  %s6000_s8 = sld [smem:[#allocation16_spill]]  ;;  %s773_s25 = scalar_lea.vmem %s5973_s23, %s5055_s30 }
  0x22   : > { %s761_s2 = scalar_lea.vmem %s5995_s26, %s5055_s30  ;;  %830 = vmatpush.msra.mxu3 %v807_v6  ;;  %v4638_v17 = vld [vmem:[%s5965_s15 + $0x1] ss:$0 sm:$0xff]  ;;  %v4637_v20 = vld [vmem:[%s5965_s15] ss:$0 sm:$0xff]  ;;  %v4639_v23 = vld [vmem:[%s5965_s15 + $0x2] ss:$0 sm:$0xff] }
  0x23   : > { %v775_v0 = vld [vmem:[%s5996_s27] sm:$0xf]  ;;  %857 = vmatpush.msra.mxu2 %v4395_v7  ;;  %s6001_s1 = sld [smem:[#allocation9_spill]] }
  0x24   : > { %v774_v1 = vld [vmem:[%s761_s2] sm:$0xff]  ;;  %4391 = vmatpush.msk.msra.mxu0 %vm782_vm0, %v775_v0  ;;  %831 = vmatpush.msra.mxu3 %v806_v8  ;;  %s5977_s2 = smov 104   ;;  %s6003_s9 = sld [smem:[#allocation17_spill]] }
  0x25   : > { %4392 = vmatmul.msk.f32.vlgmr.msra.gmra.mxu0 %vm778_vm1, %v774_v1  ;;  %858 = vmatpush.msra.mxu2 %v4394_v9  ;;  %v4636_v14 = vld [vmem:[%s5997_s7] ss:$0 sm:$0xff] }
  0x26   : > { %882 = vmatpush.msrb.mxu3 %v4402_v10  ;;  %v4404_v40 = vld [vmem:[%s5962_s12 + $0x60] sm:$0xff] }
  0x28   : > { %883 = vmatpush.msrb.mxu3 %v4401_v11 }
  0x29   : > { %s765_s6 = scalar_lea.vmem %s6001_s1, %s5055_s30 }
  0x2a   : > { %884 = vmatpush.msrb.mxu3 %v4400_v12 }
  0x2c   : > { %885 = vmatpush.msrb.mxu3 %v4399_v13 }
  0xa2   : > { %v803_v15 = vpop.f32.mrf.mxu0 }
  0xa3   : > { %v5105_v16 = vadd.f32 %v4636_v14, %v803_v15 }
  0xa5   : > { %4393 = vmatmul.msk.f32.vlgmr.msra.gmra.mxu3 %vm812_vm2, %v5105_v16  ;;  %4398 = vmatmul.msk.f32.vlgmr.msra.gmra.mxu2 %vm812_vm2, %v5105_v16 }
  0xad   : > { %4403 = vmatmul.msk.f32.vlgmr.msrb.gmra.mxu3 %vm812_vm2, %v5105_v16 }
 0x128   : > { %v833_v18 = vpop.f32.mrf.mxu3  ;;  %v860_v19 = vpop.f32.mrf.mxu2 }
 0x129   : > { %v861_v21 = vadd.f32 %v4638_v17, %v860_v19  ;;  %v834_v22 = vadd.f32 %v4637_v20, %v833_v18  ;;  %v4405_v19 = vld [vmem:[%s5962_s12 + $0x68] sm:$0xff]  ;;  %v4407_v20 = vld [vmem:[%s5962_s12 + $0x78] sm:$0xff] }
 0x12b   : > { %1073 = vrot.lane.b32.xlu2 %v861_v21, %s5979_s0  ;;  %960 = vrot.lane.b32.xlu1 %v861_v21, %s5981_s24 }
 0x12c   : > { %4408 = vmatpush.xpose.msk.msrb.mxu0 %vm896_vm3, %v861_v21 }
 0x12f   : > { %4409 = vmatmul.msk.f32.vlgmr.msrb.gmra.mxu0 %vm896_vm3, %v834_v22 }
 0x130   : > { %v887_v24 = vpop.f32.mrf.mxu3  ;;  %1043 = vmatpush.msra.mxu0 %v4405_v19 }
 0x131   : > { %v5126_v25 = vadd.f32 %v4639_v23, %v887_v24 }
 0x133   : > { %1163 = vrot.lane.b32.xlu2 %v861_v21, %s5977_s2  ;;  %953 = vmatpush.msra.mxu1 %v5126_v25  ;;  %v4406_v21 = vld [vmem:[%s5962_s12 + $0x70] sm:$0xff] }
 0x134   : > { %958 = vrot.lane.b32.xlu1 %v834_v22, %s5981_s24  ;;  %1155 = vmatpush.msrb.mxu0 %v4406_v21 }
 0x135   : > { %1066 = vmatpush.msrb.mxu1 %v4404_v40 }
 0x13c   : > { %1161 = vrot.lane.b32.xlu1 %v834_v22, %s5977_s2 }
 0x185   : > { %v1074_v27 = vpop.permute.xlu2 %1073 }
 0x18d   : > { %v1164_v41 = vpop.permute.xlu2 %1163 }
 0x19d   : > { %v961_v26 = vpop.permute.xlu1 %960 }
 0x19e   : > { %4411 = vmatpush.xpose.msk.msrb.mxu2 %vm896_vm3, %v961_v26 }
 0x1a2   : > { %4416 = vmatpush.xpose.msk.msra.mxu2 %vm896_vm3, %v1074_v27 }
 0x1a6   : > { %v959_v28 = vpop.permute.xlu1 %958 }
 0x1a7   : > { %4412 = vmatmul.msk.f32.vlgmr.msrb.gmra.mxu2 %vm896_vm3, %v959_v28 }
 0x1ac   : > { %v920_v29 = vpop.f32.mrf.mxu0 }
 0x1ad   : > { %v923_v30 = vmul.f32 0.35355338, %v920_v29  ;;  %v4640_v29 = vld [vmem:[%s5965_s15 + $0x3] ss:$0 sm:$0xff] }
 0x1ae   : > { %v1162_v52 = vpop.permute.xlu1 %1161 }
 0x1af   : > { %v924_v31 = vsel %vm896_vm3, %v923_v30, -inf }
 0x1b0   : > { %925 = vmax.xlane.f32.xlu0 %v924_v31 }
 0x223   : > { %v926_v32 = vpop.xlane.xlu0 %925 }
 0x224   : > { %v927_v33 = vsub.f32 %v923_v30, %v926_v32 }
 0x226   : > { %v928_v34 = vmul.f32 1.442695, %v927_v33 }
 0x228   : > { %4698 = vpow2.f32 %v928_v34 }
 0x22a   : > { %v983_v35 = vpop.f32.mrf.mxu2 }
 0x22b   : > { %v986_v36 = vmul.f32 0.35355338, %v983_v35  ;;  %v4907_v35 = vmov 32.0  }
 0x22d   : > { %v987_v37 = vsel %vm896_vm3, %v986_v36, -inf }
 0x22e   : > { %v4699_v38 = vpop.eup %4698  ;;  %988 = vmax.xlane.f32.xlu2 %v987_v37 }
 0x22f   : > { %v930_v39 = vsel %vm896_vm3, %v4699_v38, 0.0 }
 0x230   : > { %931 = vadd.xlane.f32.xlu0 %v930_v39 }
 0x244   : > { %1071 = vrot.lane.b32.xlu0 %v834_v22, %s5979_s0 }
 0x2a1   : > { %v989_v42 = vpop.xlane.xlu2 %988 }
 0x2a2   : > { %v990_v43 = vsub.f32 %v986_v36, %v989_v42 }
 0x2a3   : > { %v932_v44 = vpop.xlane.xlu0 %931 }
 0x2a4   : > { %v991_v45 = vmul.f32 1.442695, %v990_v43  ;;  %4700 = vrcp.f32 %v932_v44 }
 0x2a6   : > { %4702 = vpow2.f32 %v991_v45 }
 0x2aa   : > { %v4701_v46 = vpop.eup %4700 }
 0x2ab   : > { %v934_v47 = vmul.f32 %v4701_v46, %v4699_v38  ;;  %v1292_v46 = vld [vmem:[%s5963_s13 + $0x18] sm:$0xff] }
 0x2ac   : > { %v4703_v48 = vpop.eup %4702 }
 0x2ad   : > { %4410 = vmatmul.msk.f32.vlgmr.msra.gmra.mxu1 %vm896_vm3, %v934_v47  ;;  %v993_v49 = vsel %vm896_vm3, %v4703_v48, 0.0  ;;  %v1291_v47 = vld [vmem:[%s5963_s13 + $0x10] sm:$0xff] }
 0x2ae   : > { %4420 = vmatpush.xpose.msk.msra.mxu1 %vm896_vm3, %v1164_v41  ;;  %994 = vadd.xlane.f32.xlu2 %v993_v49  ;;  %v1289_v49 = vld [vmem:[%s5963_s13] sm:$0xff] }
 0x2b6   : > { %v1072_v50 = vpop.permute.xlu0 %1071 }
 0x2b7   : > { %4417 = vmatmul.msk.f32.vlgmr.msra.gmra.mxu2 %vm896_vm3, %v1072_v50  ;;  %v1328_v50 = vld [vmem:[%s5964_s14 + $0x38] sm:$0xff] }
 0x321   : > { %v995_v8 = vpop.xlane.xlu2 %994 }
 0x32a   : > { %v955_v51 = vpop.f32.mrf.mxu1 }
 0x32b   : > { %4415 = vmatmul.msk.f32.vlgmr.msrb.gmra.mxu1 %vm896_vm3, %v955_v51  ;;  %v1327_v51 = vld [vmem:[%s5964_s14 + $0x30] sm:$0xff] }
 0x32c   : > { %1343 = vmatpush.msrb.mxu1 %v1328_v50 }
 0x32e   : > { %1344 = vmatpush.msrb.mxu1 %v1327_v51  ;;  %v4647_v51 = vld [vmem:[%s5965_s15 + $0x12] ss:$0 sm:$0xff] }
 0x333   : > { %4421 = vmatmul.msk.f32.vlgmr.msra.gmra.mxu1 %vm896_vm3, %v1162_v52  ;;  %v1326_v52 = vld [vmem:[%s5964_s14 + $0x28] sm:$0xff] }
 0x334   : > { %1345 = vmatpush.msrb.mxu1 %v1326_v52 }
 0x33a   : > { %v1096_v53 = vpop.f32.mrf.mxu2 }
 0x33b   : > { %v1099_v54 = vmul.f32 0.35355338, %v1096_v53 }
 0x33d   : > { %v1100_v55 = vsel %vm896_vm3, %v1099_v54, -inf }
 0x33e   : > { %1101 = vmax.xlane.f32.xlu0 %v1100_v55  ;;  %v1325_v55 = vld [vmem:[%s5964_s14 + $0x20] sm:$0xff] }
 0x33f   : > { %1346 = vmatpush.msrb.mxu1 %v1325_v55  ;;  %v4648_v55 = vld [vmem:[%s5965_s15 + $0x10] ss:$0 sm:$0xff] }
 0x352   : > { %1111 = vrot.lane.b32.xlu0 %v5126_v25, %s5979_s0 }
 0x3a8   : > { %v1068_v56 = vpop.f32.mrf.mxu1 }
 0x3b0   : > { %v1186_v57 = vpop.f32.mrf.mxu1 }
 0x3b1   : > { %v1189_v58 = vmul.f32 0.35355338, %v1186_v57  ;;  %v1102_v59 = vpop.xlane.xlu0 %1101  ;;  %v1324_v57 = vld [vmem:[%s5964_s14 + $0x18] sm:$0xff] }
 0x3b2   : > { %v1103_v60 = vsub.f32 %v1099_v54, %v1102_v59  ;;  %1347 = vmatpush.msrb.mxu1 %v1324_v57 }
 0x3b3   : > { %v1190_v61 = vsel %vm896_vm3, %v1189_v58, -inf }
 0x3b4   : > { %v1104_v62 = vmul.f32 1.442695, %v1103_v60  ;;  %1191 = vmax.xlane.f32.xlu1 %v1190_v61 }
 0x3b6   : > { %4704 = vpow2.f32 %v1104_v62 }
 0x3bc   : > { %v4705_v63 = vpop.eup %4704 }
 0x3bd   : > { %v1106_v0 = vsel %vm896_vm3, %v4705_v63, 0.0 }
 0x3be   : > { %1107 = vadd.xlane.f32.xlu1 %v1106_v0  ;;  %v4641_v0 = vld [vmem:[%s5965_s15 + $0x4] ss:$0 sm:$0xff] }
 0x3c4   : > { %v1112_v15 = vpop.permute.xlu0 %1111 }
 0x3d7   : > { %1201 = vrot.lane.b32.xlu1 %v5126_v25, %s5977_s2  ;;  %s5998_s2 = smov 104  }
 0x427   : > { %v1192_v1 = vpop.xlane.xlu1 %1191 }
 0x428   : > { %v1193_v2 = vsub.f32 %v1189_v58, %v1192_v1 }
 0x42a   : > { %v1194_v3 = vmul.f32 1.442695, %v1193_v2 }
 0x42c   : > { %4706 = vpow2.f32 %v1194_v3  ;;  %v4642_v3 = vld [vmem:[%s5965_s15 + $0x5] ss:$0 sm:$0xff] }
 0x42d   : > { %4708 = vrcp.f32 %v995_v8  ;;  %v1321_v8 = vld [vmem:[%s5964_s14] sm:$0xff] }
 0x431   : > { %v1108_v6 = vpop.xlane.xlu1 %1107 }
 0x432   : > { %v4707_v4 = vpop.eup %4706 }
 0x433   : > { %v1196_v5 = vsel %vm896_vm3, %v4707_v4, 0.0  ;;  %v4709_v10 = vpop.eup %4708 }
 0x434   : > { %1197 = vadd.xlane.f32.xlu2 %v1196_v5  ;;  %v997_v12 = vmul.f32 %v4709_v10, %v4703_v48  ;;  %v1290_v48 = vld [vmem:[%s5963_s13 + $0x8] sm:$0xff] }
 0x449   : > { %v1202_v7 = vpop.permute.xlu1 %1201 }
 0x44a   : > { %1222 = vmatpush.msrb.mxu2 %v1202_v7  ;;  %v1322_v7 = vld [vmem:[%s5964_s14 + $0x8] sm:$0xff] }
 0x44c   : > { %999 = vrot.lane.b32.xlu2 %v5126_v25, %s5981_s24 }
 0x4a7   : > { %v1198_v9 = vpop.xlane.xlu2 %1197 }
 0x4a8   : > { %4710 = vrcp.f32 %v1198_v9  ;;  %v4643_v9 = vld [vmem:[%s5966_s16] ss:$0 sm:$0xff] }
 0x4a9   : > { %4712 = vrcp.f32 %v1108_v6  ;;  %v1323_v6 = vld [vmem:[%s5964_s14 + $0x10] sm:$0xff] }
 0x4aa   : > { %4714 = vrcp.f32 %v4907_v35  ;;  %1348 = vmatpush.msrb.mxu1 %v1323_v6  ;;  %v4438_v35 = vld [vmem:[%s5962_s12 + $0xc0] sm:$0xff] }
 0x4ab   : > { %v4444_v6 = vld [vmem:[%s5962_s12 + $0xe0] sm:$0xff] }
 0x4ac   : > { %1349 = vmatpush.msrb.mxu1 %v1322_v7 }
 0x4ae   : > { %v4711_v11 = vpop.eup %4710  ;;  %1350 = vmatpush.msrb.mxu1 %v1321_v8 }
 0x4af   : > { %v1200_v13 = vmul.f32 %v4711_v11, %v4707_v4  ;;  %v1000_v14 = vpop.permute.xlu2 %999  ;;  %v4713_v17 = vpop.eup %4712 }
 0x4b0   : > { %1020 = vmatpush.msra.mxu3 %v1000_v14  ;;  %v1110_v18 = vmul.f32 %v4713_v17, %v4705_v63  ;;  %v4715_v36 = vpop.eup %4714 }
 0x4b1   : > { %4413 = vmatmul.msk.f32.vlgmr.msra.gmra.mxu3 %vm896_vm3, %v997_v12  ;;  %4422 = vmatmul.msk.f32.vlgmr.msrb.gmra.mxu2 %vm896_vm3, %v1200_v13  ;;  %v1260_v37 = vmul.f32 32.0, %v4715_v36  ;;  %vm1264_vm4 = vweird.f32 %v4715_v36  ;;  %v4644_v13 = vld [vmem:[%s5965_s15 + $0x6] ss:$0 sm:$0xff] }
 0x4b2   : > { %1132 = vmatpush.msrb.mxu3 %v1112_v15 }
 0x4b3   : > { %v1261_v38 = vsub.f32 1.0, %v1260_v37 }
 0x4b4   : > { %1245 = vmatpush.msra.mxu3 %v4407_v20 }
 0x4b5   : > { %v1262_v39 = vmul.f32 %v4715_v36, %v1261_v38 }
 0x4b7   : > { %v1263_v40 = vadd.f32 %v4715_v36, %v1262_v39 }
 0x4b9   : > { %4418 = vmatmul.msk.f32.vlgmr.msrb.gmra.mxu3 %vm896_vm3, %v1110_v18  ;;  %v5178_v41 = vsel %vm1264_vm4, %v4715_v36, %v1263_v40 }
 0x534   : > { %v1022_v22 = vpop.f32.mrf.mxu3  ;;  %v1224_v23 = vpop.f32.mrf.mxu2 }
 0x535   : > { %4414 = vmatmul.msk.f32.vlgmr.msra.gmra.mxu0 %vm896_vm3, %v1022_v22  ;;  %4423 = vmatmul.msk.f32.vlgmr.msra.gmra.mxu3 %vm896_vm3, %v1224_v23 }
 0x536   : > { %1312 = vmatpush.msra.mxu0 %v1292_v46 }
 0x538   : > { %1313 = vmatpush.msra.mxu0 %v1291_v47 }
 0x53a   : > { %1314 = vmatpush.msra.mxu0 %v1290_v48  ;;  %v4646_v48 = vld [vmem:[%s5965_s15 + $0x8] ss:$0 sm:$0xff] }
 0x53c   : > { %v1134_v24 = vpop.f32.mrf.mxu3  ;;  %1315 = vmatpush.msra.mxu0 %v1289_v49 }
 0x53d   : > { %4419 = vmatmul.msk.f32.vlgmr.msrb.gmra.mxu0 %vm896_vm3, %v1134_v24  ;;  %v4429_v24 = vld [vmem:[%s5962_s12 + $0x98] sm:$0xff] }
 0x53e   : > { %1407 = vmatpush.msra.mxu2 %v4429_v24 }
 0x5b2   : > { %v1045_v25 = vpop.f32.mrf.mxu0 }
 0x5b3   : > { %v1069_v26 = vadd.f32 %v1068_v56, %v1045_v25  ;;  %v4435_v25 = vld [vmem:[%s5962_s12 + $0xb8] sm:$0xff] }
 0x5b4   : > { %1434 = vmatpush.msrb.mxu3 %v4435_v25 }
 0x5b8   : > { %v1247_v30 = vpop.f32.mrf.mxu3 }
 0x5ba   : > { %v1157_v27 = vpop.f32.mrf.mxu0 }
 0x5bb   : > { %v1160_v28 = vadd.f32 %v1157_v27, %v1069_v26  ;;  %v4441_v26 = vld [vmem:[%s5962_s12 + $0xd8] sm:$0xff]  ;;  %v4428_v27 = vld [vmem:[%s5962_s12 + $0x90] sm:$0xff] }
 0x5bc   : > { %1461 = vmatpush.msrb.mxu0 %v4441_v26  ;;  %1408 = vmatpush.msra.mxu2 %v4428_v27 }
 0x5bd   : > { %v1250_v31 = vadd.f32 %v1247_v30, %v1160_v28  ;;  %v4434_v28 = vld [vmem:[%s5962_s12 + $0xb0] sm:$0xff]  ;;  %v4427_v30 = vld [vmem:[%s5962_s12 + $0x88] sm:$0xff] }
 0x5be   : > { %1435 = vmatpush.msrb.mxu3 %v4434_v28  ;;  %1409 = vmatpush.msra.mxu2 %v4427_v30 }
 0x5bf   : > { %v1252_v32 = vadd.f32 %v4640_v29, %v1250_v31  ;;  %v4440_v29 = vld [vmem:[%s5962_s12 + $0xd0] sm:$0xff]  ;;  %v4433_v31 = vld [vmem:[%s5962_s12 + $0xa8] sm:$0xff] }
 0x5c0   : > { %1462 = vmatpush.msrb.mxu0 %v4440_v29  ;;  %1436 = vmatpush.msrb.mxu3 %v4433_v31 }
 0x5c1   : > { %v1253_v33 = vadd.f32 %v1252_v32, %v5105_v16  ;;  %v4439_v32 = vld [vmem:[%s5962_s12 + $0xc8] sm:$0xff] }
 0x5c2   : > { %1463 = vmatpush.msrb.mxu0 %v4439_v32 }
 0x5c3   : > { %v1256_v34 = vsel %vm812_vm2, %v1253_v33, 0.0 }
 0x5c4   : > { %1257 = vadd.xlane.f32.xlu2 %v1256_v34  ;;  %v4432_v34 = vld [vmem:[%s5962_s12 + $0xa0] sm:$0xff]  ;;  %1464 = vmatpush.msrb.mxu0 %v4438_v35 }
 0x5c5   : > { %1437 = vmatpush.msrb.mxu3 %v4432_v34 }
 0x637   : > { %v1258_v42 = vpop.xlane.xlu2 %1257 }
 0x638   : > { %v1266_v43 = vmul.f32 %v5178_v41, %v1258_v42 }
 0x63a   : > { %v1267_v44 = vsub.f32 %v1253_v33, %v1266_v43  ;;  %v4426_v33 = vld [vmem:[%s5962_s12 + $0x80] sm:$0xff] }
 0x63b   : > { %1410 = vmatpush.msra.mxu2 %v4426_v33 }
 0x63c   : > { %v1268_v45 = vmul.f32 %v1267_v44, %v1267_v44 }
 0x63e   : > { %v1269_v16 = vsel %vm812_vm2, %v1268_v45, 0.0 }
 0x63f   : > { %1270 = vadd.xlane.f32.xlu0 %v1269_v16  ;;  %v4645_v16 = vld [vmem:[%s5965_s15 + $0x7] ss:$0 sm:$0xff] }
 0x6b2   : > { %v1271_v53 = vpop.xlane.xlu0 %1270 }
 0x6b3   : > { %v1272_v54 = vmul.f32 %v1271_v53, %v5178_v41 }
 0x6b5   : > { %v1273_v56 = vadd.f32 1e-05, %v1272_v54  ;;  %v4649_v54 = vld [vmem:[%s5965_s15 + $0x11] ss:$0 sm:$0xff] }
 0x6b7   : > { %4716 = vrsqrt.f32 %v1273_v56  ;;  %vm1280_vm6 = vweird.f32 %v1273_v56 }
 0x6bd   : > { %v4717_v58 = vpop.eup %4716 }
 0x6be   : > { %v1275_v59 = vmul.f32 %v4717_v58, %v1273_v56  ;;  %vm1281_vm5 = vweird.f32 %v4717_v58 }
 0x6bf   : > { %vm1282_vm7 = vmor %vm1280_vm6, %vm1281_vm5 }
 0x6c0   : > { %v1276_v60 = vmul.f32 %v4717_v58, %v1275_v59 }
 0x6c2   : > { %v1277_v61 = vmul.f32 0.5, %v1276_v60 }
 0x6c4   : > { %v1278_v62 = vsub.f32 1.5, %v1277_v61 }
 0x6c6   : > { %v1279_v63 = vmul.f32 %v4717_v58, %v1278_v62 }
 0x6c8   : > { %v1283_v1 = vsel %vm1282_vm7, %v4717_v58, %v1279_v63 }
 0x6c9   : > { %v1284_v2 = vmul.f32 %v1283_v1, %v1267_v44 }
 0x6cb   : > { %v1286_v4 = vmul.f32 %v4641_v0, %v1284_v2 }
 0x6cd   : > { %v1288_v5 = vadd.f32 %v4642_v3, %v1286_v4 }
 0x6cf   : > { %4424 = vmatmul.msk.f32.vlgmr.msra.gmra.mxu0 %vm812_vm2, %v1288_v5 }
 0x74c   : > { %v1317_v10 = vpop.f32.mrf.mxu0 }
 0x74d   : > { %v1318_v11 = vadd.f32 %v4643_v9, %v1317_v10 }
 0x74f   : > { %v1320_v12 = vmax.f32 %v1318_v11, 0.0 }
 0x751   : > { %4425 = vmatmul.msk.f32.vlgmr.msrb.gmra.mxu1 %vm1331_vm8, %v1320_v12 }
 0x7ce   : > { %v1352_v14 = vpop.f32.mrf.mxu1 }
 0x7cf   : > { %v1353_v15 = vadd.f32 %v4644_v13, %v1352_v14 }
 0x7d1   : > { %v1355_v17 = vadd.f32 %v1353_v15, %v1288_v5 }
 0x7d3   : > { %v1358_v18 = vsel %vm812_vm2, %v1355_v17, 0.0 }
 0x7d4   : > { %1359 = vadd.xlane.f32.xlu1 %v1358_v18 }
 0x847   : > { %v1360_v19 = vpop.xlane.xlu1 %1359 }
 0x848   : > { %v1361_v20 = vmul.f32 %v1360_v19, %v5178_v41 }
 0x84a   : > { %v1362_v21 = vsub.f32 %v1355_v17, %v1361_v20 }
 0x84c   : > { %v1363_v22 = vmul.f32 %v1362_v21, %v1362_v21 }
 0x84e   : > { %v1364_v23 = vsel %vm812_vm2, %v1363_v22, 0.0 }
 0x84f   : > { %1365 = vadd.xlane.f32.xlu2 %v1364_v23 }
 0x8c2   : > { %v1366_v36 = vpop.xlane.xlu2 %1365 }
 0x8c3   : > { %v1367_v37 = vmul.f32 %v1366_v36, %v5178_v41 }
 0x8c5   : > { %v1368_v38 = vadd.f32 1e-05, %v1367_v37 }
 0x8c7   : > { %4718 = vrsqrt.f32 %v1368_v38  ;;  %vm1375_vm10 = vweird.f32 %v1368_v38 }
 0x8cd   : > { %v4719_v39 = vpop.eup %4718 }
 0x8ce   : > { %v1370_v40 = vmul.f32 %v4719_v39, %v1368_v38  ;;  %vm1376_vm9 = vweird.f32 %v4719_v39 }
 0x8cf   : > { %vm1377_vm11 = vmor %vm1375_vm10, %vm1376_vm9  ;;  %vm2059_vm10 = vcmask 130048  }
 0x8d0   : > { %v1371_v42 = vmul.f32 %v4719_v39, %v1370_v40 }
 0x8d2   : > { %v1372_v43 = vmul.f32 0.5, %v1371_v42 }
 0x8d4   : > { %v1373_v44 = vsub.f32 1.5, %v1372_v43 }
 0x8d6   : > { %v1374_v45 = vmul.f32 %v4719_v39, %v1373_v44 }
 0x8d8   : > { %v1378_v46 = vsel %vm1377_vm11, %v4719_v39, %v1374_v45 }
 0x8d9   : > { %v1379_v47 = vmul.f32 %v1378_v46, %v1362_v21 }
 0x8db   : > { %v1381_v49 = vmul.f32 %v4645_v16, %v1379_v47 }
 0x8dd   : > { %v5279_v50 = vadd.f32 %v4646_v48, %v1381_v49  ;;  %v4445_v49 = vld [vmem:[%s5962_s12 + $0xe8] sm:$0xff] }
 0x8df   : > { %4431 = vmatmul.msk.f32.vlgmr.msra.gmra.mxu2 %vm812_vm2, %v5279_v50  ;;  %4437 = vmatmul.msk.f32.vlgmr.msrb.gmra.mxu3 %vm812_vm2, %v5279_v50 }
 0x8e0   : > { %4443 = vmatmul.msk.f32.vlgmr.msrb.gmra.mxu0 %vm812_vm2, %v5279_v50 }
 0x95d   : > { %v1466_v52 = vpop.f32.mrf.mxu0 }
 0x95e   : > { %v5290_v53 = vadd.f32 %v4647_v51, %v1466_v52  ;;  %v4446_v51 = vld [vmem:[%s5962_s12 + $0xf0] sm:$0xff] }
 0x960   : > { %1531 = vmatpush.msra.mxu3 %v5290_v53 }
 0x962   : > { %v1439_v56 = vpop.f32.mrf.mxu3  ;;  %v1412_v57 = vpop.f32.mrf.mxu2  ;;  %1644 = vmatpush.msrb.mxu3 %v4444_v6 }
 0x963   : > { %v1440_v58 = vadd.f32 %v4649_v54, %v1439_v56  ;;  %v1413_v59 = vadd.f32 %v4648_v55, %v1412_v57 }
 0x965   : > { %1538 = vrot.lane.b32.xlu2 %v1440_v58, %s5981_s24  ;;  %4449 = vmatpush.xpose.msk.msrb.mxu2 %vm896_vm3, %v1440_v58 }
 0x968   : > { %4450 = vmatmul.msk.f32.vlgmr.msrb.gmra.mxu2 %vm896_vm3, %v1413_v59 }
 0x969   : > { %1621 = vmatpush.msra.mxu2 %v4445_v49 }
 0x96b   : > { %1733 = vmatpush.msrb.mxu2 %v4446_v51 }
 0x96d   : > { %1649 = vrot.lane.b32.xlu2 %v1413_v59, %s5979_s0 }
 0x9bf   : > { %v1539_v60 = vpop.permute.xlu2 %1538 }
 0x9c0   : > { %4452 = vmatpush.xpose.msk.msra.mxu0 %vm896_vm3, %v1539_v60 }
 0x9c7   : > { %v1650_v15 = vpop.permute.xlu2 %1649 }
 0x9eb   : > { %v1498_v61 = vpop.f32.mrf.mxu2 }
 0x9ec   : > { %v1501_v62 = vmul.f32 0.35355338, %v1498_v61 }
 0x9ee   : > { %v1502_v63 = vsel %vm896_vm3, %v1501_v62, -inf }
 0x9ef   : > { %1503 = vmax.xlane.f32.xlu0 %v1502_v63 }
 0xa03   : > { %1536 = vrot.lane.b32.xlu0 %v1413_v59, %s5981_s24 }
 0xa0b   : > { %1741 = vrot.lane.b32.xlu0 %v1440_v58, %s5998_s2 }
 0xa62   : > { %v1504_v0 = vpop.xlane.xlu0 %1503 }
 0xa63   : > { %v1505_v1 = vsub.f32 %v1501_v62, %v1504_v0  ;;  %v4650_v0 = vld [vmem:[%s5965_s15 + $0x13] ss:$0 sm:$0xff] }
 0xa65   : > { %v1506_v2 = vmul.f32 1.442695, %v1505_v1 }
 0xa67   : > { %4720 = vpow2.f32 %v1506_v2 }
 0xa6d   : > { %v4721_v3 = vpop.eup %4720 }
 0xa6e   : > { %v1508_v4 = vsel %vm896_vm3, %v4721_v3, 0.0 }
 0xa6f   : > { %1509 = vadd.xlane.f32.xlu1 %v1508_v4 }
 0xa75   : > { %v1537_v5 = vpop.permute.xlu0 %1536 }
 0xa76   : > { %4453 = vmatmul.msk.f32.vlgmr.msra.gmra.mxu0 %vm896_vm3, %v1537_v5 }
 0xa7d   : > { %v1742_v10 = vpop.permute.xlu0 %1741 }
 0xa88   : > { %1651 = vrot.lane.b32.xlu1 %v1440_v58, %s5979_s0  ;;  %v4447_v58 = vld [vmem:[%s5962_s12 + $0xf8] sm:$0xff] }
 0xa90   : > { %1739 = vrot.lane.b32.xlu1 %v1413_v59, %s5998_s2 }
 0xae2   : > { %v1510_v7 = vpop.xlane.xlu1 %1509 }
 0xae3   : > { %4722 = vrcp.f32 %v1510_v7 }
 0xae9   : > { %v4723_v8 = vpop.eup %4722 }
 0xaea   : > { %v1512_v9 = vmul.f32 %v4723_v8, %v4721_v3 }
 0xaec   : > { %4451 = vmatmul.msk.f32.vlgmr.msra.gmra.mxu3 %vm896_vm3, %v1512_v9 }
 0xaed   : > { %4461 = vmatpush.xpose.msk.msra.mxu3 %vm896_vm3, %v1742_v10 }
 0xaf3   : > { %v1561_v11 = vpop.f32.mrf.mxu0 }
 0xaf4   : > { %v1564_v12 = vmul.f32 0.35355338, %v1561_v11  ;;  %v4470_v11 = vld [vmem:[%s5963_s13 + $0x38] sm:$0xff] }
 0xaf6   : > { %v1565_v13 = vsel %vm896_vm3, %v1564_v12, -inf }
 0xaf7   : > { %1566 = vmax.xlane.f32.xlu0 %v1565_v13  ;;  %v4467_v13 = vld [vmem:[%s5963_s13 + $0x20] sm:$0xff] }
 0xafa   : > { %v1652_v14 = vpop.permute.xlu1 %1651 }
 0xafb   : > { %4457 = vmatpush.xpose.msk.msrb.mxu0 %vm896_vm3, %v1652_v14  ;;  %v4480_v14 = vld [vmem:[%s5964_s14 + $0x78] sm:$0xff] }
 0xafe   : > { %4458 = vmatmul.msk.f32.vlgmr.msrb.gmra.mxu0 %vm896_vm3, %v1650_v15  ;;  %v4479_v15 = vld [vmem:[%s5964_s14 + $0x70] sm:$0xff] }
 0xb02   : > { %v1740_v23 = vpop.permute.xlu1 %1739 }
 0xb6a   : > { %v1567_v17 = vpop.xlane.xlu0 %1566 }
 0xb6b   : > { %v1568_v18 = vsub.f32 %v1564_v12, %v1567_v17  ;;  %v4468_v12 = vld [vmem:[%s5963_s13 + $0x28] sm:$0xff] }
 0xb6c   : > { %v4478_v17 = vld [vmem:[%s5964_s14 + $0x68] sm:$0xff] }
 0xb6d   : > { %v1569_v19 = vmul.f32 1.442695, %v1568_v18 }
 0xb6f   : > { %4724 = vpow2.f32 %v1569_v19  ;;  %v1533_v20 = vpop.f32.mrf.mxu3 }
 0xb70   : > { %4456 = vmatmul.msk.f32.vlgmr.msrb.gmra.mxu3 %vm896_vm3, %v1533_v20  ;;  %v4477_v20 = vld [vmem:[%s5964_s14 + $0x60] sm:$0xff] }
 0xb71   : > { %1916 = vmatpush.msrb.mxu3 %v4480_v14  ;;  %v2015_v14 = vld [vmem:[%s6000_s8 + $0x8] sm:$0xff] }
 0xb73   : > { %1917 = vmatpush.msrb.mxu3 %v4479_v15  ;;  %v1985_v15 = vld [vmem:[%s5999_s3] sm:$0xff] }
 0xb75   : > { %v4725_v21 = vpop.eup %4724  ;;  %1918 = vmatpush.msrb.mxu3 %v4478_v17  ;;  %v2014_v17 = vld [vmem:[%s6000_s8] sm:$0xff] }
 0xb76   : > { %v1571_v22 = vsel %vm896_vm3, %v4725_v21, 0.0 }
 0xb77   : > { %1572 = vadd.xlane.f32.xlu0 %v1571_v22  ;;  %v4476_v22 = vld [vmem:[%s5964_s14 + $0x58] sm:$0xff]  ;;  %1919 = vmatpush.msrb.mxu3 %v4477_v20 }
 0xb78   : > { %4462 = vmatmul.msk.f32.vlgmr.msra.gmra.mxu3 %vm896_vm3, %v1740_v23 }
 0xb79   : > { %1920 = vmatpush.msrb.mxu3 %v4476_v22 }
 0xb7b   : > { %v1674_v24 = vpop.f32.mrf.mxu0 }
 0xb7c   : > { %v1677_v25 = vmul.f32 0.35355338, %v1674_v24 }
 0xb7e   : > { %v1678_v26 = vsel %vm896_vm3, %v1677_v25, -inf }
 0xb7f   : > { %1679 = vmax.xlane.f32.xlu2 %v1678_v26 }
 0xbea   : > { %v1573_v40 = vpop.xlane.xlu0 %1572 }
 0xbf2   : > { %v1680_v27 = vpop.xlane.xlu2 %1679 }
 0xbf3   : > { %v1681_v28 = vsub.f32 %v1677_v25, %v1680_v27  ;;  %v1646_v29 = vpop.f32.mrf.mxu3 }
 0xbf5   : > { %v1682_v30 = vmul.f32 1.442695, %v1681_v28 }
 0xbf7   : > { %4726 = vpow2.f32 %v1682_v30 }
 0xbfb   : > { %v1764_v31 = vpop.f32.mrf.mxu3 }
 0xbfc   : > { %v1767_v32 = vmul.f32 0.35355338, %v1764_v31 }
 0xbfd   : > { %v4727_v33 = vpop.eup %4726 }
 0xbfe   : > { %v1684_v34 = vsel %vm896_vm3, %v4727_v33, 0.0  ;;  %v1768_v35 = vsel %vm896_vm3, %v1767_v32, -inf }
 0xbff   : > { %1685 = vadd.xlane.f32.xlu2 %v1684_v34  ;;  %1769 = vmax.xlane.f32.xlu1 %v1768_v35  ;;  %v4475_v35 = vld [vmem:[%s5964_s14 + $0x50] sm:$0xff] }
 0xc00   : > { %1921 = vmatpush.msrb.mxu3 %v4475_v35 }
 0xc17   : > { %1689 = vrot.lane.b32.xlu2 %v5290_v53, %s5979_s0 }
 0xc18   : > { %1577 = vrot.lane.b32.xlu1 %v5290_v53, %s5981_s24  ;;  %s6002_s24 = sld [smem:[#allocation13_spill]] }
 0xc1e   : > { %v4660_v35 = vld [vmem:[%s6002_s24 + $0x1] ss:$0 sm:$0xff] }
 0xc72   : > { %v1770_v36 = vpop.xlane.xlu1 %1769  ;;  %v1686_v43 = vpop.xlane.xlu2 %1685 }
 0xc73   : > { %v1771_v37 = vsub.f32 %v1767_v32, %v1770_v36  ;;  %v4652_v32 = vld [vmem:[%s5965_s15 + $0x15] ss:$0 sm:$0xff]  ;;  %v4474_v36 = vld [vmem:[%s5964_s14 + $0x48] sm:$0xff] }
 0xc74   : > { %1922 = vmatpush.msrb.mxu3 %v4474_v36 }
 0xc75   : > { %v1772_v38 = vmul.f32 1.442695, %v1771_v37  ;;  %v4473_v37 = vld [vmem:[%s5964_s14 + $0x40] sm:$0xff] }
 0xc76   : > { %1923 = vmatpush.msrb.mxu3 %v4473_v37 }
 0xc77   : > { %4728 = vpow2.f32 %v1772_v38  ;;  %v4653_v38 = vld [vmem:[%s5966_s16 + $0x1] ss:$0 sm:$0xff] }
 0xc78   : > { %4730 = vrcp.f32 %v1573_v40 }
 0xc79   : > { %4732 = vrcp.f32 %v1686_v43  ;;  %v4654_v43 = vld [vmem:[%s5965_s15 + $0x16] ss:$0 sm:$0xff] }
 0xc7a   : > { %v1690_v46 = vpop.permute.xlu2 %1689 }
 0xc7d   : > { %v4729_v39 = vpop.eup %4728 }
 0xc7e   : > { %v1774_v42 = vsel %vm896_vm3, %v4729_v39, 0.0  ;;  %v4731_v44 = vpop.eup %4730 }
 0xc7f   : > { %1775 = vadd.xlane.f32.xlu0 %v1774_v42  ;;  %v1575_v45 = vmul.f32 %v4731_v44, %v4725_v21  ;;  %v4733_v47 = vpop.eup %4732 }
 0xc80   : > { %v1688_v48 = vmul.f32 %v4733_v47, %v4727_v33 }
 0xc8a   : > { %v1578_v16 = vpop.permute.xlu1 %1577 }
 0xc8b   : > { %1598 = vmatpush.msra.mxu1 %v1578_v16 }
 0xc8c   : > { %4454 = vmatmul.msk.f32.vlgmr.msra.gmra.mxu1 %vm896_vm3, %v1575_v45 }
 0xc8d   : > { %1710 = vmatpush.msrb.mxu1 %v1690_v46 }
 0xc8f   : > { %1823 = vmatpush.msra.mxu1 %v4447_v58 }
 0xc93   : > { %1779 = vrot.lane.b32.xlu0 %v5290_v53, %s5998_s2 }
 0xc94   : > { %4459 = vmatmul.msk.f32.vlgmr.msrb.gmra.mxu1 %vm896_vm3, %v1688_v48 }
 0xcf2   : > { %v1776_v52 = vpop.xlane.xlu0 %1775 }
 0xcf3   : > { %4734 = vrcp.f32 %v1776_v52 }
 0xcf9   : > { %v4735_v54 = vpop.eup %4734 }
 0xcfa   : > { %v1778_v55 = vmul.f32 %v4735_v54, %v4729_v39 }
 0xd05   : > { %v1780_v56 = vpop.permute.xlu0 %1779 }
 0xd06   : > { %1800 = vmatpush.msra.mxu0 %v1780_v56 }
 0xd07   : > { %4463 = vmatmul.msk.f32.vlgmr.msra.gmra.mxu0 %vm896_vm3, %v1778_v55 }
 0xd09   : > { %v1600_v53 = vpop.f32.mrf.mxu1 }
 0xd0a   : > { %4455 = vmatmul.msk.f32.vlgmr.msra.gmra.mxu2 %vm896_vm3, %v1600_v53 }
 0xd0b   : > { %1885 = vmatpush.msra.mxu2 %v4470_v11  ;;  %v2017_v11 = vld [vmem:[%s6000_s8 + $0x18] sm:$0xff] }
 0xd0c   : > { %2032 = vmatpush.msrb.mxu1 %v2017_v11 }
 0xd11   : > { %v1712_v57 = vpop.f32.mrf.mxu1 }
 0xd12   : > { %4460 = vmatmul.msk.f32.vlgmr.msrb.gmra.mxu2 %vm896_vm3, %v1712_v57 }
 0xd84   : > { %v1802_v59 = vpop.f32.mrf.mxu0 }
 0xd85   : > { %4464 = vmatmul.msk.f32.vlgmr.msra.gmra.mxu1 %vm896_vm3, %v1802_v59 }
 0xd8d   : > { %v1623_v60 = vpop.f32.mrf.mxu2 }
 0xd8e   : > { %v1647_v62 = vadd.f32 %v1646_v29, %v1623_v60  ;;  %v4651_v29 = vld [vmem:[%s5965_s15 + $0x14] ss:$0 sm:$0xff] }
 0xd95   : > { %v1735_v61 = vpop.f32.mrf.mxu2 }
 0xd96   : > { %v1738_v63 = vadd.f32 %v1735_v61, %v1647_v62  ;;  %v4655_v62 = vld [vmem:[%s5965_s15 + $0x17] ss:$0 sm:$0xff] }
 0xe02   : > { %v1825_v1 = vpop.f32.mrf.mxu1 }
 0xe03   : > { %v1828_v2 = vadd.f32 %v1825_v1, %v1738_v63  ;;  %v4656_v1 = vld [vmem:[%s5965_s15 + $0x18] ss:$0 sm:$0xff] }
 0xe05   : > { %v1830_v3 = vadd.f32 %v4650_v0, %v1828_v2 }
 0xe07   : > { %v1831_v4 = vadd.f32 %v1830_v3, %v5279_v50  ;;  %v4469_v50 = vld [vmem:[%s5963_s13 + $0x30] sm:$0xff] }
 0xe08   : > { %1886 = vmatpush.msra.mxu2 %v4469_v50  ;;  %v1987_v50 = vld [vmem:[%s5999_s3 + $0x10] sm:$0xff] }
 0xe09   : > { %v1834_v5 = vsel %vm812_vm2, %v1831_v4, 0.0 }
 0xe0a   : > { %1835 = vadd.xlane.f32.xlu1 %v1834_v5  ;;  %1887 = vmatpush.msra.mxu2 %v4468_v12  ;;  %v2016_v12 = vld [vmem:[%s6000_s8 + $0x10] sm:$0xff] }
 0xe0b   : > { %2033 = vmatpush.msrb.mxu1 %v2016_v12  ;;  %v4664_v12 = vld [vmem:[%s5971_s21 + $0x1] ss:$0 sm:$0xff] }
 0xe0c   : > { %1888 = vmatpush.msra.mxu2 %v4467_v13  ;;  %v1986_v13 = vld [vmem:[%s5999_s3 + $0x8] sm:$0xff] }
 0xe0d   : > { %2034 = vmatpush.msrb.mxu1 %v2015_v14 }
 0xe0f   : > { %2035 = vmatpush.msrb.mxu1 %v2014_v17 }
 0xe7d   : > { %v1836_v6 = vpop.xlane.xlu1 %1835 }
 0xe7e   : > { %v1837_v7 = vmul.f32 %v1836_v6, %v5178_v41 }
 0xe80   : > { %v1838_v8 = vsub.f32 %v1831_v4, %v1837_v7 }
 0xe82   : > { %v1839_v9 = vmul.f32 %v1838_v8, %v1838_v8 }
 0xe84   : > { %v1840_v10 = vsel %vm812_vm2, %v1839_v9, 0.0 }
 0xe85   : > { %1841 = vadd.xlane.f32.xlu2 %v1840_v10  ;;  %v1988_v10 = vld [vmem:[%s5999_s3 + $0x18] sm:$0xff] }
 0xe86   : > { %2006 = vmatpush.msrb.mxu0 %v1988_v10 }
 0xe88   : > { %2007 = vmatpush.msrb.mxu0 %v1987_v50 }
 0xe8a   : > { %2008 = vmatpush.msrb.mxu0 %v1986_v13  ;;  %v4663_v13 = vld [vmem:[%s5971_s21] ss:$0 sm:$0xff] }
 0xe8c   : > { %2009 = vmatpush.msrb.mxu0 %v1985_v15 }
 0xef8   : > { %v1842_v18 = vpop.xlane.xlu2 %1841 }
 0xef9   : > { %v1843_v19 = vmul.f32 %v1842_v18, %v5178_v41  ;;  %v2084_v18 = vld [vmem:[%s5960_s10] sm:$0xf] }
 0xefa   : > { %4488 = vmatpush.msk.msra.mxu0 %vm782_vm0, %v2084_v18 }
 0xefb   : > { %v1844_v21 = vadd.f32 1e-05, %v1843_v19 }
 0xefd   : > { %4736 = vrsqrt.f32 %v1844_v21  ;;  %vm1851_vm13 = vweird.f32 %v1844_v21 }
 0xf03   : > { %v4737_v23 = vpop.eup %4736 }
 0xf04   : > { %v1846_v24 = vmul.f32 %v4737_v23, %v1844_v21  ;;  %vm1852_vm12 = vweird.f32 %v4737_v23 }
 0xf05   : > { %vm1853_vm14 = vmor %vm1851_vm13, %vm1852_vm12 }
 0xf06   : > { %v1847_v25 = vmul.f32 %v4737_v23, %v1846_v24 }
 0xf08   : > { %v1848_v26 = vmul.f32 0.5, %v1847_v25 }
 0xf0a   : > { %v1849_v27 = vsub.f32 1.5, %v1848_v26 }
 0xf0c   : > { %v1850_v28 = vmul.f32 %v4737_v23, %v1849_v27 }
 0xf0e   : > { %v1854_v30 = vsel %vm1853_vm14, %v4737_v23, %v1850_v28  ;;  %v4657_v28 = vld [vmem:[%s5997_s7 + $0x1] ss:$0 sm:$0xff] }
 0xf0f   : > { %v1855_v31 = vmul.f32 %v1854_v30, %v1838_v8 }
 0xf11   : > { %v1857_v33 = vmul.f32 %v4651_v29, %v1855_v31  ;;  %v4658_v31 = vld [vmem:[%s5997_s7 + $0x2] ss:$0 sm:$0xff] }
 0xf13   : > { %v1859_v34 = vadd.f32 %v4652_v32, %v1857_v33 }
 0xf15   : > { %4472 = vmatmul.msk.f32.vlgmr.msra.gmra.mxu2 %vm812_vm2, %v1859_v34 }
 0xf98   : > { %v1890_v39 = vpop.f32.mrf.mxu2 }
 0xf99   : > { %v1891_v40 = vadd.f32 %v4653_v38, %v1890_v39  ;;  %v2056_v38 = vld [vmem:[%s6003_s9 + $0x8] sm:$0xff]  ;;  %v2055_v39 = vld [vmem:[%s6003_s9] sm:$0xff] }
 0xf9a   : > { %2077 = vmatpush.msrb.mxu2 %v2056_v38 }
 0xf9b   : > { %v1893_v42 = vmax.f32 %v1891_v40, 0.0 }
 0xf9c   : > { %2078 = vmatpush.msrb.mxu2 %v2055_v39 }
 0xf9d   : > { %4482 = vmatmul.msk.f32.vlgmr.msrb.gmra.mxu3 %vm1331_vm8, %v1893_v42 }
0x1020   : > { %v1925_v44 = vpop.f32.mrf.mxu3 }
0x1021   : > { %v1926_v45 = vadd.f32 %v4654_v43, %v1925_v44  ;;  %v2116_v43 = vld [vmem:[#allocation2 + $0x18] sm:$0xff] }
0x1022   : > { %v2146_v44 = vld [vmem:[#allocation2 + $0x38] sm:$0xff]  ;;  %2134 = vmatpush.msra.mxu1 %v2116_v43 }
0x1023   : > { %v1928_v16 = vadd.f32 %v1926_v45, %v1859_v34  ;;  %v2083_v34 = vld [vmem:[%s765_s6] sm:$0xff]  ;;  %v2173_v45 = vld [vmem:[#allocation2 + $0x58] sm:$0xff]  ;;  %2161 = vmatpush.msra.mxu2 %v2146_v44  ;;  %s6004_s6 = sld [smem:[#allocation10_spill]] }
0x1024   : > { %2188 = vmatpush.msra.mxu3 %v2173_v45 }
0x1025   : > { %v1931_v46 = vsel %vm812_vm2, %v1928_v16, 0.0 }
0x1026   : > { %1932 = vadd.xlane.f32.xlu0 %v1931_v46  ;;  %v2115_v46 = vld [vmem:[#allocation2 + $0x10] sm:$0xff] }
0x1027   : > { %2135 = vmatpush.msra.mxu1 %v2115_v46 }
0x1029   : > { %s769_s27 = scalar_lea.vmem %s6004_s6, %s5055_s30  ;;  %s6005_s6 = smov 120  }
0x1099   : > { %v1933_v47 = vpop.xlane.xlu0 %1932 }
0x109a   : > { %v1934_v48 = vmul.f32 %v1933_v47, %v5178_v41  ;;  %v2145_v47 = vld [vmem:[#allocation2 + $0x30] sm:$0xff] }
0x109b   : > { %2162 = vmatpush.msra.mxu2 %v2145_v47  ;;  %v2628_v47 = vld [vmem:[#allocation4 + $0x30] sm:$0xff] }
0x109c   : > { %v1935_v49 = vsub.f32 %v1928_v16, %v1934_v48  ;;  %v2172_v48 = vld [vmem:[#allocation2 + $0x50] sm:$0xff] }
0x109d   : > { %2189 = vmatpush.msra.mxu3 %v2172_v48  ;;  %v2627_v48 = vld [vmem:[#allocation4 + $0x28] sm:$0xff] }
0x109e   : > { %v1936_v51 = vmul.f32 %v1935_v49, %v1935_v49 }
0x10a0   : > { %v1937_v52 = vsel %vm812_vm2, %v1936_v51, 0.0  ;;  %v2114_v51 = vld [vmem:[#allocation2 + $0x8] sm:$0xff] }
0x10a1   : > { %1938 = vadd.xlane.f32.xlu1 %v1937_v52  ;;  %v2144_v52 = vld [vmem:[#allocation2 + $0x28] sm:$0xff]  ;;  %2136 = vmatpush.msra.mxu1 %v2114_v51 }
0x10a2   : > { %2163 = vmatpush.msra.mxu2 %v2144_v52 }
0x1114   : > { %v1939_v54 = vpop.xlane.xlu1 %1938 }
0x1115   : > { %v1940_v55 = vmul.f32 %v1939_v54, %v5178_v41 }
0x1117   : > { %v1941_v56 = vadd.f32 1e-05, %v1940_v55  ;;  %v2171_v55 = vld [vmem:[#allocation2 + $0x48] sm:$0xff] }
0x1118   : > { %2190 = vmatpush.msra.mxu3 %v2171_v55  ;;  %v4662_v55 = vld [vmem:[%s5997_s7 + $0x3] ss:$0 sm:$0xff] }
0x1119   : > { %4738 = vrsqrt.f32 %v1941_v56  ;;  %vm1948_vm4 = vweird.f32 %v1941_v56 }
0x111f   : > { %v4739_v53 = vpop.eup %4738 }
0x1120   : > { %v1943_v57 = vmul.f32 %v4739_v53, %v1941_v56  ;;  %vm1949_vm15 = vweird.f32 %v4739_v53 }
0x1121   : > { %vm1950_vm5 = vmor %vm1948_vm4, %vm1949_vm15 }
0x1122   : > { %v1944_v58 = vmul.f32 %v4739_v53, %v1943_v57  ;;  %v2143_v57 = vld [vmem:[#allocation2 + $0x20] sm:$0xff] }
0x1123   : > { %2164 = vmatpush.msra.mxu2 %v2143_v57 }
0x1124   : > { %v1945_v59 = vmul.f32 0.5, %v1944_v58 }
0x1126   : > { %v1946_v60 = vsub.f32 1.5, %v1945_v59  ;;  %v2170_v59 = vld [vmem:[#allocation2 + $0x40] sm:$0xff] }
0x1127   : > { %2191 = vmatpush.msra.mxu3 %v2170_v59 }
0x1128   : > { %v1947_v61 = vmul.f32 %v4739_v53, %v1946_v60 }
0x112a   : > { %v1951_v63 = vsel %vm1950_vm5, %v4739_v53, %v1947_v61  ;;  %v2113_v53 = vld [vmem:[#allocation2] sm:$0xff] }
0x112b   : > { %v1952_v0 = vmul.f32 %v1951_v63, %v1935_v49  ;;  %v4661_v49 = vld [vmem:[%s5997_s7 + $0x4] ss:$0 sm:$0xff]  ;;  %2137 = vmatpush.msra.mxu1 %v2113_v53 }
0x112d   : > { %v1954_v2 = vmul.f32 %v4655_v62, %v1952_v0 }
0x112f   : > { %v1956_v3 = vadd.f32 %v4656_v1, %v1954_v2  ;;  %v4659_v2 = vld [vmem:[%s6002_s24] ss:$0 sm:$0xff] }
0x1131   : > { %v1959_v4 = vsel %vm812_vm2, %v1956_v3, 0.0 }
0x1132   : > { %1960 = vadd.xlane.f32.xlu2 %v1959_v4  ;;  %v2052_v4 = vld [vmem:[%s769_s27] sm:$0xff]  ;;  %s6006_s27 = smov 112  }
0x11a5   : > { %v1961_v5 = vpop.xlane.xlu2 %1960 }
0x11a6   : > { %v1962_v6 = vmul.f32 %v1961_v5, %v5178_v41 }
0x11a8   : > { %v1963_v7 = vsub.f32 %v1956_v3, %v1962_v6 }
0x11aa   : > { %v1964_v8 = vmul.f32 %v1963_v7, %v1963_v7 }
0x11ac   : > { %v1965_v9 = vsel %vm812_vm2, %v1964_v8, 0.0 }
0x11ad   : > { %1966 = vadd.xlane.f32.xlu0 %v1965_v9  ;;  %v4665_v9 = vld [vmem:[%s5971_s21 + $0x2] ss:$0 sm:$0xff] }
0x1220   : > { %v1967_v19 = vpop.xlane.xlu0 %1966 }
0x1221   : > { %v1968_v20 = vmul.f32 %v1967_v19, %v5178_v41 }
0x1223   : > { %v1969_v21 = vadd.f32 1e-05, %v1968_v20  ;;  %v2202_v20 = vlaneseq }
0x1225   : > { %4740 = vrsqrt.f32 %v1969_v21  ;;  %vm1976_vm7 = vweird.f32 %v1969_v21 }
0x122b   : > { %v4741_v22 = vpop.eup %4740 }
0x122c   : > { %v1971_v23 = vmul.f32 %v4741_v22, %v1969_v21  ;;  %vm1977_vm6 = vweird.f32 %v4741_v22  ;;  %v2203_v21 = vshrl.u32 %v2202_v20, 7 }
0x122d   : > { %vm1978_vm9 = vmor %vm1976_vm7, %vm1977_vm6 }
0x122e   : > { %v1972_v24 = vmul.f32 %v4741_v22, %v1971_v23 }
0x1230   : > { %v1973_v25 = vmul.f32 0.5, %v1972_v24 }
0x1232   : > { %v1974_v26 = vsub.f32 1.5, %v1973_v25 }
0x1234   : > { %v1975_v27 = vmul.f32 %v4741_v22, %v1974_v26 }
0x1236   : > { %v1979_v29 = vsel %vm1978_vm9, %v4741_v22, %v1975_v27  ;;  %v2205_v22 = vand.u32 127, %v2202_v20 }
0x1237   : > { %v1980_v30 = vmul.f32 %v1979_v29, %v1963_v7 }
0x1238   : > { %vm5507_vm11 = vcmp.le.s32.totalorder %v2205_v22, %v2203_v21 }
0x1239   : > { %v1982_v32 = vmul.f32 %v4657_v28, %v1980_v30 }
0x123b   : > { %v1984_v33 = vadd.f32 %v4658_v31, %v1982_v32 }
0x123d   : > { %4485 = vmatmul.msk.f32.vlgmr.msrb.gmra.mxu0 %vm812_vm2, %v1984_v33  ;;  %4486 = vmatmul.msk.f32.vlgmr.msrb.gmra.mxu1 %vm812_vm2, %v1984_v33 }
0x1245   : > { %4489 = vmatmul.msk.f32.vlgmr.msra.gmra.mxu0 %vm778_vm1, %v2083_v34  ;;  %v2197_v34 = vld [vmem:[#allocation2 + $0x60] sm:$0xff] }
0x12ba   : > { %v2011_v36 = vpop.f32.mrf.mxu0  ;;  %v2037_v37 = vpop.f32.mrf.mxu1 }
0x12bb   : > { %v2038_v40 = vadd.f32 %v4660_v35, %v2037_v37  ;;  %v2012_v6 = vadd.f32 %v4659_v2, %v2011_v36 }
0x12bd   : > { %v2041_v42 = vand.u32 2147483647, %v2038_v40  ;;  %v2040_v63 = vmax.f32 %v2038_v40, 0.0  ;;  %vm2049_vm0 = vcmp.gt.f32.partialorder %v2038_v40, 20.0 }
0x12bf   : > { %v2042_v16 = vsub.f32 0.0, %v2041_v42 }
0x12c1   : > { %v2043_v54 = vmul.f32 1.442695, %v2042_v16  ;;  %v2629_v16 = vld [vmem:[#allocation4 + $0x38] sm:$0xff] }
0x12c2   : > { %v2110_v56 = vpop.f32.mrf.mxu0 }
0x12c3   : > { %4742 = vpow2.f32 %v2043_v54  ;;  %v5472_v58 = vadd.f32 %v4661_v49, %v2110_v56  ;;  %v2626_v49 = vld [vmem:[#allocation4 + $0x20] sm:$0xff] }
0x12c5   : > { %4490 = vmatmul.msk.f32.vlgmr.msra.gmra.mxu1 %vm812_vm2, %v5472_v58  ;;  %4492 = vmatmul.msk.f32.vlgmr.msra.gmra.mxu3 %vm812_vm2, %v5472_v58 }
0x12c9   : > { %v4743_v60 = vpop.eup %4742 }
0x12ca   : > { %v2045_v61 = vadd.f32 1.0, %v4743_v60 }
0x12cc   : > { %4744 = vlog2.f32 %v2045_v61 }
0x12d2   : > { %v4745_v62 = vpop.eup %4744 }
0x12d3   : > { %v2047_v0 = vmul.f32 0.6931472, %v4745_v62 }
0x12d5   : > { %v2048_v1 = vadd.f32 %v2047_v0, %v2040_v63 }
0x12d7   : > { %v2050_v3 = vsel %vm2049_vm0, %v2038_v40, %v2048_v1 }
0x12d8   : > { %v2051_v5 = vadd.f32 1e-08, %v2050_v3 }
0x12da   : > { %v2053_v7 = vmul.f32 %v2052_v4, %v2051_v5 }
0x12dc   : > { %v2054_v8 = vadd.f32 %v2053_v7, %v2012_v6 }
0x12de   : > { %4487 = vmatmul.msk.f32.vlgmr.msrb.gmra.mxu2 %vm2059_vm10, %v2054_v8 }
0x12e6   : > { %4491 = vmatmul.msk.f32.vlgmr.msra.gmra.mxu2 %vm812_vm2, %v5472_v58 }
0x1342   : > { %v2139_v15 = vpop.f32.mrf.mxu1 }
0x1343   : > { %v2140_v18 = vadd.f32 %v4663_v13, %v2139_v15 }
0x1348   : > { %v2193_v10 = vpop.f32.mrf.mxu3 }
0x1349   : > { %v5490_v11 = vadd.f32 %v4665_v9, %v2193_v10 }
0x134b   : > { %2264 = vmatpush.msrb.mxu1 %v5490_v11 }
0x134d   : > { %2378 = vmatpush.msra.mxu1 %v2197_v34 }
0x1361   : > { %v5493_v50 = vpop.f32.mrf.mxu2 }
0x1362   : > { %v5535_v60 = vadd.f32 %v4662_v55, %v5493_v50 }
0x1369   : > { %v2166_v14 = vpop.f32.mrf.mxu2 }
0x136a   : > { %v2167_v17 = vadd.f32 %v4664_v12, %v2166_v14  ;;  %v2198_v14 = vld [vmem:[#allocation2 + $0x68] sm:$0xff] }
0x136c   : > { %2271 = vrot.lane.b32.xlu0 %v2167_v17, %s6005_s6  ;;  %4493 = vmatpush.xpose.msk.msrb.mxu0 %vm896_vm3, %v2167_v17 }
0x136f   : > { %4494 = vmatmul.msk.f32.vlgmr.msrb.gmra.mxu0 %vm896_vm3, %v2140_v18 }
0x1370   : > { %2355 = vmatpush.msra.mxu0 %v2198_v14  ;;  %v4670_v14 = vld [vmem:[%s5971_s21 + $0x5] ss:$0 sm:$0xff] }
0x1374   : > { %2476 = vrot.lane.b32.xlu0 %v2167_v17, %s5998_s2 }
0x137c   : > { %2383 = vrot.lane.b32.xlu0 %v2140_v18, %s6006_s27 }
0x13de   : > { %v2272_v19 = vpop.permute.xlu0 %2271 }
0x13df   : > { %4496 = vmatpush.xpose.msk.msrb.mxu2 %vm896_vm3, %v2272_v19 }
0x13e6   : > { %v2477_v36 = vpop.permute.xlu0 %2476 }
0x13ec   : > { %v2230_v23 = vpop.f32.mrf.mxu0 }
0x13ed   : > { %v2233_v25 = vmul.f32 0.35355338, %v2230_v23  ;;  %v4666_v23 = vld [vmem:[%s5971_s21 + $0x7] ss:$0 sm:$0xff] }
0x13ee   : > { %v2384_v40 = vpop.permute.xlu0 %2383 }
0x13ef   : > { %v2234_v26 = vsel %vm5507_vm11, %v2233_v25, -1e+30 }
0x13f0   : > { %v2235_v27 = vsel %vm896_vm3, %v2234_v26, -inf }
0x13f1   : > { %2236 = vmax.xlane.f32.xlu1 %v2235_v27 }
0x140a   : > { %2269 = vrot.lane.b32.xlu1 %v2140_v18, %s6005_s6 }
0x1412   : > { %2474 = vrot.lane.b32.xlu1 %v2140_v18, %s5998_s2 }
0x1464   : > { %v2237_v28 = vpop.xlane.xlu1 %2236 }
0x1465   : > { %v2238_v29 = vsub.f32 %v2234_v26, %v2237_v28  ;;  %v2200_v28 = vld [vmem:[#allocation2 + $0x78] sm:$0xff] }
0x1467   : > { %v2239_v30 = vmul.f32 1.442695, %v2238_v29 }
0x1469   : > { %4746 = vpow2.f32 %v2239_v30 }
0x146f   : > { %v4747_v31 = vpop.eup %4746 }
0x1470   : > { %v2241_v32 = vsel %vm896_vm3, %v4747_v31, 0.0 }
0x1471   : > { %2242 = vadd.xlane.f32.xlu2 %v2241_v32  ;;  %v2199_v32 = vld [vmem:[#allocation2 + $0x70] sm:$0xff] }
0x1472   : > { %2468 = vmatpush.msrb.mxu0 %v2199_v32  ;;  %v2683_v32 = vld [vmem:[#allocation4 + $0x60] sm:$0xff] }
0x147c   : > { %v2270_v33 = vpop.permute.xlu1 %2269 }
0x147d   : > { %4497 = vmatmul.msk.f32.vlgmr.msrb.gmra.mxu2 %vm896_vm3, %v2270_v33 }
0x1484   : > { %v2475_v51 = vpop.permute.xlu1 %2474 }
0x1489   : > { %2385 = vrot.lane.b32.xlu2 %v2167_v17, %s6006_s27 }
0x14e4   : > { %v2243_v35 = vpop.xlane.xlu2 %2242 }
0x14e5   : > { %4748 = vrcp.f32 %v2243_v35 }
0x14eb   : > { %v4749_v37 = vpop.eup %4748 }
0x14ec   : > { %v2245_v38 = vmul.f32 %v4749_v37, %v4747_v31  ;;  %v2386_v39 = vpop.permute.xlu2 %2385  ;;  %v2658_v37 = vld [vmem:[#allocation4 + $0x50] sm:$0xff] }
0x14ed   : > { %4501 = vmatpush.xpose.msk.msra.mxu2 %vm896_vm3, %v2386_v39  ;;  %v2656_v39 = vld [vmem:[#allocation4 + $0x40] sm:$0xff] }
0x14ee   : > { %4495 = vmatmul.msk.f32.vlgmr.msrb.gmra.mxu1 %vm896_vm3, %v2245_v38  ;;  %v2657_v38 = vld [vmem:[#allocation4 + $0x48] sm:$0xff] }
0x14ef   : > { %4505 = vmatpush.xpose.msk.msrb.mxu1 %vm896_vm3, %v2477_v36  ;;  %v2659_v36 = vld [vmem:[#allocation4 + $0x58] sm:$0xff] }
0x14f0   : > { %4502 = vmatmul.msk.f32.vlgmr.msra.gmra.mxu2 %vm896_vm3, %v2384_v40  ;;  %v2599_v40 = vld [vmem:[#allocation4 + $0x18] sm:$0xff] }
0x1500   : > { %v2294_v42 = vpop.f32.mrf.mxu2 }
0x1501   : > { %v2297_v43 = vmul.f32 0.35355338, %v2294_v42  ;;  %v2598_v42 = vld [vmem:[#allocation4 + $0x10] sm:$0xff] }
0x1503   : > { %v2298_v44 = vsel %vm5507_vm11, %v2297_v43, -1e+30  ;;  %v2597_v43 = vld [vmem:[#allocation4 + $0x8] sm:$0xff] }
0x1504   : > { %v2299_v45 = vsel %vm896_vm3, %v2298_v44, -inf }
0x1505   : > { %2300 = vmax.xlane.f32.xlu2 %v2299_v45 }
0x156b   : > { %v2266_v46 = vpop.f32.mrf.mxu1 }
0x156c   : > { %4500 = vmatmul.msk.f32.vlgmr.msra.gmra.mxu1 %vm896_vm3, %v2266_v46 }
0x156d   : > { %2647 = vmatpush.msra.mxu1 %v2629_v16  ;;  %v4667_v16 = vld [vmem:[%s5971_s21 + $0x8] ss:$0 sm:$0xff] }
0x156f   : > { %2648 = vmatpush.msra.mxu1 %v2628_v47 }
0x1571   : > { %2649 = vmatpush.msra.mxu1 %v2627_v48 }
0x1573   : > { %v2408_v52 = vpop.f32.mrf.mxu2  ;;  %2650 = vmatpush.msra.mxu1 %v2626_v49 }
0x1574   : > { %v2411_v54 = vmul.f32 0.35355338, %v2408_v52  ;;  %4506 = vmatmul.msk.f32.vlgmr.msrb.gmra.mxu1 %vm896_vm3, %v2475_v51 }
0x1576   : > { %v2412_v56 = vsel %vm5507_vm11, %v2411_v54, -1e+30  ;;  %v4668_v54 = vld [vmem:[%s5971_s21 + $0x3] ss:$0 sm:$0xff] }
0x1577   : > { %v2413_v53 = vsel %vm896_vm3, %v2412_v56, -inf }
0x1578   : > { %2414 = vmax.xlane.f32.xlu1 %v2413_v53  ;;  %v2301_v57 = vpop.xlane.xlu2 %2300 }
0x1579   : > { %v2302_v59 = vsub.f32 %v2298_v44, %v2301_v57  ;;  %v2596_v44 = vld [vmem:[#allocation4] sm:$0xff] }
0x157b   : > { %v2303_v61 = vmul.f32 1.442695, %v2302_v59 }
0x157c   : > { %4510 = vmatmul.msk.f32.vlgmr.msra.gmra.mxu1 %vm812_vm2, %v5535_v60 }
0x157d   : > { %4750 = vpow2.f32 %v2303_v61 }
0x1583   : > { %v4751_v62 = vpop.eup %4750 }
0x1584   : > { %v2305_v63 = vsel %vm896_vm3, %v4751_v62, 0.0 }
0x1585   : > { %2306 = vadd.xlane.f32.xlu2 %v2305_v63 }
0x1591   : > { %2311 = vrot.lane.b32.xlu1 %v5490_v11, %s6005_s6 }
0x15e9   : > { %v5542_v0 = vpop.f32.mrf.mxu1 }
0x15eb   : > { %v2415_v1 = vpop.xlane.xlu1 %2414 }
0x15ec   : > { %v2416_v2 = vsub.f32 %v2412_v56, %v2415_v1 }
0x15ee   : > { %v2417_v3 = vmul.f32 1.442695, %v2416_v2 }
0x15f0   : > { %4752 = vpow2.f32 %v2417_v3 }
0x15f1   : > { %v2499_v4 = vpop.f32.mrf.mxu1 }
0x15f2   : > { %v2502_v5 = vmul.f32 0.35355338, %v2499_v4 }
0x15f4   : > { %v2503_v6 = vsel %vm5507_vm11, %v2502_v5, -1e+30 }
0x15f5   : > { %v2504_v7 = vsel %vm896_vm3, %v2503_v6, -inf }
0x15f6   : > { %2505 = vmax.xlane.f32.xlu0 %v2504_v7  ;;  %v4753_v9 = vpop.eup %4752 }
0x15f7   : > { %v2419_v10 = vsel %vm896_vm3, %v4753_v9, 0.0 }
0x15f8   : > { %v2307_v8 = vpop.xlane.xlu2 %2306 }
0x15f9   : > { %4754 = vrcp.f32 %v2307_v8  ;;  %v2652_v25 = vpop.f32.mrf.mxu1 }
0x15fa   : > { %v5555_v29 = vadd.f32 %v4666_v23, %v2652_v25 }
0x15fe   : > { %2420 = vadd.xlane.f32.xlu0 %v2419_v10 }
0x15ff   : > { %v4755_v50 = vpop.eup %4754 }
0x1600   : > { %v2309_v12 = vmul.f32 %v4755_v50, %v4751_v62  ;;  %v4669_v50 = vld [vmem:[%s5971_s21 + $0x4] ss:$0 sm:$0xff] }
0x1603   : > { %v2312_v13 = vpop.permute.xlu1 %2311 }
0x1604   : > { %2332 = vmatpush.msrb.mxu3 %v2312_v13 }
0x1605   : > { %4498 = vmatmul.msk.f32.vlgmr.msrb.gmra.mxu3 %vm896_vm3, %v2309_v12 }
0x1612   : > { %2424 = vrot.lane.b32.xlu0 %v5490_v11, %s6006_s27 }
0x1669   : > { %v2506_v15 = vpop.xlane.xlu0 %2505 }
0x166a   : > { %v2507_v17 = vsub.f32 %v2503_v6, %v2506_v15 }
0x166c   : > { %v2508_v18 = vmul.f32 1.442695, %v2507_v17 }
0x166e   : > { %4756 = vpow2.f32 %v2508_v18  ;;  %v4671_v18 = vld [vmem:[%s5971_s21 + $0x6] ss:$0 sm:$0xff] }
0x1671   : > { %v2421_v21 = vpop.xlane.xlu0 %2420 }
0x1672   : > { %4758 = vrcp.f32 %v2421_v21 }
0x1674   : > { %v4757_v19 = vpop.eup %4756 }
0x1675   : > { %v2510_v20 = vsel %vm896_vm3, %v4757_v19, 0.0 }
0x1676   : > { %2511 = vadd.xlane.f32.xlu2 %v2510_v20 }
0x1678   : > { %v4759_v22 = vpop.eup %4758 }
0x1679   : > { %v2423_v26 = vmul.f32 %v4759_v22, %v4753_v9 }
0x1684   : > { %v2425_v27 = vpop.permute.xlu0 %2424 }
0x1685   : > { %2445 = vmatpush.msra.mxu3 %v2425_v27 }
0x1686   : > { %4503 = vmatmul.msk.f32.vlgmr.msra.gmra.mxu3 %vm896_vm3, %v2423_v26 }
0x1687   : > { %2559 = vmatpush.msrb.mxu3 %v2200_v28 }
0x1688   : > { %v2334_v30 = vpop.f32.mrf.mxu3 }
0x1689   : > { %4512 = vmatpush.xpose.msk.msra.mxu3 %vm896_vm3, %v5555_v29  ;;  %4499 = vmatmul.msk.f32.vlgmr.msra.gmra.mxu0 %vm896_vm3, %v2334_v30 }
0x168a   : > { %2617 = vmatpush.msra.mxu0 %v2599_v40 }
0x168c   : > { %2618 = vmatpush.msra.mxu0 %v2598_v42 }
0x168e   : > { %2515 = vrot.lane.b32.xlu2 %v5490_v11, %s5998_s2  ;;  %2619 = vmatpush.msra.mxu0 %v2597_v43 }
0x1690   : > { %2620 = vmatpush.msra.mxu0 %v2596_v44 }
0x16e9   : > { %v2512_v31 = vpop.xlane.xlu2 %2511 }
0x16ea   : > { %4760 = vrcp.f32 %v2512_v31 }
0x16f0   : > { %v4761_v33 = vpop.eup %4760 }
0x16f1   : > { %v2514_v34 = vmul.f32 %v4761_v33, %v4757_v19  ;;  %v2516_v35 = vpop.permute.xlu2 %2515 }
0x16f2   : > { %2536 = vmatpush.msrb.mxu2 %v2516_v35 }
0x16f3   : > { %4507 = vmatmul.msk.f32.vlgmr.msrb.gmra.mxu2 %vm896_vm3, %v2514_v34 }
0x16f4   : > { %2674 = vmatpush.msra.mxu2 %v2659_v36 }
0x16f6   : > { %2675 = vmatpush.msra.mxu2 %v2658_v37 }
0x16f8   : > { %2676 = vmatpush.msra.mxu2 %v2657_v38 }
0x16fa   : > { %2677 = vmatpush.msra.mxu2 %v2656_v39 }
0x16fb   : > { %4511 = vmatmul.msk.f32.vlgmr.msra.gmra.mxu2 %vm812_vm2, %v5535_v60 }
0x1706   : > { %v2357_v48 = vpop.f32.mrf.mxu0 }
0x1707   : > { %v2381_v51 = vadd.f32 %v5542_v0, %v2357_v48 }
0x1709   : > { %v2447_v11 = vpop.f32.mrf.mxu3 }
0x170a   : > { %4504 = vmatmul.msk.f32.vlgmr.msrb.gmra.mxu0 %vm896_vm3, %v2447_v11 }
0x1776   : > { %v2538_v45 = vpop.f32.mrf.mxu2 }
0x1777   : > { %4508 = vmatmul.msk.f32.vlgmr.msrb.gmra.mxu3 %vm896_vm3, %v2538_v45 }
0x177e   : > { %v2679_v46 = vpop.f32.mrf.mxu2 }
0x177f   : > { %v5571_v47 = vadd.f32 %v4667_v16, %v2679_v46 }
0x1781   : > { %2744 = vmatpush.msrb.mxu0 %v5571_v47 }
0x1787   : > { %v2470_v49 = vpop.f32.mrf.mxu0 }
0x1788   : > { %v2473_v52 = vadd.f32 %v2470_v49, %v2381_v51 }
0x17fa   : > { %v2561_v55 = vpop.f32.mrf.mxu3 }
0x17fb   : > { %v2564_v56 = vadd.f32 %v2561_v55, %v2473_v52 }
0x17fd   : > { %v2566_v53 = vadd.f32 %v4668_v54, %v2564_v56 }
0x17ff   : > { %v2567_v57 = vadd.f32 %v2566_v53, %v5472_v58 }
0x1801   : > { %v2570_v59 = vsel %vm812_vm2, %v2567_v57, 0.0 }
0x1802   : > { %2571 = vadd.xlane.f32.xlu1 %v2570_v59 }
0x1875   : > { %v2572_v61 = vpop.xlane.xlu1 %2571 }
0x1876   : > { %v2573_v62 = vmul.f32 %v2572_v61, %v5178_v41 }
0x1878   : > { %v2574_v63 = vsub.f32 %v2567_v57, %v2573_v62 }
0x187a   : > { %v2575_v1 = vmul.f32 %v2574_v63, %v2574_v63 }
0x187c   : > { %v2576_v0 = vsel %vm812_vm2, %v2575_v1, 0.0 }
0x187d   : > { %2577 = vadd.xlane.f32.xlu0 %v2576_v0 }
0x1891   : > { %2751 = vrot.lane.b32.xlu0 %v5555_v29, %s6005_s6 }
0x18f0   : > { %v2578_v2 = vpop.xlane.xlu0 %2577 }
0x18f1   : > { %v2579_v3 = vmul.f32 %v2578_v2, %v5178_v41 }
0x18f3   : > { %v2580_v4 = vadd.f32 1e-05, %v2579_v3 }
0x18f5   : > { %4762 = vrsqrt.f32 %v2580_v4  ;;  %vm2587_vm13 = vweird.f32 %v2580_v4 }
0x18fb   : > { %v4763_v58 = vpop.eup %4762 }
0x18fc   : > { %v2582_v5 = vmul.f32 %v4763_v58, %v2580_v4  ;;  %vm2588_vm12 = vweird.f32 %v4763_v58 }
0x18fd   : > { %vm2589_vm14 = vmor %vm2587_vm13, %vm2588_vm12 }
0x18fe   : > { %v2583_v6 = vmul.f32 %v4763_v58, %v2582_v5 }
0x1900   : > { %v2584_v7 = vmul.f32 0.5, %v2583_v6 }
0x1902   : > { %v2585_v8 = vsub.f32 1.5, %v2584_v7 }
0x1903   : > { %v2752_v9 = vpop.permute.xlu0 %2751 }
0x1904   : > { %v2586_v10 = vmul.f32 %v4763_v58, %v2585_v8  ;;  %4515 = vmatpush.xpose.msk.msrb.mxu1 %vm896_vm3, %v2752_v9 }
0x1906   : > { %v2590_v12 = vsel %vm2589_vm14, %v4763_v58, %v2586_v10 }
0x1907   : > { %v2591_v13 = vmul.f32 %v2590_v12, %v2574_v63  ;;  %v2685_v12 = vld [vmem:[#allocation4 + $0x70] sm:$0xff] }
0x1909   : > { %v2593_v15 = vmul.f32 %v4669_v50, %v2591_v13  ;;  %v2684_v50 = vld [vmem:[#allocation4 + $0x68] sm:$0xff] }
0x190a   : > { %2834 = vmatpush.msrb.mxu3 %v2684_v50 }
0x190b   : > { %v5592_v17 = vadd.f32 %v4670_v14, %v2593_v15 }
0x190d   : > { %4509 = vmatmul.msk.f32.vlgmr.msra.gmra.mxu0 %vm812_vm2, %v5592_v17 }
0x190e   : > { %2857 = vmatpush.msra.mxu0 %v2683_v32 }
0x198a   : > { %v2622_v19 = vpop.f32.mrf.mxu0 }
0x198b   : > { %v2623_v20 = vadd.f32 %v4671_v18, %v2622_v19 }
0x198d   : > { %2862 = vrot.lane.b32.xlu0 %v2623_v20, %s6006_s27  ;;  %4513 = vmatmul.msk.f32.vlgmr.msra.gmra.mxu3 %vm896_vm3, %v2623_v20 }
0x198e   : > { %2946 = vmatpush.msra.mxu3 %v2685_v12 }
0x1995   : > { %2952 = vrot.lane.b32.xlu0 %v2623_v20, %s5998_s2 }
0x1a10   : > { %v2711_v21 = vpop.f32.mrf.mxu3 }
0x1a11   : > { %v2714_v22 = vmul.f32 0.35355338, %v2711_v21  ;;  %v2686_v21 = vld [vmem:[#allocation4 + $0x78] sm:$0xff] }
0x1a13   : > { %v2715_v23 = vsel %vm896_vm3, %v2714_v22, -inf }
0x1a14   : > { %2716 = vmax.xlane.f32.xlu2 %v2715_v23 }
0x1a2c   : > { %2749 = vrot.lane.b32.xlu2 %v2623_v20, %s6005_s6 }
0x1a34   : > { %2954 = vrot.lane.b32.xlu2 %v5555_v29, %s5998_s2 }
0x1a87   : > { %v2717_v25 = vpop.xlane.xlu2 %2716 }
0x1a88   : > { %v2718_v26 = vsub.f32 %v2714_v22, %v2717_v25 }
0x1a8a   : > { %v2719_v27 = vmul.f32 1.442695, %v2718_v26 }
0x1a8c   : > { %4764 = vpow2.f32 %v2719_v27  ;;  %v4672_v27 = vld [vmem:[%s5971_s21 + $0x9] ss:$0 sm:$0xff] }
0x1a8f   : > { %v2750_v28 = vpop.permute.xlu2 %2749 }
0x1a90   : > { %4516 = vmatmul.msk.f32.vlgmr.msrb.gmra.mxu1 %vm896_vm3, %v2750_v28 }
0x1a92   : > { %v4765_v30 = vpop.eup %4764 }
0x1a93   : > { %v2721_v31 = vsel %vm896_vm3, %v4765_v30, 0.0 }
0x1a94   : > { %2722 = vadd.xlane.f32.xlu1 %v2721_v31 }
0x1a97   : > { %v2955_v39 = vpop.permute.xlu2 %2954 }
0x1aad   : > { %2864 = vrot.lane.b32.xlu1 %v5555_v29, %s6006_s27  ;;  %v2863_v29 = vpop.permute.xlu0 %2862 }
0x1ab5   : > { %v2953_v46 = vpop.permute.xlu0 %2952 }
0x1b07   : > { %v2723_v33 = vpop.xlane.xlu1 %2722 }
0x1b08   : > { %4766 = vrcp.f32 %v2723_v33 }
0x1b0d   : > { %v2774_v34 = vpop.f32.mrf.mxu1 }
0x1b0e   : > { %v4767_v35 = vpop.eup %4766  ;;  %v2777_v36 = vmul.f32 0.35355338, %v2774_v34 }
0x1b0f   : > { %v2725_v37 = vmul.f32 %v4767_v35, %v4765_v30 }
0x1b10   : > { %v2778_v38 = vsel %vm896_vm3, %v2777_v36, -inf }
0x1b11   : > { %4514 = vmatmul.msk.f32.vlgmr.msrb.gmra.mxu0 %vm896_vm3, %v2725_v37  ;;  %2779 = vmax.xlane.f32.xlu1 %v2778_v38 }
0x1b12   : > { %4524 = vmatpush.xpose.msk.msrb.mxu0 %vm896_vm3, %v2955_v39  ;;  %v3076_v39 = vld [vmem:[%s5969_s19 + $0x18] sm:$0xff] }
0x1b1f   : > { %v2865_v11 = vpop.permute.xlu1 %2864 }
0x1b20   : > { %4520 = vmatpush.xpose.msk.msra.mxu1 %vm896_vm3, %v2865_v11  ;;  %v3074_v11 = vld [vmem:[%s5969_s19 + $0x8] sm:$0xff] }
0x1b23   : > { %4521 = vmatmul.msk.f32.vlgmr.msra.gmra.mxu1 %vm896_vm3, %v2863_v29  ;;  %v3073_v29 = vld [vmem:[%s5969_s19] sm:$0xff] }
0x1b84   : > { %v2780_v40 = vpop.xlane.xlu1 %2779 }
0x1b85   : > { %v2781_v42 = vsub.f32 %v2777_v36, %v2780_v40  ;;  %v3112_v40 = vld [vmem:[%s5970_s20 + $0x38] sm:$0xff] }
0x1b87   : > { %v2782_v43 = vmul.f32 1.442695, %v2781_v42  ;;  %v3111_v42 = vld [vmem:[%s5970_s20 + $0x30] sm:$0xff] }
0x1b89   : > { %4768 = vpow2.f32 %v2782_v43  ;;  %v3110_v43 = vld [vmem:[%s5970_s20 + $0x28] sm:$0xff] }
0x1b8e   : > { %v2746_v44 = vpop.f32.mrf.mxu0 }
0x1b8f   : > { %v4769_v45 = vpop.eup %4768  ;;  %4519 = vmatmul.msk.f32.vlgmr.msra.gmra.mxu0 %vm896_vm3, %v2746_v44 }
0x1b90   : > { %v2784_v16 = vsel %vm896_vm3, %v4769_v45, 0.0  ;;  %3126 = vmatpush.msra.mxu0 %v3112_v40  ;;  %v4678_v40 = vld [vmem:[%s5971_s21 + $0xe] ss:$0 sm:$0xff] }
0x1b91   : > { %2785 = vadd.xlane.f32.xlu1 %v2784_v16  ;;  %v3109_v16 = vld [vmem:[%s5970_s20 + $0x20] sm:$0xff] }
0x1b92   : > { %3127 = vmatpush.msra.mxu0 %v3111_v42 }
0x1b94   : > { %3128 = vmatpush.msra.mxu0 %v3110_v43 }
0x1b96   : > { %3129 = vmatpush.msra.mxu0 %v3109_v16  ;;  %v4679_v16 = vld [vmem:[%s5971_s21 + $0x10] ss:$0 sm:$0xff] }
0x1b97   : > { %4525 = vmatmul.msk.f32.vlgmr.msrb.gmra.mxu0 %vm896_vm3, %v2953_v46 }
0x1ba0   : > { %v2887_v48 = vpop.f32.mrf.mxu1 }
0x1ba1   : > { %v2890_v49 = vmul.f32 0.35355338, %v2887_v48  ;;  %v3108_v48 = vld [vmem:[%s5970_s20 + $0x18] sm:$0xff] }
0x1ba2   : > { %3130 = vmatpush.msra.mxu0 %v3108_v48 }
0x1ba3   : > { %v2891_v51 = vsel %vm896_vm3, %v2890_v49, -inf }
0x1ba4   : > { %2892 = vmax.xlane.f32.xlu2 %v2891_v51 }
0x1c04   : > { %v2786_v2 = vpop.xlane.xlu1 %2785 }
0x1c0c   : > { %v2859_v52 = vpop.f32.mrf.mxu0 }
0x1c14   : > { %v2977_v54 = vpop.f32.mrf.mxu0 }
0x1c15   : > { %v2980_v55 = vmul.f32 0.35355338, %v2977_v54 }
0x1c17   : > { %v2893_v56 = vpop.xlane.xlu2 %2892  ;;  %v2981_v53 = vsel %vm896_vm3, %v2980_v55, -inf }
0x1c18   : > { %v2894_v57 = vsub.f32 %v2890_v49, %v2893_v56  ;;  %2982 = vmax.xlane.f32.xlu0 %v2981_v53  ;;  %v4673_v53 = vld [vmem:[%s5971_s21 + $0xa] ss:$0 sm:$0xff] }
0x1c1a   : > { %v2895_v59 = vmul.f32 1.442695, %v2894_v57 }
0x1c1c   : > { %4770 = vpow2.f32 %v2895_v59 }
0x1c22   : > { %v4771_v61 = vpop.eup %4770 }
0x1c23   : > { %v2897_v62 = vsel %vm896_vm3, %v4771_v61, 0.0 }
0x1c24   : > { %2898 = vadd.xlane.f32.xlu2 %v2897_v62 }
0x1c2c   : > { %2790 = vrot.lane.b32.xlu0 %v5571_v47, %s6005_s6 }
0x1c3c   : > { %2902 = vrot.lane.b32.xlu2 %v5571_v47, %s6006_s27 }
0x1c8b   : > { %v2983_v63 = vpop.xlane.xlu0 %2982 }
0x1c8c   : > { %v2984_v1 = vsub.f32 %v2980_v55, %v2983_v63 }
0x1c8e   : > { %v2985_v0 = vmul.f32 1.442695, %v2984_v1  ;;  %v3107_v1 = vld [vmem:[%s5970_s20 + $0x10] sm:$0xff] }
0x1c8f   : > { %3131 = vmatpush.msra.mxu0 %v3107_v1 }
0x1c90   : > { %4772 = vpow2.f32 %v2985_v0  ;;  %v3106_v0 = vld [vmem:[%s5970_s20 + $0x8] sm:$0xff] }
0x1c91   : > { %4774 = vrcp.f32 %v2786_v2  ;;  %3132 = vmatpush.msra.mxu0 %v3106_v0  ;;  %v3105_v2 = vld [vmem:[%s5970_s20] sm:$0xff] }
0x1c93   : > { %3133 = vmatpush.msra.mxu0 %v3105_v2 }
0x1c96   : > { %v4773_v3 = vpop.eup %4772 }
0x1c97   : > { %v2899_v4 = vpop.xlane.xlu2 %2898  ;;  %v2987_v58 = vsel %vm896_vm3, %v4773_v3, 0.0  ;;  %v4775_v5 = vpop.eup %4774 }
0x1c98   : > { %2988 = vadd.xlane.f32.xlu1 %v2987_v58  ;;  %4776 = vrcp.f32 %v2899_v4  ;;  %v2788_v6 = vmul.f32 %v4775_v5, %v4769_v45 }
0x1c9e   : > { %v2791_v7 = vpop.permute.xlu0 %2790  ;;  %v4777_v9 = vpop.eup %4776 }
0x1c9f   : > { %2811 = vmatpush.msrb.mxu2 %v2791_v7  ;;  %v2903_v8 = vpop.permute.xlu2 %2902  ;;  %v2901_v10 = vmul.f32 %v4777_v9, %v4771_v61  ;;  %v4674_v61 = vld [vmem:[%s5971_s21 + $0xb] ss:$0 sm:$0xff] }
0x1ca0   : > { %4517 = vmatmul.msk.f32.vlgmr.msrb.gmra.mxu2 %vm896_vm3, %v2788_v6  ;;  %v4676_v6 = vld [vmem:[%s5971_s21 + $0xc] ss:$0 sm:$0xff] }
0x1ca1   : > { %2923 = vmatpush.msra.mxu2 %v2903_v8 }
0x1ca3   : > { %3036 = vmatpush.msrb.mxu2 %v2686_v21  ;;  %v3170_v21 = vld [vmem:[#allocation2 + $0x90] sm:$0xff] }
0x1ca8   : > { %4522 = vmatmul.msk.f32.vlgmr.msra.gmra.mxu2 %vm896_vm3, %v2901_v10 }
0x1cb1   : > { %2992 = vrot.lane.b32.xlu1 %v5571_v47, %s5998_s2 }
0x1d0b   : > { %v2989_v13 = vpop.xlane.xlu1 %2988 }
0x1d0c   : > { %4778 = vrcp.f32 %v2989_v13 }
0x1d12   : > { %v4779_v14 = vpop.eup %4778 }
0x1d13   : > { %v2991_v15 = vmul.f32 %v4779_v14, %v4773_v3  ;;  %v4675_v3 = vld [vmem:[%s5972_s22] ss:$0 sm:$0xff] }
0x1d23   : > { %v2993_v18 = vpop.permute.xlu1 %2992  ;;  %v2813_v19 = vpop.f32.mrf.mxu2 }
0x1d24   : > { %4518 = vmatmul.msk.f32.vlgmr.msrb.gmra.mxu3 %vm896_vm3, %v2813_v19  ;;  %3013 = vmatpush.msrb.mxu1 %v2993_v18  ;;  %v3171_v18 = vld [vmem:[#allocation2 + $0x98] sm:$0xff] }
0x1d25   : > { %4526 = vmatmul.msk.f32.vlgmr.msrb.gmra.mxu1 %vm896_vm3, %v2991_v15  ;;  %3096 = vmatpush.msrb.mxu3 %v3076_v39  ;;  %v3202_v19 = vld [vmem:[#allocation2 + $0xb8] sm:$0xff] }
0x1d26   : > { %3190 = vmatpush.msra.mxu1 %v3171_v18  ;;  %3217 = vmatpush.msra.mxu2 %v3202_v19  ;;  %v3680_v18 = vld [vmem:[#allocation4 + $0xb0] sm:$0xff] }
0x1d28   : > { %3191 = vmatpush.msra.mxu1 %v3170_v21  ;;  %v3679_v21 = vld [vmem:[#allocation4 + $0xa8] sm:$0xff] }
0x1d2b   : > { %v2925_v20 = vpop.f32.mrf.mxu2 }
0x1d2c   : > { %4523 = vmatmul.msk.f32.vlgmr.msra.gmra.mxu3 %vm896_vm3, %v2925_v20  ;;  %v3229_v20 = vld [vmem:[#allocation2 + $0xd8] sm:$0xff] }
0x1da2   : > { %v3015_v47 = vpop.f32.mrf.mxu1 }
0x1da3   : > { %4527 = vmatmul.msk.f32.vlgmr.msrb.gmra.mxu2 %vm896_vm3, %v3015_v47  ;;  %v3201_v47 = vld [vmem:[#allocation2 + $0xb0] sm:$0xff] }
0x1da4   : > { %3218 = vmatpush.msra.mxu2 %v3201_v47 }
0x1da7   : > { %v2836_v22 = vpop.f32.mrf.mxu3 }
0x1da8   : > { %v2860_v25 = vadd.f32 %v2859_v52, %v2836_v22  ;;  %v3228_v22 = vld [vmem:[#allocation2 + $0xd0] sm:$0xff] }
0x1daf   : > { %v2948_v23 = vpop.f32.mrf.mxu3 }
0x1db0   : > { %v2951_v26 = vadd.f32 %v2948_v23, %v2860_v25  ;;  %v3169_v23 = vld [vmem:[#allocation2 + $0x88] sm:$0xff] }
0x1db1   : > { %v3200_v25 = vld [vmem:[#allocation2 + $0xa8] sm:$0xff]  ;;  %3192 = vmatpush.msra.mxu1 %v3169_v23 }
0x1db2   : > { %3219 = vmatpush.msra.mxu2 %v3200_v25 }
0x1e26   : > { %v3038_v28 = vpop.f32.mrf.mxu2 }
0x1e27   : > { %v3041_v30 = vadd.f32 %v3038_v28, %v2951_v26  ;;  %v3227_v26 = vld [vmem:[#allocation2 + $0xc8] sm:$0xff]  ;;  %v3199_v28 = vld [vmem:[#allocation2 + $0xa0] sm:$0xff] }
0x1e28   : > { %3220 = vmatpush.msra.mxu2 %v3199_v28 }
0x1e29   : > { %v3043_v31 = vadd.f32 %v4672_v27, %v3041_v30  ;;  %v3168_v27 = vld [vmem:[#allocation2 + $0x80] sm:$0xff] }
0x1e2a   : > { %v3226_v30 = vld [vmem:[#allocation2 + $0xc0] sm:$0xff]  ;;  %3193 = vmatpush.msra.mxu1 %v3168_v27 }
0x1e2b   : > { %v3044_v32 = vadd.f32 %v3043_v31, %v5592_v17  ;;  %v3075_v17 = vld [vmem:[%s5969_s19 + $0x10] sm:$0xff] }
0x1e2c   : > { %3097 = vmatpush.msrb.mxu3 %v3075_v17  ;;  %v4677_v17 = vld [vmem:[%s5971_s21 + $0xd] ss:$0 sm:$0xff] }
0x1e2d   : > { %v3047_v33 = vsel %vm812_vm2, %v3044_v32, 0.0 }
0x1e2e   : > { %3048 = vadd.xlane.f32.xlu0 %v3047_v33  ;;  %3098 = vmatpush.msrb.mxu3 %v3074_v11 }
0x1e30   : > { %3099 = vmatpush.msrb.mxu3 %v3073_v29 }
0x1e32   : > { %3244 = vmatpush.msra.mxu3 %v3229_v20 }
0x1e34   : > { %3245 = vmatpush.msra.mxu3 %v3228_v22  ;;  %v3678_v22 = vld [vmem:[#allocation4 + $0xa0] sm:$0xff] }
0x1e36   : > { %3246 = vmatpush.msra.mxu3 %v3227_v26 }
0x1e38   : > { %3247 = vmatpush.msra.mxu3 %v3226_v30 }
0x1ea1   : > { %v3049_v34 = vpop.xlane.xlu0 %3048 }
0x1ea2   : > { %v3050_v35 = vmul.f32 %v3049_v34, %v5178_v41 }
0x1ea4   : > { %v3051_v36 = vsub.f32 %v3044_v32, %v3050_v35 }
0x1ea6   : > { %v3052_v37 = vmul.f32 %v3051_v36, %v3051_v36 }
0x1ea8   : > { %v3053_v38 = vsel %vm812_vm2, %v3052_v37, 0.0 }
0x1ea9   : > { %3054 = vadd.xlane.f32.xlu2 %v3053_v38 }
0x1f1c   : > { %v3055_v44 = vpop.xlane.xlu2 %3054 }
0x1f1d   : > { %v3056_v45 = vmul.f32 %v3055_v44, %v5178_v41  ;;  %v4680_v44 = vld [vmem:[%s5971_s21 + $0x11] ss:$0 sm:$0xff] }
0x1f1f   : > { %v3057_v46 = vadd.f32 1e-05, %v3056_v45  ;;  %v4681_v45 = vld [vmem:[%s5971_s21 + $0x12] ss:$0 sm:$0xff] }
0x1f21   : > { %4780 = vrsqrt.f32 %v3057_v46  ;;  %vm3064_vm4 = vweird.f32 %v3057_v46 }
0x1f27   : > { %v4781_v49 = vpop.eup %4780 }
0x1f28   : > { %v3059_v51 = vmul.f32 %v4781_v49, %v3057_v46  ;;  %vm3065_vm15 = vweird.f32 %v4781_v49 }
0x1f29   : > { %vm3066_vm5 = vmor %vm3064_vm4, %vm3065_vm15 }
0x1f2a   : > { %v3060_v52 = vmul.f32 %v4781_v49, %v3059_v51 }
0x1f2c   : > { %v3061_v54 = vmul.f32 0.5, %v3060_v52 }
0x1f2e   : > { %v3062_v55 = vsub.f32 1.5, %v3061_v54 }
0x1f30   : > { %v3063_v56 = vmul.f32 %v4781_v49, %v3062_v55 }
0x1f32   : > { %v3067_v57 = vsel %vm3066_vm5, %v4781_v49, %v3063_v56 }
0x1f33   : > { %v3068_v59 = vmul.f32 %v3067_v57, %v3051_v36 }
0x1f35   : > { %v3070_v62 = vmul.f32 %v4673_v53, %v3068_v59 }
0x1f37   : > { %v3072_v63 = vadd.f32 %v4674_v61, %v3070_v62 }
0x1f39   : > { %4528 = vmatmul.msk.f32.vlgmr.msrb.gmra.mxu3 %vm812_vm2, %v3072_v63 }
0x1fbc   : > { %v3101_v4 = vpop.f32.mrf.mxu3 }
0x1fbd   : > { %v3102_v58 = vadd.f32 %v4675_v3, %v3101_v4  ;;  %v3253_v4 = vld [vmem:[#allocation2 + $0xe0] sm:$0xff] }
0x1fbf   : > { %v3104_v5 = vmax.f32 %v3102_v58, 0.0 }
0x1fc1   : > { %4529 = vmatmul.msk.f32.vlgmr.msra.gmra.mxu0 %vm1331_vm8, %v3104_v5 }
0x203e   : > { %v3135_v7 = vpop.f32.mrf.mxu0 }
0x203f   : > { %v3136_v8 = vadd.f32 %v4676_v6, %v3135_v7 }
0x2041   : > { %v3138_v9 = vadd.f32 %v3136_v8, %v3072_v63 }
0x2043   : > { %v3141_v10 = vsel %vm812_vm2, %v3138_v9, 0.0 }
0x2044   : > { %3142 = vadd.xlane.f32.xlu1 %v3141_v10 }
0x20b7   : > { %v3143_v50 = vpop.xlane.xlu1 %3142 }
0x20b8   : > { %v3144_v12 = vmul.f32 %v3143_v50, %v5178_v41 }
0x20ba   : > { %v3145_v13 = vsub.f32 %v3138_v9, %v3144_v12 }
0x20bc   : > { %v3146_v14 = vmul.f32 %v3145_v13, %v3145_v13 }
0x20be   : > { %v3147_v15 = vsel %vm812_vm2, %v3146_v14, 0.0  ;;  %v3681_v14 = vld [vmem:[#allocation4 + $0xb8] sm:$0xff] }
0x20bf   : > { %3148 = vadd.xlane.f32.xlu0 %v3147_v15 }
0x2132   : > { %v3149_v31 = vpop.xlane.xlu0 %3148 }
0x2133   : > { %v3150_v32 = vmul.f32 %v3149_v31, %v5178_v41 }
0x2135   : > { %v3151_v33 = vadd.f32 1e-05, %v3150_v32 }
0x2137   : > { %4782 = vrsqrt.f32 %v3151_v33  ;;  %vm3158_vm7 = vweird.f32 %v3151_v33 }
0x213d   : > { %v4783_v34 = vpop.eup %4782 }
0x213e   : > { %v3153_v35 = vmul.f32 %v4783_v34, %v3151_v33  ;;  %vm3159_vm6 = vweird.f32 %v4783_v34 }
0x213f   : > { %vm3160_vm9 = vmor %vm3158_vm7, %vm3159_vm6 }
0x2140   : > { %v3154_v36 = vmul.f32 %v4783_v34, %v3153_v35 }
0x2142   : > { %v3155_v37 = vmul.f32 0.5, %v3154_v36 }
0x2144   : > { %v3156_v38 = vsub.f32 1.5, %v3155_v37 }
0x2146   : > { %v3157_v39 = vmul.f32 %v4783_v34, %v3156_v38 }
0x2148   : > { %v3161_v11 = vsel %vm3160_vm9, %v4783_v34, %v3157_v39 }
0x2149   : > { %v3162_v29 = vmul.f32 %v3161_v11, %v3145_v13 }
0x214b   : > { %v3164_v42 = vmul.f32 %v4677_v17, %v3162_v29 }
0x214d   : > { %v5702_v43 = vadd.f32 %v4678_v40, %v3164_v42 }
0x214f   : > { %4531 = vmatmul.msk.f32.vlgmr.msra.gmra.mxu1 %vm812_vm2, %v5702_v43  ;;  %4533 = vmatmul.msk.f32.vlgmr.msra.gmra.mxu2 %vm812_vm2, %v5702_v43 }
0x2150   : > { %4535 = vmatmul.msk.f32.vlgmr.msra.gmra.mxu3 %vm812_vm2, %v5702_v43 }
0x21cc   : > { %v3195_v48 = vpop.f32.mrf.mxu1 }
0x21cd   : > { %v3196_v54 = vadd.f32 %v4679_v16, %v3195_v48 }
0x21d2   : > { %v3222_v46 = vpop.f32.mrf.mxu2 }
0x21d3   : > { %v3223_v49 = vadd.f32 %v4680_v44, %v3222_v46  ;;  %v3249_v51 = vpop.f32.mrf.mxu3  ;;  %v3254_v44 = vld [vmem:[#allocation2 + $0xe8] sm:$0xff] }
0x21d4   : > { %v5719_v52 = vadd.f32 %v4681_v45, %v3249_v51 }
0x21d5   : > { %3322 = vrot.lane.b32.xlu1 %v3223_v49, %s6005_s6  ;;  %4537 = vmatpush.xpose.msk.msrb.mxu1 %vm896_vm3, %v3223_v49 }
0x21d6   : > { %3315 = vmatpush.msrb.mxu2 %v5719_v52 }
0x21d8   : > { %4538 = vmatmul.msk.f32.vlgmr.msrb.gmra.mxu1 %vm896_vm3, %v3196_v54  ;;  %3429 = vmatpush.msra.mxu2 %v3253_v4  ;;  %v3707_v4 = vld [vmem:[#allocation4 + $0xd0] sm:$0xff] }
0x21d9   : > { %3406 = vmatpush.msra.mxu1 %v3254_v44 }
0x21dd   : > { %3436 = vrot.lane.b32.xlu1 %v3223_v49, %s6006_s27 }
0x2247   : > { %v3323_v55 = vpop.permute.xlu1 %3322 }
0x2248   : > { %4540 = vmatpush.xpose.msk.msrb.mxu3 %vm896_vm3, %v3323_v55  ;;  %v4682_v55 = vld [vmem:[%s5971_s21 + $0x17] ss:$0 sm:$0xff] }
0x224f   : > { %v3437_v56 = vpop.permute.xlu1 %3436 }
0x2250   : > { %4545 = vmatpush.xpose.msk.msra.mxu3 %vm896_vm3, %v3437_v56 }
0x2255   : > { %v3281_v53 = vpop.f32.mrf.mxu1 }
0x2256   : > { %v3284_v57 = vmul.f32 0.35355338, %v3281_v53 }
0x2258   : > { %v3285_v59 = vsel %vm5507_vm11, %v3284_v57, -1e+30 }
0x2259   : > { %v3286_v61 = vsel %vm896_vm3, %v3285_v59, -inf }
0x225a   : > { %3287 = vmax.xlane.f32.xlu0 %v3286_v61 }
0x226e   : > { %3320 = vrot.lane.b32.xlu0 %v3196_v54, %s6005_s6 }
0x2276   : > { %3525 = vrot.lane.b32.xlu0 %v3196_v54, %s5998_s2 }
0x22cd   : > { %v3288_v62 = vpop.xlane.xlu0 %3287 }
0x22ce   : > { %v3289_v63 = vsub.f32 %v3285_v59, %v3288_v62  ;;  %v3256_v59 = vld [vmem:[#allocation2 + $0xf8] sm:$0xff]  ;;  %v3255_v62 = vld [vmem:[#allocation2 + $0xf0] sm:$0xff] }
0x22cf   : > { %3519 = vmatpush.msrb.mxu1 %v3255_v62 }
0x22d0   : > { %v3290_v1 = vmul.f32 1.442695, %v3289_v63 }
0x22d2   : > { %4784 = vpow2.f32 %v3290_v1 }
0x22d8   : > { %v4785_v0 = vpop.eup %4784 }
0x22d9   : > { %v3292_v2 = vsel %vm896_vm3, %v4785_v0, 0.0 }
0x22da   : > { %3293 = vadd.xlane.f32.xlu2 %v3292_v2 }
0x22e0   : > { %v3321_v3 = vpop.permute.xlu0 %3320 }
0x22e1   : > { %4541 = vmatmul.msk.f32.vlgmr.msrb.gmra.mxu3 %vm896_vm3, %v3321_v3  ;;  %v3708_v3 = vld [vmem:[#allocation4 + $0xd8] sm:$0xff] }
0x22e8   : > { %v3526_v13 = vpop.permute.xlu0 %3525 }
0x22f2   : > { %3527 = vrot.lane.b32.xlu2 %v3223_v49, %s5998_s2 }
0x22fa   : > { %3434 = vrot.lane.b32.xlu2 %v3196_v54, %s6006_s27 }
0x234d   : > { %v3294_v58 = vpop.xlane.xlu2 %3293 }
0x234e   : > { %4786 = vrcp.f32 %v3294_v58  ;;  %v3706_v58 = vld [vmem:[#allocation4 + $0xc8] sm:$0xff] }
0x2354   : > { %v4787_v5 = vpop.eup %4786 }
0x2355   : > { %v3296_v6 = vmul.f32 %v4787_v5, %v4785_v0  ;;  %v3528_v7 = vpop.permute.xlu2 %3527  ;;  %v3705_v5 = vld [vmem:[#allocation4 + $0xc0] sm:$0xff] }
0x2357   : > { %4539 = vmatmul.msk.f32.vlgmr.msrb.gmra.mxu2 %vm896_vm3, %v3296_v6  ;;  %v3651_v6 = vld [vmem:[#allocation4 + $0x98] sm:$0xff] }
0x2358   : > { %4549 = vmatpush.xpose.msk.msrb.mxu2 %vm896_vm3, %v3528_v7  ;;  %v3650_v7 = vld [vmem:[#allocation4 + $0x90] sm:$0xff] }
0x235d   : > { %v3435_v8 = vpop.permute.xlu2 %3434 }
0x235e   : > { %4546 = vmatmul.msk.f32.vlgmr.msra.gmra.mxu3 %vm896_vm3, %v3435_v8  ;;  %v3649_v8 = vld [vmem:[#allocation4 + $0x88] sm:$0xff] }
0x2364   : > { %v3345_v9 = vpop.f32.mrf.mxu3 }
0x2365   : > { %v3348_v10 = vmul.f32 0.35355338, %v3345_v9  ;;  %v3648_v9 = vld [vmem:[#allocation4 + $0x80] sm:$0xff] }
0x2367   : > { %v3349_v50 = vsel %vm5507_vm11, %v3348_v10, -1e+30 }
0x2368   : > { %v3350_v12 = vsel %vm896_vm3, %v3349_v50, -inf }
0x2369   : > { %3351 = vmax.xlane.f32.xlu0 %v3350_v12 }
0x23da   : > { %v3317_v15 = vpop.f32.mrf.mxu2 }
0x23db   : > { %4544 = vmatmul.msk.f32.vlgmr.msra.gmra.mxu2 %vm896_vm3, %v3317_v15 }
0x23dc   : > { %v3352_v19 = vpop.xlane.xlu0 %3351  ;;  %3696 = vmatpush.msra.mxu2 %v3681_v14 }
0x23dd   : > { %v3353_v20 = vsub.f32 %v3349_v50, %v3352_v19  ;;  %v4683_v50 = vld [vmem:[%s5971_s21 + $0x18] ss:$0 sm:$0xff]  ;;  %v4684_v19 = vld [vmem:[%s5971_s21 + $0x13] ss:$0 sm:$0xff] }
0x23de   : > { %3697 = vmatpush.msra.mxu2 %v3680_v18 }
0x23df   : > { %v3354_v47 = vmul.f32 1.442695, %v3353_v20 }
0x23e0   : > { %3698 = vmatpush.msra.mxu2 %v3679_v21 }
0x23e1   : > { %4788 = vpow2.f32 %v3354_v47  ;;  %v3459_v23 = vpop.f32.mrf.mxu3 }
0x23e2   : > { %v3462_v25 = vmul.f32 0.35355338, %v3459_v23  ;;  %3699 = vmatpush.msra.mxu2 %v3678_v22 }
0x23e3   : > { %4550 = vmatmul.msk.f32.vlgmr.msrb.gmra.mxu2 %vm896_vm3, %v3526_v13 }
0x23e4   : > { %v3463_v26 = vsel %vm5507_vm11, %v3462_v25, -1e+30 }
0x23e5   : > { %v3464_v27 = vsel %vm896_vm3, %v3463_v26, -inf }
0x23e6   : > { %3465 = vmax.xlane.f32.xlu2 %v3464_v27 }
0x23e7   : > { %v4789_v28 = vpop.eup %4788 }
0x23e8   : > { %v3356_v30 = vsel %vm896_vm3, %v4789_v28, 0.0 }
0x23e9   : > { %3357 = vadd.xlane.f32.xlu0 %v3356_v30 }
0x23eb   : > { %4558 = vmatmul.msk.f32.vlgmr.msra.gmra.mxu2 %vm812_vm2, %v5535_v60 }
0x23fd   : > { %3362 = vrot.lane.b32.xlu0 %v5719_v52, %s6005_s6 }
0x2459   : > { %v3466_v31 = vpop.xlane.xlu2 %3465 }
0x245a   : > { %v3467_v33 = vsub.f32 %v3463_v26, %v3466_v31 }
0x245c   : > { %v3358_v34 = vpop.xlane.xlu0 %3357  ;;  %v3468_v35 = vmul.f32 1.442695, %v3467_v33 }
0x245d   : > { %4790 = vrcp.f32 %v3358_v34 }
0x245e   : > { %v5753_v32 = vpop.f32.mrf.mxu2  ;;  %4792 = vpow2.f32 %v3468_v35 }
0x2463   : > { %v4791_v17 = vpop.eup %4790 }
0x2464   : > { %v4793_v11 = vpop.eup %4792  ;;  %v3360_v29 = vmul.f32 %v4791_v17, %v4789_v28  ;;  %v4685_v17 = vld [vmem:[%s5971_s21 + $0x14] ss:$0 sm:$0xff] }
0x2465   : > { %v3470_v42 = vsel %vm896_vm3, %v4793_v11, 0.0 }
0x2466   : > { %v3550_v36 = vpop.f32.mrf.mxu2 }
0x2467   : > { %v3553_v37 = vmul.f32 0.35355338, %v3550_v36 }
0x2469   : > { %v3554_v38 = vsel %vm5507_vm11, %v3553_v37, -1e+30 }
0x246a   : > { %v3555_v39 = vsel %vm896_vm3, %v3554_v38, -inf }
0x246b   : > { %3556 = vmax.xlane.f32.xlu1 %v3555_v39 }
0x246e   : > { %v3701_v56 = vpop.f32.mrf.mxu2 }
0x246f   : > { %v3363_v40 = vpop.permute.xlu0 %3362  ;;  %v5767_v61 = vadd.f32 %v4682_v55, %v3701_v56 }
0x2470   : > { %3383 = vmatpush.msrb.mxu0 %v3363_v40  ;;  %v4686_v40 = vld [vmem:[%s5971_s21 + $0x15] ss:$0 sm:$0xff] }
0x2471   : > { %4542 = vmatmul.msk.f32.vlgmr.msrb.gmra.mxu0 %vm896_vm3, %v3360_v29 }
0x2473   : > { %3471 = vadd.xlane.f32.xlu1 %v3470_v42 }
0x248c   : > { %3475 = vrot.lane.b32.xlu1 %v5719_v52, %s6006_s27 }
0x24de   : > { %v3557_v24 = vpop.xlane.xlu1 %3556 }
0x24df   : > { %v3558_v45 = vsub.f32 %v3554_v38, %v3557_v24  ;;  %v4687_v24 = vld [vmem:[%s5971_s21 + $0x16] ss:$0 sm:$0xff] }
0x24e1   : > { %v3559_v16 = vmul.f32 1.442695, %v3558_v45 }
0x24e3   : > { %4794 = vpow2.f32 %v3559_v16 }
0x24e6   : > { %v3472_v51 = vpop.xlane.xlu1 %3471 }
0x24e7   : > { %4796 = vrcp.f32 %v3472_v51 }
0x24e9   : > { %v4795_v46 = vpop.eup %4794 }
0x24ea   : > { %v3561_v48 = vsel %vm896_vm3, %v4795_v46, 0.0 }
0x24eb   : > { %3562 = vadd.xlane.f32.xlu2 %v3561_v48 }
0x24ed   : > { %v4797_v54 = vpop.eup %4796 }
0x24ee   : > { %v3385_v49 = vpop.f32.mrf.mxu0  ;;  %v3474_v53 = vmul.f32 %v4797_v54, %v4793_v11 }
0x24ef   : > { %4543 = vmatmul.msk.f32.vlgmr.msra.gmra.mxu1 %vm896_vm3, %v3385_v49 }
0x24f0   : > { %3669 = vmatpush.msra.mxu1 %v3651_v6 }
0x24f2   : > { %3670 = vmatpush.msra.mxu1 %v3650_v7 }
0x24f4   : > { %3671 = vmatpush.msra.mxu1 %v3649_v8 }
0x24f6   : > { %3672 = vmatpush.msra.mxu1 %v3648_v9 }
0x24fe   : > { %v3476_v57 = vpop.permute.xlu1 %3475 }
0x24ff   : > { %3496 = vmatpush.msra.mxu0 %v3476_v57 }
0x2500   : > { %4547 = vmatmul.msk.f32.vlgmr.msra.gmra.mxu0 %vm896_vm3, %v3474_v53 }
0x2501   : > { %3610 = vmatpush.msrb.mxu0 %v3256_v59  ;;  %v3732_v59 = vld [vmem:[#allocation4 + $0xe0] sm:$0xff] }
0x2503   : > { %4562 = vmatpush.xpose.msk.msra.mxu0 %vm896_vm3, %v5767_v61  ;;  %3566 = vrot.lane.b32.xlu2 %v5719_v52, %s5998_s2 }
0x255e   : > { %v3563_v63 = vpop.xlane.xlu2 %3562 }
0x255f   : > { %4798 = vrcp.f32 %v3563_v63 }
0x2565   : > { %v4799_v1 = vpop.eup %4798 }
0x2566   : > { %v3565_v0 = vmul.f32 %v4799_v1, %v4795_v46  ;;  %v3567_v2 = vpop.permute.xlu2 %3566 }
0x2567   : > { %3587 = vmatpush.msrb.mxu3 %v3567_v2 }
0x2568   : > { %4551 = vmatmul.msk.f32.vlgmr.msrb.gmra.mxu3 %vm896_vm3, %v3565_v0 }
0x2569   : > { %3723 = vmatpush.msra.mxu3 %v3708_v3 }
0x256b   : > { %3724 = vmatpush.msra.mxu3 %v3707_v4 }
0x256c   : > { %v3408_v13 = vpop.f32.mrf.mxu1 }
0x256d   : > { %3725 = vmatpush.msra.mxu3 %v3706_v58  ;;  %v3432_v15 = vadd.f32 %v5753_v32, %v3408_v13 }
0x256f   : > { %3726 = vmatpush.msra.mxu3 %v3705_v5 }
0x2570   : > { %4560 = vmatmul.msk.f32.vlgmr.msra.gmra.mxu3 %vm812_vm2, %v5535_v60 }
0x257d   : > { %v3498_v52 = vpop.f32.mrf.mxu0 }
0x257e   : > { %4548 = vmatmul.msk.f32.vlgmr.msrb.gmra.mxu1 %vm896_vm3, %v3498_v52 }
0x25eb   : > { %v3589_v10 = vpop.f32.mrf.mxu3 }
0x25ec   : > { %4552 = vmatmul.msk.f32.vlgmr.msrb.gmra.mxu0 %vm896_vm3, %v3589_v10 }
0x25f3   : > { %v3728_v12 = vpop.f32.mrf.mxu3 }
0x25f4   : > { %v5782_v60 = vadd.f32 %v4683_v50, %v3728_v12 }
0x25f6   : > { %3793 = vmatpush.msrb.mxu1 %v5782_v60 }
0x25fb   : > { %v3521_v14 = vpop.f32.mrf.mxu1 }
0x25fc   : > { %v3524_v18 = vadd.f32 %v3521_v14, %v3432_v15 }
0x2669   : > { %v3612_v20 = vpop.f32.mrf.mxu0 }
0x266a   : > { %v3615_v21 = vadd.f32 %v3612_v20, %v3524_v18 }
0x266c   : > { %v3617_v47 = vadd.f32 %v4684_v19, %v3615_v21 }
0x266e   : > { %v3618_v22 = vadd.f32 %v3617_v47, %v5702_v43 }
0x2670   : > { %v3621_v23 = vsel %vm812_vm2, %v3618_v22, 0.0 }
0x2671   : > { %3622 = vadd.xlane.f32.xlu0 %v3621_v23 }
0x26e4   : > { %v3623_v25 = vpop.xlane.xlu0 %3622 }
0x26e5   : > { %v3624_v26 = vmul.f32 %v3623_v25, %v5178_v41 }
0x26e7   : > { %v3625_v27 = vsub.f32 %v3618_v22, %v3624_v26 }
0x26e9   : > { %v3626_v28 = vmul.f32 %v3625_v27, %v3625_v27 }
0x26eb   : > { %v3627_v30 = vsel %vm812_vm2, %v3626_v28, 0.0 }
0x26ec   : > { %3628 = vadd.xlane.f32.xlu2 %v3627_v30 }
0x2704   : > { %3800 = vrot.lane.b32.xlu2 %v5767_v61, %s6005_s6 }
0x275f   : > { %v3629_v31 = vpop.xlane.xlu2 %3628 }
0x2760   : > { %v3630_v32 = vmul.f32 %v3629_v31, %v5178_v41 }
0x2762   : > { %v3631_v33 = vadd.f32 1e-05, %v3630_v32 }
0x2764   : > { %4800 = vrsqrt.f32 %v3631_v33  ;;  %vm3638_vm10 = vweird.f32 %v3631_v33 }
0x2767   : > { %v3801_v43 = vpop.permute.xlu2 %3800 }
0x2768   : > { %4565 = vmatpush.xpose.msk.msrb.mxu2 %vm896_vm3, %v3801_v43 }
0x276a   : > { %v4801_v34 = vpop.eup %4800 }
0x276b   : > { %v3633_v35 = vmul.f32 %v4801_v34, %v3631_v33  ;;  %vm3639_vm0 = vweird.f32 %v4801_v34 }
0x276c   : > { %vm3640_vm11 = vmor %vm3638_vm10, %vm3639_vm0 }
0x276d   : > { %v3634_v36 = vmul.f32 %v4801_v34, %v3633_v35 }
0x276f   : > { %v3635_v37 = vmul.f32 0.5, %v3634_v36 }
0x2771   : > { %v3636_v38 = vsub.f32 1.5, %v3635_v37 }
0x2773   : > { %v3637_v39 = vmul.f32 %v4801_v34, %v3636_v38 }
0x2775   : > { %v3641_v11 = vsel %vm3640_vm11, %v4801_v34, %v3637_v39  ;;  %v3733_v39 = vld [vmem:[#allocation4 + $0xe8] sm:$0xff] }
0x2776   : > { %v3642_v29 = vmul.f32 %v3641_v11, %v3625_v27  ;;  %3883 = vmatpush.msrb.mxu0 %v3733_v39 }
0x2778   : > { %v3644_v42 = vmul.f32 %v4685_v17, %v3642_v29 }
0x277a   : > { %v5803_v44 = vadd.f32 %v4686_v40, %v3644_v42  ;;  %v3734_v40 = vld [vmem:[#allocation4 + $0xf0] sm:$0xff] }
0x277c   : > { %4556 = vmatmul.msk.f32.vlgmr.msra.gmra.mxu1 %vm812_vm2, %v5803_v44 }
0x277d   : > { %3906 = vmatpush.msra.mxu1 %v3732_v59 }
0x27f9   : > { %v3674_v45 = vpop.f32.mrf.mxu1 }
0x27fa   : > { %v3675_v16 = vadd.f32 %v4687_v24, %v3674_v45  ;;  %v3735_v24 = vld [vmem:[#allocation4 + $0xf8] sm:$0xff] }
0x27fc   : > { %3911 = vrot.lane.b32.xlu2 %v3675_v16, %s6006_s27  ;;  %4563 = vmatmul.msk.f32.vlgmr.msra.gmra.mxu0 %vm896_vm3, %v3675_v16 }
0x27fd   : > { %3995 = vmatpush.msra.mxu0 %v3734_v40 }
0x2856   : > { %v3912_v2 = vpop.permute.xlu2 %3911 }
0x2879   : > { %v3760_v46 = vpop.f32.mrf.mxu0 }
0x287a   : > { %v3763_v48 = vmul.f32 0.35355338, %v3760_v46 }
0x287c   : > { %v3764_v49 = vsel %vm896_vm3, %v3763_v48, -inf }
0x287d   : > { %3765 = vmax.xlane.f32.xlu1 %v3764_v49 }
0x2896   : > { %3913 = vrot.lane.b32.xlu1 %v5767_v61, %s6006_s27 }
0x289e   : > { %4001 = vrot.lane.b32.xlu1 %v3675_v16, %s5998_s2 }
0x28f0   : > { %v3766_v51 = vpop.xlane.xlu1 %3765 }
0x28f1   : > { %v3767_v54 = vsub.f32 %v3763_v48, %v3766_v51  ;;  %v4688_v51 = vld [vmem:[%s5971_s21 + $0x19] ss:$0 sm:$0xff] }
0x28f3   : > { %v3768_v55 = vmul.f32 1.442695, %v3767_v54 }
0x28f5   : > { %4802 = vpow2.f32 %v3768_v55 }
0x28fb   : > { %v4803_v56 = vpop.eup %4802 }
0x28fc   : > { %v3770_v53 = vsel %vm896_vm3, %v4803_v56, 0.0 }
0x28fd   : > { %3771 = vadd.xlane.f32.xlu0 %v3770_v53 }
0x2908   : > { %v3914_v57 = vpop.permute.xlu1 %3913 }
0x2909   : > { %4570 = vmatpush.xpose.msk.msra.mxu2 %vm896_vm3, %v3914_v57 }
0x2911   : > { %3798 = vrot.lane.b32.xlu0 %v3675_v16, %s6005_s6 }
0x2919   : > { %4003 = vrot.lane.b32.xlu0 %v5767_v61, %s5998_s2  ;;  %v4002_v61 = vpop.permute.xlu1 %4001 }
0x2970   : > { %v3772_v62 = vpop.xlane.xlu0 %3771 }
0x2971   : > { %4804 = vrcp.f32 %v3772_v62 }
0x2977   : > { %v4805_v63 = vpop.eup %4804 }
0x2978   : > { %v3774_v1 = vmul.f32 %v4805_v63, %v4803_v56 }
0x297a   : > { %4564 = vmatmul.msk.f32.vlgmr.msrb.gmra.mxu1 %vm896_vm3, %v3774_v1 }
0x2983   : > { %v3799_v0 = vpop.permute.xlu0 %3798 }
0x2984   : > { %4566 = vmatmul.msk.f32.vlgmr.msrb.gmra.mxu2 %vm896_vm3, %v3799_v0 }
0x298b   : > { %v4004_v3 = vpop.permute.xlu0 %4003 }
0x298c   : > { %4571 = vmatmul.msk.f32.vlgmr.msra.gmra.mxu2 %vm896_vm3, %v3912_v2  ;;  %4574 = vmatpush.xpose.msk.msrb.mxu1 %vm896_vm3, %v4004_v3  ;;  %v4583_v2 = vld [vmem:[%s5969_s19 + $0x38] sm:$0xff]  ;;  %v4581_v3 = vld [vmem:[%s5969_s19 + $0x28] sm:$0xff] }
0x29f7   : > { %v3795_v4 = vpop.f32.mrf.mxu1 }
0x29f8   : > { %4569 = vmatmul.msk.f32.vlgmr.msra.gmra.mxu1 %vm896_vm3, %v3795_v4  ;;  %v4580_v4 = vld [vmem:[%s5969_s19 + $0x20] sm:$0xff] }
0x2a00   : > { %4575 = vmatmul.msk.f32.vlgmr.msrb.gmra.mxu1 %vm896_vm3, %v4002_v61  ;;  %v4593_v61 = vld [vmem:[%s5970_s20 + $0x78] sm:$0xff] }
0x2a01   : > { %4178 = vmatpush.msra.mxu1 %v4593_v61 }
0x2a07   : > { %v3823_v58 = vpop.f32.mrf.mxu2 }
0x2a08   : > { %v3826_v5 = vmul.f32 0.35355338, %v3823_v58  ;;  %v4592_v58 = vld [vmem:[%s5970_s20 + $0x70] sm:$0xff] }
0x2a09   : > { %4179 = vmatpush.msra.mxu1 %v4592_v58 }
0x2a0a   : > { %v3827_v52 = vsel %vm896_vm3, %v3826_v5, -inf }
0x2a0b   : > { %3828 = vmax.xlane.f32.xlu0 %v3827_v52 }
0x2a0f   : > { %v3936_v6 = vpop.f32.mrf.mxu2 }
0x2a10   : > { %v3939_v7 = vmul.f32 0.35355338, %v3936_v6 }
0x2a12   : > { %v3940_v8 = vsel %vm896_vm3, %v3939_v7, -inf }
0x2a13   : > { %3941 = vmax.xlane.f32.xlu1 %v3940_v8 }
0x2a75   : > { %v5829_v9 = vpop.f32.mrf.mxu1 }
0x2a7d   : > { %v4026_v10 = vpop.f32.mrf.mxu1 }
0x2a7e   : > { %v4029_v50 = vmul.f32 0.35355338, %v4026_v10  ;;  %v3829_v12 = vpop.xlane.xlu0 %3828 }
0x2a7f   : > { %v3830_v13 = vsub.f32 %v3826_v5, %v3829_v12  ;;  %v4591_v5 = vld [vmem:[%s5970_s20 + $0x68] sm:$0xff] }
0x2a80   : > { %v4030_v14 = vsel %vm896_vm3, %v4029_v50, -inf  ;;  %4180 = vmatpush.msra.mxu1 %v4591_v5 }
0x2a81   : > { %v3831_v15 = vmul.f32 1.442695, %v3830_v13  ;;  %4031 = vmax.xlane.f32.xlu2 %v4030_v14 }
0x2a83   : > { %4806 = vpow2.f32 %v3831_v15 }
0x2a86   : > { %v3942_v18 = vpop.xlane.xlu1 %3941 }
0x2a87   : > { %v3943_v19 = vsub.f32 %v3939_v7, %v3942_v18  ;;  %v4590_v7 = vld [vmem:[%s5970_s20 + $0x60] sm:$0xff]  ;;  %v4689_v18 = vld [vmem:[%s5971_s21 + $0x1a] ss:$0 sm:$0xff] }
0x2a88   : > { %4181 = vmatpush.msra.mxu1 %v4590_v7 }
0x2a89   : > { %v4807_v20 = vpop.eup %4806  ;;  %v3944_v21 = vmul.f32 1.442695, %v3943_v19 }
0x2a8a   : > { %v3833_v47 = vsel %vm896_vm3, %v4807_v20, 0.0 }
0x2a8b   : > { %4808 = vpow2.f32 %v3944_v21  ;;  %3834 = vadd.xlane.f32.xlu0 %v3833_v47 }
0x2a91   : > { %v4809_v22 = vpop.eup %4808 }
0x2a92   : > { %v3946_v23 = vsel %vm896_vm3, %v4809_v22, 0.0 }
0x2a93   : > { %3947 = vadd.xlane.f32.xlu1 %v3946_v23  ;;  %v4588_v23 = vld [vmem:[%s5970_s20 + $0x50] sm:$0xff] }
0x2a9f   : > { %3839 = vrot.lane.b32.xlu0 %v5782_v60, %s6005_s6 }
0x2aac   : > { %3951 = vrot.lane.b32.xlu1 %v5782_v60, %s6006_s27 }
0x2af4   : > { %v4032_v25 = vpop.xlane.xlu2 %4031 }
0x2af5   : > { %v4033_v26 = vsub.f32 %v4029_v50, %v4032_v25  ;;  %v4587_v25 = vld [vmem:[%s5970_s20 + $0x48] sm:$0xff] }
0x2af7   : > { %v4034_v27 = vmul.f32 1.442695, %v4033_v26  ;;  %v4586_v26 = vld [vmem:[%s5970_s20 + $0x40] sm:$0xff] }
0x2af9   : > { %4810 = vpow2.f32 %v4034_v27  ;;  %v4691_v27 = vld [vmem:[%s5972_s22 + $0x1] ss:$0 sm:$0xff] }
0x2afe   : > { %v3835_v31 = vpop.xlane.xlu0 %3834 }
0x2aff   : > { %v4811_v28 = vpop.eup %4810  ;;  %4812 = vrcp.f32 %v3835_v31 }
0x2b00   : > { %v4036_v30 = vsel %vm896_vm3, %v4811_v28, 0.0 }
0x2b01   : > { %4037 = vadd.xlane.f32.xlu2 %v4036_v30 }
0x2b05   : > { %v4813_v32 = vpop.eup %4812 }
0x2b06   : > { %v3837_v33 = vmul.f32 %v4813_v32, %v4807_v20  ;;  %v3948_v34 = vpop.xlane.xlu1 %3947  ;;  %v4690_v20 = vld [vmem:[%s5971_s21 + $0x1b] ss:$0 sm:$0xff]  ;;  %v4692_v32 = vld [vmem:[%s5971_s21 + $0x1c] ss:$0 sm:$0xff] }
0x2b07   : > { %4814 = vrcp.f32 %v3948_v34 }
0x2b0d   : > { %v4815_v35 = vpop.eup %4814 }
0x2b0e   : > { %v3950_v36 = vmul.f32 %v4815_v35, %v4809_v22 }
0x2b11   : > { %v3840_v43 = vpop.permute.xlu0 %3839 }
0x2b12   : > { %3860 = vmatpush.msrb.mxu3 %v3840_v43 }
0x2b13   : > { %4567 = vmatmul.msk.f32.vlgmr.msrb.gmra.mxu3 %vm896_vm3, %v3837_v33 }
0x2b19   : > { %4041 = vrot.lane.b32.xlu2 %v5782_v60, %s5998_s2  ;;  %s6009_s2 = sld [smem:[#allocation14_spill]] }
0x2b1e   : > { %v3952_v37 = vpop.permute.xlu1 %3951 }
0x2b1f   : > { %3972 = vmatpush.msra.mxu3 %v3952_v37 }
0x2b20   : > { %4572 = vmatmul.msk.f32.vlgmr.msra.gmra.mxu3 %vm896_vm3, %v3950_v36 }
0x2b21   : > { %4085 = vmatpush.msrb.mxu3 %v3735_v24 }
0x2b74   : > { %v4038_v38 = vpop.xlane.xlu2 %4037 }
0x2b75   : > { %4816 = vrcp.f32 %v4038_v38 }
0x2b7b   : > { %v4817_v17 = vpop.eup %4816 }
0x2b7c   : > { %v4040_v11 = vmul.f32 %v4817_v17, %v4811_v28  ;;  %v4042_v29 = vpop.permute.xlu2 %4041 }
0x2b7d   : > { %4062 = vmatpush.msrb.mxu2 %v4042_v29 }
0x2b7e   : > { %4576 = vmatmul.msk.f32.vlgmr.msrb.gmra.mxu2 %vm896_vm3, %v4040_v11 }
0x2b96   : > { %v3862_v42 = vpop.f32.mrf.mxu3 }
0x2b97   : > { %4568 = vmatmul.msk.f32.vlgmr.msrb.gmra.mxu0 %vm896_vm3, %v3862_v42 }
0x2b98   : > { %4147 = vmatpush.msrb.mxu0 %v4583_v2  ;;  %v4249_v2 = vld [vmem:[%s5961_s11 + $0x10] sm:$0xff] }
0x2ba3   : > { %v3974_v60 = vpop.f32.mrf.mxu3 }
0x2ba4   : > { %4573 = vmatmul.msk.f32.vlgmr.msra.gmra.mxu0 %vm896_vm3, %v3974_v60 }
0x2c01   : > { %v4064_v45 = vpop.f32.mrf.mxu2 }
0x2c02   : > { %4577 = vmatmul.msk.f32.vlgmr.msrb.gmra.mxu3 %vm896_vm3, %v4064_v45 }
0x2c14   : > { %v3885_v16 = vpop.f32.mrf.mxu0 }
0x2c15   : > { %v3909_v48 = vadd.f32 %v5829_v9, %v3885_v16  ;;  %v4589_v9 = vld [vmem:[%s5970_s20 + $0x58] sm:$0xff] }
0x2c16   : > { %4182 = vmatpush.msra.mxu1 %v4589_v9 }
0x2c18   : > { %4183 = vmatpush.msra.mxu1 %v4588_v23 }
0x2c1a   : > { %4184 = vmatpush.msra.mxu1 %v4587_v25 }
0x2c1c   : > { %4185 = vmatpush.msra.mxu1 %v4586_v26 }
0x2c21   : > { %v3997_v46 = vpop.f32.mrf.mxu0 }
0x2c22   : > { %v4000_v49 = vadd.f32 %v3997_v46, %v3909_v48  ;;  %v4693_v48 = vld [vmem:[%s5971_s21 + $0x1d] ss:$0 sm:$0xff] }
0x2c85   : > { %v4087_v54 = vpop.f32.mrf.mxu3 }
0x2c86   : > { %v4090_v55 = vadd.f32 %v4087_v54, %v4000_v49  ;;  %v4694_v54 = vld [vmem:[%s5971_s21 + $0x1e] ss:$0 sm:$0xff] }
0x2c88   : > { %v4092_v56 = vadd.f32 %v4688_v51, %v4090_v55 }
0x2c8a   : > { %v4093_v53 = vadd.f32 %v4092_v56, %v5803_v44  ;;  %v4582_v44 = vld [vmem:[%s5969_s19 + $0x30] sm:$0xff] }
0x2c8b   : > { %4148 = vmatpush.msrb.mxu0 %v4582_v44  ;;  %v4248_v44 = vld [vmem:[%s5961_s11 + $0x8] sm:$0xff] }
0x2c8c   : > { %v4096_v57 = vsel %vm812_vm2, %v4093_v53, 0.0 }
0x2c8d   : > { %4097 = vadd.xlane.f32.xlu0 %v4096_v57  ;;  %4149 = vmatpush.msrb.mxu0 %v4581_v3  ;;  %v4247_v3 = vld [vmem:[%s5961_s11] sm:$0xff] }
0x2c8f   : > { %4150 = vmatpush.msrb.mxu0 %v4580_v4 }
0x2d00   : > { %v4098_v59 = vpop.xlane.xlu0 %4097 }
0x2d01   : > { %v4099_v62 = vmul.f32 %v4098_v59, %v5178_v41 }
0x2d03   : > { %v4100_v63 = vsub.f32 %v4093_v53, %v4099_v62 }
0x2d05   : > { %v4101_v1 = vmul.f32 %v4100_v63, %v4100_v63 }
0x2d07   : > { %v4102_v0 = vsel %vm812_vm2, %v4101_v1, 0.0 }
0x2d08   : > { %4103 = vadd.xlane.f32.xlu2 %v4102_v0  ;;  %v4250_v0 = vld [vmem:[%s5961_s11 + $0x18] sm:$0xff] }
0x2d09   : > { %4270 = vmatpush.msra.mxu2 %v4250_v0 }
0x2d0b   : > { %4271 = vmatpush.msra.mxu2 %v4249_v2 }
0x2d0d   : > { %4272 = vmatpush.msra.mxu2 %v4248_v44 }
0x2d0f   : > { %4273 = vmatpush.msra.mxu2 %v4247_v3 }
0x2d7b   : > { %v4104_v52 = vpop.xlane.xlu2 %4103 }
0x2d7c   : > { %v4105_v6 = vmul.f32 %v4104_v52, %v5178_v41 }
0x2d7e   : > { %v4106_v8 = vadd.f32 1e-05, %v4105_v6 }
0x2d80   : > { %4818 = vrsqrt.f32 %v4106_v8  ;;  %vm4113_vm12 = vweird.f32 %v4106_v8 }
0x2d86   : > { %v4819_v10 = vpop.eup %4818 }
0x2d87   : > { %v4108_v50 = vmul.f32 %v4819_v10, %v4106_v8  ;;  %vm4114_vm3 = vweird.f32 %v4819_v10 }
0x2d88   : > { %vm4115_vm13 = vmor %vm4113_vm12, %vm4114_vm3 }
0x2d89   : > { %v4109_v12 = vmul.f32 %v4819_v10, %v4108_v50 }
0x2d8b   : > { %v4110_v13 = vmul.f32 0.5, %v4109_v12 }
0x2d8d   : > { %v4111_v14 = vsub.f32 1.5, %v4110_v13 }
0x2d8f   : > { %v4112_v15 = vmul.f32 %v4819_v10, %v4111_v14 }
0x2d91   : > { %v4116_v19 = vsel %vm4115_vm13, %v4819_v10, %v4112_v15  ;;  %v4695_v10 = vld [vmem:[%s5997_s7 + $0x5] ss:$0 sm:$0xff]  ;;  %v4697_v15 = vld [vmem:[%s6009_s2] ss:$0 sm:$0xff] }
0x2d92   : > { %v4117_v21 = vmul.f32 %v4116_v19, %v4100_v63 }
0x2d94   : > { %v4119_v47 = vmul.f32 %v4689_v18, %v4117_v21 }
0x2d96   : > { %v4121_v22 = vadd.f32 %v4690_v20, %v4119_v47 }
0x2d98   : > { %4585 = vmatmul.msk.f32.vlgmr.msrb.gmra.mxu0 %vm812_vm2, %v4121_v22 }
0x2e15   : > { %v4152_v28 = vpop.f32.mrf.mxu0 }
0x2e16   : > { %v4153_v30 = vadd.f32 %v4691_v27, %v4152_v28 }
0x2e18   : > { %v4155_v31 = vmax.f32 %v4153_v30, 0.0 }
0x2e1a   : > { %4595 = vmatmul.msk.f32.vlgmr.msra.gmra.mxu1 %vm1331_vm8, %v4155_v31 }
0x2e97   : > { %v4187_v33 = vpop.f32.mrf.mxu1 }
0x2e98   : > { %v4188_v43 = vadd.f32 %v4692_v32, %v4187_v33 }
0x2e9a   : > { %v4190_v34 = vadd.f32 %v4188_v43, %v4121_v22 }
0x2e9c   : > { %v4193_v35 = vsel %vm812_vm2, %v4190_v34, 0.0 }
0x2e9d   : > { %4194 = vadd.xlane.f32.xlu1 %v4193_v35 }
0x2f10   : > { %v4195_v36 = vpop.xlane.xlu1 %4194 }
0x2f11   : > { %v4196_v37 = vmul.f32 %v4195_v36, %v5178_v41 }
0x2f13   : > { %v4197_v38 = vsub.f32 %v4190_v34, %v4196_v37 }
0x2f15   : > { %v4198_v39 = vmul.f32 %v4197_v38, %v4197_v38 }
0x2f17   : > { %v4199_v17 = vsel %vm812_vm2, %v4198_v39, 0.0 }
0x2f18   : > { %4200 = vadd.xlane.f32.xlu0 %v4199_v17 }
0x2f8b   : > { %v4201_v11 = vpop.xlane.xlu0 %4200 }
0x2f8c   : > { %v4202_v29 = vmul.f32 %v4201_v11, %v5178_v41 }
0x2f8e   : > { %v4203_v40 = vadd.f32 1e-05, %v4202_v29 }
0x2f90   : > { %4820 = vrsqrt.f32 %v4203_v40  ;;  %vm4210_vm14 = vweird.f32 %v4203_v40 }
0x2f96   : > { %v4821_v42 = vpop.eup %4820 }
0x2f97   : > { %v4205_v60 = vmul.f32 %v4821_v42, %v4203_v40  ;;  %vm4211_vm8 = vweird.f32 %v4821_v42 }
0x2f98   : > { %vm4212_vm15 = vmor %vm4210_vm14, %vm4211_vm8 }
0x2f99   : > { %v4206_v24 = vmul.f32 %v4821_v42, %v4205_v60 }
0x2f9b   : > { %v4207_v45 = vmul.f32 0.5, %v4206_v24 }
0x2f9d   : > { %v4208_v16 = vsub.f32 1.5, %v4207_v45 }
0x2f9f   : > { %v4209_v46 = vmul.f32 %v4821_v42, %v4208_v16 }
0x2fa1   : > { %v4213_v49 = vsel %vm4212_vm15, %v4821_v42, %v4209_v46 }
0x2fa2   : > { %v4214_v51 = vmul.f32 %v4213_v49, %v4197_v38 }
0x2fa4   : > { %v4216_v55 = vmul.f32 %v4693_v48, %v4214_v51 }
0x2fa6   : > { %v4218_v56 = vadd.f32 %v4694_v54, %v4216_v55 }
0x2fa8   : > { %v4221_v53 = vsel %vm812_vm2, %v4218_v56, 0.0 }
0x2fa9   : > { %4222 = vadd.xlane.f32.xlu2 %v4221_v53 }
0x301c   : > { %v4223_v57 = vpop.xlane.xlu2 %4222 }
0x301d   : > { %v4224_v59 = vmul.f32 %v4223_v57, %v5178_v41 }
0x301f   : > { %v4225_v62 = vsub.f32 %v4218_v56, %v4224_v59 }
0x3021   : > { %v4226_v63 = vmul.f32 %v4225_v62, %v4225_v62 }
0x3023   : > { %v4227_v1 = vsel %vm812_vm2, %v4226_v63, 0.0 }
0x3024   : > { %4228 = vadd.xlane.f32.xlu0 %v4227_v1 }
0x3097   : > { %v4229_v4 = vpop.xlane.xlu0 %4228 }
0x3098   : > { %v4230_v61 = vmul.f32 %v4229_v4, %v5178_v41  ;;  %v4696_v41 = vld [vmem:[%s5997_s7 + $0x6] ss:$0 sm:$0xff] }
0x309a   : > { %v4231_v58 = vadd.f32 1e-05, %v4230_v61 }
0x309c   : > { %4822 = vrsqrt.f32 %v4231_v58  ;;  %vm4238_vm5 = vweird.f32 %v4231_v58 }
0x30a2   : > { %v4823_v5 = vpop.eup %4822 }
0x30a3   : > { %v4233_v52 = vmul.f32 %v4823_v5, %v4231_v58  ;;  %vm4239_vm4 = vweird.f32 %v4823_v5 }
0x30a4   : > { %vm4240_vm6 = vmor %vm4238_vm5, %vm4239_vm4 }
0x30a5   : > { %v4234_v6 = vmul.f32 %v4823_v5, %v4233_v52 }
0x30a7   : > { %v4235_v7 = vmul.f32 0.5, %v4234_v6 }
0x30a9   : > { %v4236_v8 = vsub.f32 1.5, %v4235_v7 }
0x30ab   : > { %v4237_v9 = vmul.f32 %v4823_v5, %v4236_v8 }
0x30ad   : > { %v4241_v50 = vsel %vm4240_vm6, %v4823_v5, %v4237_v9 }
0x30ae   : > { %v4242_v12 = vmul.f32 %v4241_v50, %v4225_v62 }
0x30b0   : > { %v4244_v13 = vmul.f32 %v4695_v10, %v4242_v12 }
0x30b2   : > { %v4246_v14 = vadd.f32 %v4696_v41, %v4244_v13 }
0x30b4   : > { %4598 = vmatmul.msk.f32.vlgmr.msra.gmra.mxu2 %vm812_vm2, %v4246_v14 }
0x3137   : > { %v4275_v18 = vpop.f32.mrf.mxu2 }
0x3138   : > { %v4276_v19 = vadd.f32 %v4697_v15, %v4275_v18 }
0x313a   : > { %4278 = vst.msk [vmem:[%s773_s25] sm:$0xff] %vm778_vm1, %v4276_v19 }
0x313b PF: > { %s35_s4 = sadd.s32 1, %s4898_s4  }
0x313c   : > { %p32_p7 = scmp.ge.s32.totalorder %s35_s4, 4  }
0x313e   :  { %34 = sbr.rel (!%p32_p7) target bundleno = 13 (0xd), region = 186 }
0x3143   :  { %4298 = vsyncpa [#allocation3], 1 }
0x3144   :  { %4300 = vsyncpa [#allocation3 + $0x1], 1 }
0x3145   :  { %4301 = vsyncpa [#allocation5], 1 }

</bundles_post_ra>
